<compile_context>
chip_gen: v7x
topology: tpu7x:2x2x1
jax: 0.10.0
libtpu: 0.0.40
codegen_flags: <defaults>
</compile_context>

<pallas_src>
import functools

import jax
import jax.numpy as jnp
from jax import lax
from jax.experimental import pallas as pl
from jax.experimental.pallas import tpu as pltpu


# ----------------------------- fused Pallas kernel -------------------------- #

def _encoder_kernel(patches_ref,
                    ws_ref, ss_ref, bs_ref,       # stem 7x7/2 (im2col) + folded BN
                    w1d_ref, s1d_ref, b1d_ref,    # merged [downsample 1x1 | conv1 1x1] + BN
                    w2_ref, s2_ref, b2_ref,       # 3x3 conv, packed (9*CM, CM), + BN
                    w3_ref, s3_ref, b3_ref,       # 1x1 conv (CM, CO) + BN
                    out_ref,
                    *, Bblk, Ho, Wo, CS, CM, CO):
    f32 = jnp.float32
    bf16 = jnp.bfloat16
    Hp, Wp = Ho // 2, Wo // 2
    Kstem = patches_ref.shape[-1]
    M0 = Bblk * Ho * Wo
    M1 = Bblk * Hp * Wp

    # ---- Stem: 7x7/2 conv as one im2col matmul (bf16 MXU) + folded BN + ReLU ----
    x = patches_ref[...].reshape(M0, Kstem)
    h = jnp.dot(x, ws_ref[...], preferred_element_type=f32)
    h = jnp.maximum(h * ss_ref[...] + bs_ref[...], 0.0)            # (M0, CS) f32

    # ---- MaxPool 3x3 / stride 2 / pad 1 (exact, no selection matmul) ----
    # Output (i, j) pools input rows {2i-1, 2i, 2i+1} and cols {2j-1, 2j, 2j+1}.
    # Split rows/cols into even/odd phases; out-of-range "-1" taps are zero,
    # which is exact ONLY because h >= 0 post-ReLU (so -inf vs 0 maxpool padding
    # agree) -- keep the stem ReLU if this kernel is reused.
    h_sp = h.reshape(Bblk, Hp, 2, Wp, 2, CS)
    he = h_sp[:, :, 0]                                  # rows 2i   (Bblk,Hp,Wp,2,CS)
    ho = h_sp[:, :, 1]                                  # rows 2i+1
    ho_up = jnp.concatenate(
        [jnp.zeros((Bblk, 1, Wp, 2, CS), f32), ho[:, :Hp - 1]], axis=1)  # rows 2i-1
    rmax = jnp.maximum(jnp.maximum(he, ho), ho_up)      # (Bblk, Hp, Wp, 2, CS)
    ce = rmax[:, :, :, 0]                               # cols 2j   (Bblk,Hp,Wp,CS)
    co = rmax[:, :, :, 1]                               # cols 2j+1
    co_left = jnp.concatenate(
        [jnp.zeros((Bblk, Hp, 1, CS), f32), co[:, :, :Wp - 1]], axis=2)  # cols 2j-1
    x0 = jnp.maximum(jnp.maximum(ce, co), co_left)      # (Bblk, Hp, Wp, CS)
    x0b = x0.reshape(M1, CS).astype(bf16)

    # ---- Merged [downsample 1x1 | conv1 1x1] matmul sharing LHS x0b ----
    res = jnp.dot(x0b, w1d_ref[...], preferred_element_type=f32)   # (M1, CO+CM)
    res = res * s1d_ref[...] + b1d_ref[...]
    ds = res[:, :CO]                                    # downsample branch: BN only
    h1 = jnp.maximum(res[:, CO:], 0.0)                  # conv1 branch: BN + ReLU

    # ---- 3x3 conv (pad 1) as ONE matmul over 9 concatenated shifted taps ----
    h1b = h1.astype(bf16).reshape(Bblk, Hp, Wp, CM)
    zr = jnp.zeros((Bblk, 1, Wp, CM), bf16)
    zc = jnp.zeros((Bblk, Hp + 2, 1, CM), bf16)
    h1p = jnp.concatenate([zr, h1b, zr], axis=1)
    h1p = jnp.concatenate([zc, h1p, zc], axis=2)        # (Bblk, Hp+2, Wp+2, CM)
    taps = [h1p[:, di:di + Hp, dj:dj + Wp, :]
            for di in range(3) for dj in range(3)]      # K order (di, dj, cin)
    cat = jnp.concatenate(taps, axis=-1).reshape(M1, 9 * CM)
    h2 = jnp.dot(cat, w2_ref[...], preferred_element_type=f32)
    h2 = jnp.maximum(h2 * s2_ref[...] + b2_ref[...], 0.0)          # (M1, CM)

    # ---- 1x1 conv -> BN, residual add, final ReLU; lane-dense (CO=128) store ----
    h3 = jnp.dot(h2.astype(bf16), w3_ref[...], preferred_element_type=f32)
    h3 = h3 * s3_ref[...] + b3_ref[...]
    out = jnp.maximum(h3 + ds, 0.0)                                # (M1, CO)
    out_ref[...] = out.reshape(Bblk, Hp * Wp, CO).astype(out_ref.dtype)


def _encoder_forward_pallas(patches, packed, *, Ho, Wo, CS, CM, CO, bblk,
                            out_dtype=jnp.bfloat16):
    B, M0, Kstem = patches.shape
    assert M0 == Ho * Wo
    assert Ho % 2 == 0 and Wo % 2 == 0, "pool phase split assumes even spatial dims"
    assert B % bblk == 0
    Hp, Wp = Ho // 2, Wo // 2

    kern = functools.partial(_encoder_kernel, Bblk=bblk, Ho=Ho, Wo=Wo,
                             CS=CS, CM=CM, CO=CO)

    in_specs = [pl.BlockSpec((bblk, Ho * Wo, Kstem), lambda g: (g, 0, 0))]
    # Weights / folded-BN vectors: full 2-D arrays, constant index -> resident.
    in_specs += [pl.BlockSpec(p.shape, lambda g: (0, 0)) for p in packed]

    return pl.pallas_call(
        kern,
        out_shape=jax.ShapeDtypeStruct((B, Hp * Wp, CO), out_dtype),
        grid_spec=pltpu.PrefetchScalarGridSpec(
            num_scalar_prefetch=0,
            grid=(B // bblk,),
            in_specs=in_specs,
            out_specs=pl.BlockSpec((bblk, Hp * Wp, CO), lambda g: (g, 0, 0)),
        ),
        compiler_params=pltpu.CompilerParams(
            dimension_semantics=("parallel",),
            vmem_limit_bytes=32 * 1024 * 1024),
    )(patches, *packed)


# ------------------------------ wrapper plumbing ---------------------------- #

def _stem_patches(x_nhwc, kh, kw, stride, pad):
    """Wrapper-side im2col for the 7x7/2 stem.  Returns (B, Ho*Wo, kh*kw*Cin)."""
    # TODO(synk): move in-kernel (space-to-depth + shifted-tap matmul) at scale.
    B, H, W, C = x_nhwc.shape
    xp = jnp.pad(x_nhwc, ((0, 0), (pad, pad), (pad, pad), (0, 0)))
    Ho = (H + 2 * pad - kh) // stride + 1
    Wo = (W + 2 * pad - kw) // stride + 1
    cols = []
    for i in range(kh):
        for j in range(kw):
            cols.append(xp[:, i:i + Ho * stride:stride,
                           j:j + Wo * stride:stride, :])
    patches = jnp.stack(cols, axis=3)                  # (B, Ho, Wo, kh*kw, C)
    return patches.reshape(B, Ho * Wo, kh * kw * C), Ho, Wo


def _bn_params(key, c, eps=1e-5):
    k1, k2, k3, k4 = jax.random.split(key, 4)
    gamma = 1.0 + 0.1 * jax.random.normal(k1, (c,), jnp.float32)
    beta = 0.1 * jax.random.normal(k2, (c,), jnp.float32)
    mean = 0.1 * jax.random.normal(k3, (c,), jnp.float32)
    var = jnp.abs(jax.random.normal(k4, (c,), jnp.float32)) + 0.5
    return (gamma, beta, mean, var, eps)


def _conv_w(key, cout, cin, kh, kw):
    fan_in = cin * kh * kw
    return jax.random.normal(key, (cout, cin, kh, kw), jnp.float32) / jnp.sqrt(fan_in)


def _fold_bn(bn):
    gamma, beta, mean, var, eps = bn
    scale = gamma / jnp.sqrt(var + eps)
    bias = beta - mean * scale
    return scale, bias


def _pack_conv(w_oihw, bn):
    """OIHW conv weight -> (KH*KW*Cin, Cout) bf16; BN folded to f32 (1, Cout)."""
    cout, cin, kh, kw = w_oihw.shape
    w2 = jnp.transpose(w_oihw, (2, 3, 1, 0)).reshape(kh * kw * cin, cout)
    scale, bias = _fold_bn(bn)
    return (w2.astype(jnp.bfloat16),
            scale.reshape(1, cout).astype(jnp.float32),
            bias.reshape(1, cout).astype(jnp.float32))


def _pack_merged_1x1(wd, bnd, w1, bn1):
    """Merge downsample 1x1 and conv1 1x1 (shared LHS) into [wd | w1]."""
    wdp, sd, bd = _pack_conv(wd, bnd)
    w1p, s1, b1 = _pack_conv(w1, bn1)
    return (jnp.concatenate([wdp, w1p], axis=1),
            jnp.concatenate([sd, s1], axis=1),
            jnp.concatenate([bd, b1], axis=1))


# ------------------------------ Encoder module ------------------------------ #

class MyEncoderCNNPallas:
    """Scaled-down ResNet-style encoder matching MyEncoderCNN's forward semantics."""

    # TODO(synk): pretrained torchvision resnet50/googlenet/vgg19 weights are not
    # loadable here; same op structure (resnet trunk slice) with deterministic
    # synthetic weights at reduced width/depth.

    def __init__(self, key, cnn_type='resnet', stem_ch=64, mid_ch=64, out_ch=128):
        assert cnn_type in ['resnet', 'googlenet', 'vggnet']
        self.cnn_type = cnn_type
        self.stem_ch, self.mid_ch, self.out_ch = stem_ch, mid_ch, out_ch
        keys = jax.random.split(key, 10)
        # stem: conv 7x7/2 pad 3, BN, ReLU
        self.stem_w = _conv_w(keys[0], stem_ch, 3, 7, 7)
        self.stem_bn = _bn_params(keys[1], stem_ch)
        # bottleneck block
        self.w1 = _conv_w(keys[2], mid_ch, stem_ch, 1, 1)
        self.bn1 = _bn_params(keys[3], mid_ch)
        self.w2 = _conv_w(keys[4], mid_ch, mid_ch, 3, 3)
        self.bn2 = _bn_params(keys[5], mid_ch)
        self.w3 = _conv_w(keys[6], out_ch, mid_ch, 1, 1)
        self.bn3 = _bn_params(keys[7], out_ch)
        self.wd = _conv_w(keys[8], out_ch, stem_ch, 1, 1)   # downsample 1x1
        self.bnd = _bn_params(keys[9], out_ch)
        # Pre-packed kernel operands (bf16 weights for the MXU, f32 folded BN).
        self._packed = (
            *_pack_conv(self.stem_w, self.stem_bn),
            *_pack_merged_1x1(self.wd, self.bnd, self.w1, self.bn1),
            *_pack_conv(self.w2, self.bn2),
            *_pack_conv(self.w3, self.bn3),
        )

    def __call__(self, images_nchw):
        # images: (B, 3, H, W) PyTorch NCHW -> NHWC internally.
        x = jnp.transpose(images_nchw, (0, 2, 3, 1)).astype(jnp.float32)
        patches, Ho, Wo = _stem_patches(x, 7, 7, 2, 3)
        patches = patches.astype(jnp.bfloat16)
        B = patches.shape[0]
        # Batch-block the grid: big M per step, but keep >= 2 grid steps so both
        # v7x TensorCores get work (grid is a sequential loop on one TC).
        bblk = B // 2 if (B % 2 == 0 and B >= 2) else 1
        out = _encoder_forward_pallas(
            patches, self._packed, Ho=Ho, Wo=Wo,
            CS=self.stem_ch, CM=self.mid_ch, CO=self.out_ch, bblk=bblk,
            out_dtype=jnp.bfloat16)
        # PyTorch: output.permute(0, 2, 3, 1).view(B, -1, C); the kernel already
        # emits (B, H'*W', C) in h-major spatial order.
        return out


# ------------------------------ pure-JAX reference --------------------------- #

def _ref_forward(images_nchw, enc):
    """Plain XLA reference of the same scaled-down network (f32)."""
    x = jnp.transpose(images_nchw, (0, 2, 3, 1)).astype(jnp.float32)

    def conv_bn(x, w_oihw, bn, stride, pad, relu):
        w = jnp.transpose(w_oihw, (2, 3, 1, 0))   # HWIO
        y = lax.conv_general_dilated(
            x, w, (stride, stride), [(pad, pad), (pad, pad)],
            dimension_numbers=('NHWC', 'HWIO', 'NHWC'))
        scale, bias = _fold_bn(bn)
        y = y * scale + bias
        return jnp.maximum(y, 0.0) if relu else y

    h = conv_bn(x, enc.stem_w, enc.stem_bn, 2, 3, True)
    h = lax.reduce_window(h, -jnp.inf, lax.max,
                          (1, 3, 3, 1), (1, 2, 2, 1),
                          ((0, 0), (1, 1), (1, 1), (0, 0)))
    identity = h
    o = conv_bn(h, enc.w1, enc.bn1, 1, 0, True)
    o = conv_bn(o, enc.w2, enc.bn2, 1, 1, True)
    o = conv_bn(o, enc.w3, enc.bn3, 1, 0, False)
    ds = conv_bn(identity, enc.wd, enc.bnd, 1, 0, False)
    o = jnp.maximum(o + ds, 0.0)
    B, H, W, C = o.shape
    return o.reshape(B, H * W, C)


# ----------------------------------- Main ------------------------------------ #

if __name__ == "__main__":
    key = jax.random.PRNGKey(0)
    k_params, k_imgs = jax.random.split(key)

    encoder = MyEncoderCNNPallas(k_params, cnn_type='resnet')

    # Small analogue of [batch, 3, 224, 224] -> [4, 3, 32, 32]
    images = jax.random.normal(k_imgs, (4, 3, 32, 32), jnp.float32)

    feats = jax.jit(encoder.__call__)(images)
    feats = jax.block_until_ready(feats)

    assert feats.shape == (4, 8 * 8, 128), feats.shape
    assert feats.dtype == jnp.bfloat16, feats.dtype
    feats_f32 = feats.astype(jnp.float32)
    assert bool(jnp.all(jnp.isfinite(feats_f32)))

    # Loose correctness check vs the XLA f32 reference (bf16 MXU inputs and the
    # bf16 output cast introduce ~1% drift; real bugs produce O(100%) errors).
    ref = _ref_forward(images, encoder)
    err = float(jnp.max(jnp.abs(feats_f32 - ref)))
    scale = float(jnp.max(jnp.abs(ref))) + 1e-6
    assert err <= 8e-2 * scale + 2e-2, (err, scale)

    print("KERNEL_OK")
</pallas_src>

<mosaic_0001>
module attributes {stable_mosaic.version = 11 : i64} {
  func.func @_encoder_kernel(%arg0: i32, %arg1: memref<2x256x147xbf16, #tpu.memory_space<vmem>>, %arg2: memref<147x64xbf16, #tpu.memory_space<vmem>>, %arg3: memref<1x64xf32, #tpu.memory_space<vmem>>, %arg4: memref<1x64xf32, #tpu.memory_space<vmem>>, %arg5: memref<64x192xbf16, #tpu.memory_space<vmem>>, %arg6: memref<1x192xf32, #tpu.memory_space<vmem>>, %arg7: memref<1x192xf32, #tpu.memory_space<vmem>>, %arg8: memref<576x64xbf16, #tpu.memory_space<vmem>>, %arg9: memref<1x64xf32, #tpu.memory_space<vmem>>, %arg10: memref<1x64xf32, #tpu.memory_space<vmem>>, %arg11: memref<64x128xbf16, #tpu.memory_space<vmem>>, %arg12: memref<1x128xf32, #tpu.memory_space<vmem>>, %arg13: memref<1x128xf32, #tpu.memory_space<vmem>>, %arg14: memref<2x64x128xbf16, #tpu.memory_space<vmem>>) attributes {dimension_semantics = [#tpu.dimension_semantics<parallel>], iteration_bounds = array<i64: 2>, scalar_prefetch = 0 : i64, scratch_operands = 0 : i64, tpu.core_type = #tpu.core_type<tc>, window_params = [{transform_indices = @transform_0, window_bounds = array<i64: 2, 256, 147>}, {pipeline_mode = #tpu.pipeline_mode<synchronous>, transform_indices = @transform_1, window_bounds = array<i64: 147, 64>}, {pipeline_mode = #tpu.pipeline_mode<synchronous>, transform_indices = @transform_2, window_bounds = array<i64: 1, 64>}, {pipeline_mode = #tpu.pipeline_mode<synchronous>, transform_indices = @transform_3, window_bounds = array<i64: 1, 64>}, {pipeline_mode = #tpu.pipeline_mode<synchronous>, transform_indices = @transform_4, window_bounds = array<i64: 64, 192>}, {pipeline_mode = #tpu.pipeline_mode<synchronous>, transform_indices = @transform_5, window_bounds = array<i64: 1, 192>}, {pipeline_mode = #tpu.pipeline_mode<synchronous>, transform_indices = @transform_6, window_bounds = array<i64: 1, 192>}, {pipeline_mode = #tpu.pipeline_mode<synchronous>, transform_indices = @transform_7, window_bounds = array<i64: 576, 64>}, {pipeline_mode = #tpu.pipeline_mode<synchronous>, transform_indices = @transform_8, window_bounds = array<i64: 1, 64>}, {pipeline_mode = #tpu.pipeline_mode<synchronous>, transform_indices = @transform_9, window_bounds = array<i64: 1, 64>}, {pipeline_mode = #tpu.pipeline_mode<synchronous>, transform_indices = @transform_10, window_bounds = array<i64: 64, 128>}, {pipeline_mode = #tpu.pipeline_mode<synchronous>, transform_indices = @transform_11, window_bounds = array<i64: 1, 128>}, {pipeline_mode = #tpu.pipeline_mode<synchronous>, transform_indices = @transform_12, window_bounds = array<i64: 1, 128>}, {transform_indices = @transform_13, window_bounds = array<i64: 2, 64, 128>}]} {
    %c0 = arith.constant 0 : index
    %c0_0 = arith.constant 0 : index
    %c0_1 = arith.constant 0 : index
    %0 = vector.load %arg1[%c0, %c0_0, %c0_1] : memref<2x256x147xbf16, #tpu.memory_space<vmem>>, vector<2x256x147xbf16>
    %1 = vector.shape_cast %0 : vector<2x256x147xbf16> to vector<512x147xbf16>
    %c0_2 = arith.constant 0 : index
    %c0_3 = arith.constant 0 : index
    %2 = vector.load %arg2[%c0_2, %c0_3] : memref<147x64xbf16, #tpu.memory_space<vmem>>, vector<147x64xbf16>
    %cst = arith.constant dense<0.000000e+00> : vector<512x64xf32>
    %3 = tpu.matmul %1, %2, %cst {dimension_numbers = #tpu.dot_dimension_numbers<[1], [0], [0], [1], [0, 0, 1, 1], [], []>} : vector<512x147xbf16>, vector<147x64xbf16>, vector<512x64xf32> -> vector<512x64xf32>
    %c0_4 = arith.constant 0 : index
    %c0_5 = arith.constant 0 : index
    %4 = vector.load %arg3[%c0_4, %c0_5] : memref<1x64xf32, #tpu.memory_space<vmem>>, vector<1x64xf32>
    %5 = vector.broadcast %4 : vector<1x64xf32> to vector<512x64xf32>
    %6 = arith.mulf %3, %5 : vector<512x64xf32>
    %c0_6 = arith.constant 0 : index
    %c0_7 = arith.constant 0 : index
    %7 = vector.load %arg4[%c0_6, %c0_7] : memref<1x64xf32, #tpu.memory_space<vmem>>, vector<1x64xf32>
    %8 = vector.broadcast %7 : vector<1x64xf32> to vector<512x64xf32>
    %9 = arith.addf %6, %8 : vector<512x64xf32>
    %cst_8 = arith.constant 0.000000e+00 : f32
    %10 = vector.broadcast %cst_8 : f32 to vector<512x64xf32>
    %11 = arith.maximumf %9, %10 : vector<512x64xf32>
    %12 = vector.shape_cast %11 : vector<512x64xf32> to vector<2x8x2x8x2x64xf32>
    %13 = vector.extract_strided_slice %12 {offsets = [0, 0, 0, 0, 0, 0], sizes = [2, 8, 1, 8, 2, 64], strides = [1, 1, 1, 1, 1, 1]} : vector<2x8x2x8x2x64xf32> to vector<2x8x1x8x2x64xf32>
    %14 = vector.shape_cast %13 : vector<2x8x1x8x2x64xf32> to vector<2x8x8x2x64xf32>
    %15 = vector.extract_strided_slice %12 {offsets = [0, 0, 1, 0, 0, 0], sizes = [2, 8, 1, 8, 2, 64], strides = [1, 1, 1, 1, 1, 1]} : vector<2x8x2x8x2x64xf32> to vector<2x8x1x8x2x64xf32>
    %16 = vector.shape_cast %15 : vector<2x8x1x8x2x64xf32> to vector<2x8x8x2x64xf32>
    %cst_9 = arith.constant 0.000000e+00 : f32
    %17 = vector.broadcast %cst_9 : f32 to vector<2x1x8x2x64xf32>
    %18 = vector.extract_strided_slice %16 {offsets = [0, 0, 0, 0, 0], sizes = [2, 7, 8, 2, 64], strides = [1, 1, 1, 1, 1]} : vector<2x8x8x2x64xf32> to vector<2x7x8x2x64xf32>
    %19 = tpu.concatenate %17, %18 in 1 : vector<2x1x8x2x64xf32>, vector<2x7x8x2x64xf32> -> vector<2x8x8x2x64xf32>
    %20 = arith.maximumf %14, %16 : vector<2x8x8x2x64xf32>
    %21 = arith.maximumf %20, %19 : vector<2x8x8x2x64xf32>
    %22 = vector.extract_strided_slice %21 {offsets = [0, 0, 0, 0, 0], sizes = [2, 8, 8, 1, 64], strides = [1, 1, 1, 1, 1]} : vector<2x8x8x2x64xf32> to vector<2x8x8x1x64xf32>
    %23 = vector.shape_cast %22 : vector<2x8x8x1x64xf32> to vector<2x8x8x64xf32>
    %24 = vector.extract_strided_slice %21 {offsets = [0, 0, 0, 1, 0], sizes = [2, 8, 8, 1, 64], strides = [1, 1, 1, 1, 1]} : vector<2x8x8x2x64xf32> to vector<2x8x8x1x64xf32>
    %25 = vector.shape_cast %24 : vector<2x8x8x1x64xf32> to vector<2x8x8x64xf32>
    %cst_10 = arith.constant 0.000000e+00 : f32
    %26 = vector.broadcast %cst_10 : f32 to vector<2x8x1x64xf32>
    %27 = vector.extract_strided_slice %25 {offsets = [0, 0, 0, 0], sizes = [2, 8, 7, 64], strides = [1, 1, 1, 1]} : vector<2x8x8x64xf32> to vector<2x8x7x64xf32>
    %28 = tpu.concatenate %26, %27 in 2 : vector<2x8x1x64xf32>, vector<2x8x7x64xf32> -> vector<2x8x8x64xf32>
    %29 = arith.maximumf %23, %25 : vector<2x8x8x64xf32>
    %30 = arith.maximumf %29, %28 : vector<2x8x8x64xf32>
    %31 = vector.shape_cast %30 : vector<2x8x8x64xf32> to vector<128x64xf32>
    %32 = arith.truncf %31 : vector<128x64xf32> to vector<128x64xbf16>
    %c0_11 = arith.constant 0 : index
    %c0_12 = arith.constant 0 : index
    %33 = vector.load %arg5[%c0_11, %c0_12] : memref<64x192xbf16, #tpu.memory_space<vmem>>, vector<64x192xbf16>
    %cst_13 = arith.constant dense<0.000000e+00> : vector<128x192xf32>
    %34 = tpu.matmul %32, %33, %cst_13 {dimension_numbers = #tpu.dot_dimension_numbers<[1], [0], [0], [1], [0, 0, 1, 1], [], []>} : vector<128x64xbf16>, vector<64x192xbf16>, vector<128x192xf32> -> vector<128x192xf32>
    %c0_14 = arith.constant 0 : index
    %c0_15 = arith.constant 0 : index
    %35 = vector.load %arg6[%c0_14, %c0_15] : memref<1x192xf32, #tpu.memory_space<vmem>>, vector<1x192xf32>
    %36 = vector.broadcast %35 : vector<1x192xf32> to vector<128x192xf32>
    %37 = arith.mulf %34, %36 : vector<128x192xf32>
    %c0_16 = arith.constant 0 : index
    %c0_17 = arith.constant 0 : index
    %38 = vector.load %arg7[%c0_16, %c0_17] : memref<1x192xf32, #tpu.memory_space<vmem>>, vector<1x192xf32>
    %39 = vector.broadcast %38 : vector<1x192xf32> to vector<128x192xf32>
    %40 = arith.addf %37, %39 : vector<128x192xf32>
    %41 = vector.extract_strided_slice %40 {offsets = [0, 0], sizes = [128, 128], strides = [1, 1]} : vector<128x192xf32> to vector<128x128xf32>
    %42 = vector.extract_strided_slice %40 {offsets = [0, 128], sizes = [128, 64], strides = [1, 1]} : vector<128x192xf32> to vector<128x64xf32>
    %cst_18 = arith.constant 0.000000e+00 : f32
    %43 = vector.broadcast %cst_18 : f32 to vector<128x64xf32>
    %44 = arith.maximumf %42, %43 : vector<128x64xf32>
    %45 = arith.truncf %44 : vector<128x64xf32> to vector<128x64xbf16>
    %46 = vector.shape_cast %45 : vector<128x64xbf16> to vector<2x8x8x64xbf16>
    %cst_19 = arith.constant 0.000000e+00 : bf16
    %47 = vector.broadcast %cst_19 : bf16 to vector<2x1x8x64xbf16>
    %cst_20 = arith.constant 0.000000e+00 : bf16
    %48 = vector.broadcast %cst_20 : bf16 to vector<2x10x1x64xbf16>
    %49 = tpu.concatenate %47, %46, %47 in 1 : vector<2x1x8x64xbf16>, vector<2x8x8x64xbf16>, vector<2x1x8x64xbf16> -> vector<2x10x8x64xbf16>
    %50 = tpu.concatenate %48, %49, %48 in 2 : vector<2x10x1x64xbf16>, vector<2x10x8x64xbf16>, vector<2x10x1x64xbf16> -> vector<2x10x10x64xbf16>
    %51 = vector.extract_strided_slice %50 {offsets = [0, 0, 0, 0], sizes = [2, 8, 8, 64], strides = [1, 1, 1, 1]} : vector<2x10x10x64xbf16> to vector<2x8x8x64xbf16>
    %52 = vector.extract_strided_slice %50 {offsets = [0, 0, 1, 0], sizes = [2, 8, 8, 64], strides = [1, 1, 1, 1]} : vector<2x10x10x64xbf16> to vector<2x8x8x64xbf16>
    %53 = vector.extract_strided_slice %50 {offsets = [0, 0, 2, 0], sizes = [2, 8, 8, 64], strides = [1, 1, 1, 1]} : vector<2x10x10x64xbf16> to vector<2x8x8x64xbf16>
    %54 = vector.extract_strided_slice %50 {offsets = [0, 1, 0, 0], sizes = [2, 8, 8, 64], strides = [1, 1, 1, 1]} : vector<2x10x10x64xbf16> to vector<2x8x8x64xbf16>
    %55 = vector.extract_strided_slice %50 {offsets = [0, 1, 1, 0], sizes = [2, 8, 8, 64], strides = [1, 1, 1, 1]} : vector<2x10x10x64xbf16> to vector<2x8x8x64xbf16>
    %56 = vector.extract_strided_slice %50 {offsets = [0, 1, 2, 0], sizes = [2, 8, 8, 64], strides = [1, 1, 1, 1]} : vector<2x10x10x64xbf16> to vector<2x8x8x64xbf16>
    %57 = vector.extract_strided_slice %50 {offsets = [0, 2, 0, 0], sizes = [2, 8, 8, 64], strides = [1, 1, 1, 1]} : vector<2x10x10x64xbf16> to vector<2x8x8x64xbf16>
    %58 = vector.extract_strided_slice %50 {offsets = [0, 2, 1, 0], sizes = [2, 8, 8, 64], strides = [1, 1, 1, 1]} : vector<2x10x10x64xbf16> to vector<2x8x8x64xbf16>
    %59 = vector.extract_strided_slice %50 {offsets = [0, 2, 2, 0], sizes = [2, 8, 8, 64], strides = [1, 1, 1, 1]} : vector<2x10x10x64xbf16> to vector<2x8x8x64xbf16>
    %60 = tpu.concatenate %51, %52, %53, %54, %55, %56, %57, %58, %59 in 3 : vector<2x8x8x64xbf16>, vector<2x8x8x64xbf16>, vector<2x8x8x64xbf16>, vector<2x8x8x64xbf16>, vector<2x8x8x64xbf16>, vector<2x8x8x64xbf16>, vector<2x8x8x64xbf16>, vector<2x8x8x64xbf16>, vector<2x8x8x64xbf16> -> vector<2x8x8x576xbf16>
    %61 = vector.shape_cast %60 : vector<2x8x8x576xbf16> to vector<128x576xbf16>
    %c0_21 = arith.constant 0 : index
    %c0_22 = arith.constant 0 : index
    %62 = vector.load %arg8[%c0_21, %c0_22] : memref<576x64xbf16, #tpu.memory_space<vmem>>, vector<576x64xbf16>
    %cst_23 = arith.constant dense<0.000000e+00> : vector<128x64xf32>
    %63 = tpu.matmul %61, %62, %cst_23 {dimension_numbers = #tpu.dot_dimension_numbers<[1], [0], [0], [1], [0, 0, 1, 1], [], []>} : vector<128x576xbf16>, vector<576x64xbf16>, vector<128x64xf32> -> vector<128x64xf32>
    %c0_24 = arith.constant 0 : index
    %c0_25 = arith.constant 0 : index
    %64 = vector.load %arg9[%c0_24, %c0_25] : memref<1x64xf32, #tpu.memory_space<vmem>>, vector<1x64xf32>
    %65 = vector.broadcast %64 : vector<1x64xf32> to vector<128x64xf32>
    %66 = arith.mulf %63, %65 : vector<128x64xf32>
    %c0_26 = arith.constant 0 : index
    %c0_27 = arith.constant 0 : index
    %67 = vector.load %arg10[%c0_26, %c0_27] : memref<1x64xf32, #tpu.memory_space<vmem>>, vector<1x64xf32>
    %68 = vector.broadcast %67 : vector<1x64xf32> to vector<128x64xf32>
    %69 = arith.addf %66, %68 : vector<128x64xf32>
    %cst_28 = arith.constant 0.000000e+00 : f32
    %70 = vector.broadcast %cst_28 : f32 to vector<128x64xf32>
    %71 = arith.maximumf %69, %70 : vector<128x64xf32>
    %72 = arith.truncf %71 : vector<128x64xf32> to vector<128x64xbf16>
    %c0_29 = arith.constant 0 : index
    %c0_30 = arith.constant 0 : index
    %73 = vector.load %arg11[%c0_29, %c0_30] : memref<64x128xbf16, #tpu.memory_space<vmem>>, vector<64x128xbf16>
    %cst_31 = arith.constant dense<0.000000e+00> : vector<128x128xf32>
    %74 = tpu.matmul %72, %73, %cst_31 {dimension_numbers = #tpu.dot_dimension_numbers<[1], [0], [0], [1], [0, 0, 1, 1], [], []>} : vector<128x64xbf16>, vector<64x128xbf16>, vector<128x128xf32> -> vector<128x128xf32>
    %c0_32 = arith.constant 0 : index
    %c0_33 = arith.constant 0 : index
    %75 = vector.load %arg12[%c0_32, %c0_33] : memref<1x128xf32, #tpu.memory_space<vmem>>, vector<1x128xf32>
    %76 = vector.broadcast %75 : vector<1x128xf32> to vector<128x128xf32>
    %77 = arith.mulf %74, %76 : vector<128x128xf32>
    %c0_34 = arith.constant 0 : index
    %c0_35 = arith.constant 0 : index
    %78 = vector.load %arg13[%c0_34, %c0_35] : memref<1x128xf32, #tpu.memory_space<vmem>>, vector<1x128xf32>
    %79 = vector.broadcast %78 : vector<1x128xf32> to vector<128x128xf32>
    %80 = arith.addf %77, %79 : vector<128x128xf32>
    %81 = arith.addf %80, %41 : vector<128x128xf32>
    %cst_36 = arith.constant 0.000000e+00 : f32
    %82 = vector.broadcast %cst_36 : f32 to vector<128x128xf32>
    %83 = arith.maximumf %81, %82 : vector<128x128xf32>
    %84 = vector.shape_cast %83 : vector<128x128xf32> to vector<2x64x128xf32>
    %85 = arith.truncf %84 : vector<2x64x128xf32> to vector<2x64x128xbf16>
    %c0_37 = arith.constant 0 : index
    %c0_38 = arith.constant 0 : index
    %c0_39 = arith.constant 0 : index
    %86 = vector.load %arg14[%c0_37, %c0_38, %c0_39] : memref<2x64x128xbf16, #tpu.memory_space<vmem>>, vector<2x64x128xbf16>
    tpu.vector_store %arg14[%c0_37, %c0_38, %c0_39], %85 {strides = array<i32>} : memref<2x64x128xbf16, #tpu.memory_space<vmem>>, vector<2x64x128xbf16>,
    return
  }
  func.func @transform_0(%arg0: i32) -> (i32, i32, i32) {
    %c0_i32 = arith.constant 0 : i32
    %c0_i32_0 = arith.constant 0 : i32
    %c0_i32_1 = arith.constant 0 : i32
    return %arg0, %c0_i32, %c0_i32_0 : i32, i32, i32
  }
  func.func @transform_1(%arg0: i32) -> (i32, i32) {
    %c0_i32 = arith.constant 0 : i32
    %c0_i32_0 = arith.constant 0 : i32
    %c0_i32_1 = arith.constant 0 : i32
    return %c0_i32, %c0_i32_0 : i32, i32
  }
  func.func @transform_2(%arg0: i32) -> (i32, i32) {
    %c0_i32 = arith.constant 0 : i32
    %c0_i32_0 = arith.constant 0 : i32
    %c0_i32_1 = arith.constant 0 : i32
    return %c0_i32, %c0_i32_0 : i32, i32
  }
  func.func @transform_3(%arg0: i32) -> (i32, i32) {
    %c0_i32 = arith.constant 0 : i32
    %c0_i32_0 = arith.constant 0 : i32
    %c0_i32_1 = arith.constant 0 : i32
    return %c0_i32, %c0_i32_0 : i32, i32
  }
  func.func @transform_4(%arg0: i32) -> (i32, i32) {
    %c0_i32 = arith.constant 0 : i32
    %c0_i32_0 = arith.constant 0 : i32
    %c0_i32_1 = arith.constant 0 : i32
    return %c0_i32, %c0_i32_0 : i32, i32
  }
  func.func @transform_5(%arg0: i32) -> (i32, i32) {
    %c0_i32 = arith.constant 0 : i32
    %c0_i32_0 = arith.constant 0 : i32
    %c0_i32_1 = arith.constant 0 : i32
    return %c0_i32, %c0_i32_0 : i32, i32
  }
  func.func @transform_6(%arg0: i32) -> (i32, i32) {
    %c0_i32 = arith.constant 0 : i32
    %c0_i32_0 = arith.constant 0 : i32
    %c0_i32_1 = arith.constant 0 : i32
    return %c0_i32, %c0_i32_0 : i32, i32
  }
  func.func @transform_7(%arg0: i32) -> (i32, i32) {
    %c0_i32 = arith.constant 0 : i32
    %c0_i32_0 = arith.constant 0 : i32
    %c0_i32_1 = arith.constant 0 : i32
    return %c0_i32, %c0_i32_0 : i32, i32
  }
  func.func @transform_8(%arg0: i32) -> (i32, i32) {
    %c0_i32 = arith.constant 0 : i32
    %c0_i32_0 = arith.constant 0 : i32
    %c0_i32_1 = arith.constant 0 : i32
    return %c0_i32, %c0_i32_0 : i32, i32
  }
  func.func @transform_9(%arg0: i32) -> (i32, i32) {
    %c0_i32 = arith.constant 0 : i32
    %c0_i32_0 = arith.constant 0 : i32
    %c0_i32_1 = arith.constant 0 : i32
    return %c0_i32, %c0_i32_0 : i32, i32
  }
  func.func @transform_10(%arg0: i32) -> (i32, i32) {
    %c0_i32 = arith.constant 0 : i32
    %c0_i32_0 = arith.constant 0 : i32
    %c0_i32_1 = arith.constant 0 : i32
    return %c0_i32, %c0_i32_0 : i32, i32
  }
  func.func @transform_11(%arg0: i32) -> (i32, i32) {
    %c0_i32 = arith.constant 0 : i32
    %c0_i32_0 = arith.constant 0 : i32
    %c0_i32_1 = arith.constant 0 : i32
    return %c0_i32, %c0_i32_0 : i32, i32
  }
  func.func @transform_12(%arg0: i32) -> (i32, i32) {
    %c0_i32 = arith.constant 0 : i32
    %c0_i32_0 = arith.constant 0 : i32
    %c0_i32_1 = arith.constant 0 : i32
    return %c0_i32, %c0_i32_0 : i32, i32
  }
  func.func @transform_13(%arg0: i32) -> (i32, i32, i32) {
    %c0_i32 = arith.constant 0 : i32
    %c0_i32_0 = arith.constant 0 : i32
    %c0_i32_1 = arith.constant 0 : i32
    return %arg0, %c0_i32, %c0_i32_0 : i32, i32, i32
  }
}

</mosaic_0001>

<bundles_post_ra>
// kernel: a_call__.1
= control target key start
LH: loop header
LB: loop body
LE: loop exit
PB: predicated region body
PF: predicated region fallthrough
CT: control target
= control target key end

     0   :  { %s12493_s0 = inlined_call_operand.vmem [shape: bf16[4,256,147], index: 0, kind: input, shape index: {}]   ;;  %s12494_s1 = inlined_call_operand.vmem [shape: bf16[147,64], index: 1, kind: input, shape index: {}]   ;;  %s12495_s2 = inlined_call_operand.vmem [shape: f32[1,64], index: 2, kind: input, shape index: {}]   ;;  %s12496_s3 = inlined_call_operand.vmem [shape: f32[1,64], index: 3, kind: input, shape index: {}]   ;;  %s12497_s4 = inlined_call_operand.vmem [shape: bf16[64,192], index: 4, kind: input, shape index: {}]   ;;  %s12498_s5 = inlined_call_operand.vmem [shape: f32[1,192], index: 5, kind: input, shape index: {}]   ;;  %s12499_s6 = inlined_call_operand.vmem [shape: f32[1,192], index: 6, kind: input, shape index: {}]   ;;  %s12500_s7 = inlined_call_operand.vmem [shape: bf16[576,64], index: 7, kind: input, shape index: {}]   ;;  %s12501_s8 = inlined_call_operand.vmem [shape: f32[1,64], index: 8, kind: input, shape index: {}]   ;;  %s12502_s9 = inlined_call_operand.vmem [shape: f32[1,64], index: 9, kind: input, shape index: {}]   ;;  %s12503_s10 = inlined_call_operand.vmem [shape: bf16[64,128], index: 10, kind: input, shape index: {}]   ;;  %s12504_s11 = inlined_call_operand.vmem [shape: f32[1,128], index: 11, kind: input, shape index: {}]   ;;  %s12505_s12 = inlined_call_operand.vmem [shape: f32[1,128], index: 12, kind: input, shape index: {}]   ;;  %s12506_s13 = inlined_call_operand.hbm [shape: bf16[4,64,128], index: 13, kind: output, shape index: {}]  }
   0x1   :  { %12540 = sst [smem:[#allocation38_spill]] %s12493_s0 }
   0x2   :  { %18 = vsyncpa [#allocation3], 0 }
   0x3   :  { %20 = vsyncpa [#allocation3 + $0x1], 0  ;;  %s8734_s25 = smov 0   ;;  %s8736_s26 = smov 0  }
   0x4   :  { %s8738_s27 = smov 0   ;;  %s8740_s28 = smov 0  }
   0x5 LB: > { %s8755_s29 = sadd.s32 4294967295, %s8656_s28   ;;  %s7712_s30 = sadd.s32 4294967294, %s8656_s28   ;;  %s8656_s28 = sphi %s8740_s28, %s12837_s28   ;;  %s8652_s27 = sphi %s8738_s27, %s12836_s27   ;;  %s8648_s26 = sphi %s8736_s26, %s12835_s26   ;;  %s8644_s25 = sphi %s8734_s25, %s12834_s25  }
   0x6   : > { %s8759_s14 = sadd.s32 1, %s8656_s28   ;;  %s311_s15 = sadd.s32 1, %s8652_s27 }
   0x7   : > { %s308_s16 = ssub.s32 %s8656_s28, %s8759_s14  ;;  %p321_p0 = scmp.ne.s32.totalorder %s8652_s27, %s8648_s26 }
   0x8   : > { %p309_p1 = scmp.eq.s32.totalorder %s308_s16, 0  ;;  %p322_p2 = scmp.eq.s32.totalorder %s8755_s29, 1 }
   0x9   : > { %p327_p3 = scmp.ne.s32.totalorder %s8648_s26, %s8644_s25  ;;  %p328_p4 = scmp.eq.s32.totalorder %s7712_s30, 1 }
   0xa   : > { %s8770_s17 = scalar_select %p309_p1, %s8652_s27, %s311_s15  }
   0xb   : > { %p8772_p5 = por %p322_p2, %p321_p0  ;;  %p8776_p6 = por %p328_p4, %p327_p3 }
   0xc   : > { %12541 = sst [smem:[#allocation5_spill]] %s8770_s17  ;;  %p7715_p7 = scmp.ge.s32.totalorder %s8656_s28, 1 }
   0xd   : > { %p392_p8 = scmp.lt.s32.totalorder %s8656_s28, 3 }
   0xf   : > { %p393_p9 = pnand %p7715_p7, %p392_p8 }
  0x11   : > { %396 = sbr.rel (%p393_p9) target bundleno = 1719 (0x6b7), region = 72 }
  0x18   : > { %v8430_v0 = vld [vmem:[%s12494_s1] sm:$0xff]   ;;  %v12507_v1 = vmov 0   ;;  %v8431_v2 = vld [vmem:[%s12494_s1 + $0x8] sm:$0xff]   ;;  %v8432_v3 = vld [vmem:[%s12494_s1 + $0x10] sm:$0xff]   ;;  %s7717_s15 = sshll.u32 %s8755_s29, 1  ;;  %s12544_s0 = sld [smem:[#allocation38_spill]] }
  0x19   : > { %978 = vmatprep.subr.bf16.mxu0 %v12507_v1  ;;  %5689 = vmatprep.mubr.bf16.mxu1 %v12507_v1  ;;  %p438_p10 = scmp.lt.s32.totalorder %s7717_s15, 3  ;;  %v8433_v4 = vld [vmem:[%s12494_s1 + $0x18] sm:$0xff]   ;;  %v8434_v5 = vld [vmem:[%s12494_s1 + $0x20] sm:$0xff]   ;;  %vm874_vm0 = vcmask 154624   ;;  %v8435_v7 = vld [vmem:[%s12494_s1 + $0x28] sm:$0xff]   ;;  %vm971_vm1 = vcmask 1040384  }
  0x1a   : > { %979 = vmatpush1.bf16.msra.mxu0 %v8430_v0  ;;  %v8436_v8 = vld [vmem:[%s12494_s1 + $0x30] sm:$0xff]   ;;  %v8437_v9 = vld [vmem:[%s12494_s1 + $0x38] sm:$0xff]   ;;  %vm972_vm2 = vcmask 1041408   ;;  %v8659_v10 = vmov 65535   ;;  %v8438_v12 = vld [vmem:[%s12494_s1 + $0x40] sm:$0xff]   ;;  %vm3697_vm3 = vcmask 1042434  }
  0x1b   : > { %980 = vmatprep.subr.bf16.mxu0 %v12507_v1  ;;  %s12839_s15 = smov (!%p438_p10, %s7717_s15), 3  ;;  %v973_v11 = vsel %vm971_vm1, 4294967295, %v8659_v10  ;;  %v8439_v13 = vld [vmem:[%s12494_s1 + $0x48] ss:$0 sps:$4 sm:$0x33]   ;;  %vm3699_vm4 = vcmask 1043459  }
  0x1c   : > { %s8104_s21 = sshll.u32 %s12839_s15, 8  ;;  %v974_v14 = vsel %vm972_vm2, %v973_v11, 0  ;;  %v8536_v56 = vld [vmem:[%s12497_s4 + $0x4] ss:$8 sps:$4 sm:$0xff]   ;;  %v8538_v57 = vld [vmem:[%s12497_s4] ss:$8 sps:$4 sm:$0xff]  }
  0x1d   : > { %v976_v15 = vand.u32 %v8439_v13, %v974_v14  ;;  %5657 = vmatprep.subr.bf16.mxu1 %v8536_v56  ;;  %v8539_v60 = vld [vmem:[%s12497_s4 + $0x14] ss:$8 sps:$4 sm:$0xff]   ;;  %v8541_v61 = vld [vmem:[%s12497_s4 + $0x10] ss:$8 sps:$4 sm:$0xff]   ;;  %v8542_v63 = vld [vmem:[%s12497_s4 + $0x24] ss:$8 sps:$4 sm:$0xff]  }
  0x1e   : > { %981 = vmatpush1.bf16.msra.mxu0 %v8431_v2  ;;  %s8803_s17 = scalar_lea.vmem %s12544_s0, %s8104_s21  ;;  %5658 = vmatpush1.bf16.msra.mxu1 %v8538_v57  ;;  %v8544_v2 = vld [vmem:[%s12497_s4 + $0x20] ss:$8 sps:$4 sm:$0xff]   ;;  %vm3701_vm5 = vcmask 1044484   ;;  %vm3703_vm6 = vcmask 1045509   ;;  %vm3705_vm7 = vcmask 1046534   ;;  %vm3707_vm8 = vcmask 1047559  }
  0x1f   : > { %982 = vmatprep.subr.bf16.mxu0 %v12507_v1  ;;  %v8442_v6 = vld [vmem:[%s8803_s17 + $0x4] ss:$8 sps:$4 sm:$0xff]   ;;  %v8440_v16 = vld [vmem:[%s8803_s17] ss:$8 sps:$4 sm:$0xff]   ;;  %v8443_v17 = vld [vmem:[%s8803_s17 + $0x14] ss:$8 sps:$4 sm:$0xff]   ;;  %5659 = vmatprep.subr.bf16.mxu1 %v8539_v60 }
  0x20   : > { %7794 = vmatprep.mubr.msk.bf16.mxu0 %vm874_vm0, %v8442_v6  ;;  %v8445_v18 = vld [vmem:[%s8803_s17 + $0x10] ss:$8 sps:$4 sm:$0xff]   ;;  %v8446_v19 = vld [vmem:[%s8803_s17 + $0x24] ss:$8 sps:$4 sm:$0xff]   ;;  %v8448_v20 = vld [vmem:[%s8803_s17 + $0x20] ss:$8 sps:$4 sm:$0xff]  }
  0x21   : > { %v8449_v21 = vld [vmem:[%s8803_s17 + $0x34] ss:$8 sps:$4 sm:$0xff]   ;;  %v8451_v22 = vld [vmem:[%s8803_s17 + $0x30] ss:$8 sps:$4 sm:$0xff]   ;;  %v8452_v23 = vld [vmem:[%s8803_s17 + $0x44] ss:$8 sps:$4 sm:$0xff]  }
  0x22   : > { %983 = vmatpush1.bf16.msra.mxu0 %v8432_v3  ;;  %v8454_v24 = vld [vmem:[%s8803_s17 + $0x40] ss:$8 sps:$4 sm:$0xff]   ;;  %v8455_v25 = vld [vmem:[%s8803_s17 + $0x54] ss:$8 sps:$4 sm:$0xff]   ;;  %v8457_v26 = vld [vmem:[%s8803_s17 + $0x50] ss:$8 sps:$4 sm:$0xff]   ;;  %5660 = vmatpush1.bf16.msra.mxu1 %v8541_v61 }
  0x23   : > { %984 = vmatprep.subr.bf16.mxu0 %v12507_v1  ;;  %v8458_v27 = vld [vmem:[%s8803_s17 + $0x64] ss:$8 sps:$4 sm:$0xff]   ;;  %v8460_v28 = vld [vmem:[%s8803_s17 + $0x60] ss:$8 sps:$4 sm:$0xff]   ;;  %v8461_v29 = vld [vmem:[%s8803_s17 + $0x74] ss:$8 sps:$4 sm:$0xff]   ;;  %5661 = vmatprep.subr.bf16.mxu1 %v8542_v63 }
  0x24   : > { %v8463_v30 = vld [vmem:[%s8803_s17 + $0x70] ss:$8 sps:$4 sm:$0xff]   ;;  %v8464_v31 = vld [vmem:[%s8803_s17 + $0x84] ss:$8 sps:$4 sm:$0xff]   ;;  %v8466_v32 = vld [vmem:[%s8803_s17 + $0x80] ss:$8 sps:$4 sm:$0xff]  }
  0x25   : > { %v8467_v33 = vld [vmem:[%s8803_s17 + $0x94] ss:$8 sps:$4 sm:$0xff]   ;;  %v8469_v34 = vld [vmem:[%s8803_s17 + $0x90] ss:$8 sps:$4 sm:$0xff]   ;;  %v8470_v35 = vld [vmem:[%s8803_s17 + $0xa4] ss:$8 sps:$4 sm:$0xff]  }
  0x26   : > { %985 = vmatpush1.bf16.msra.mxu0 %v8433_v4  ;;  %v8472_v36 = vld [vmem:[%s8803_s17 + $0xa0] ss:$8 sps:$4 sm:$0xff]   ;;  %v8473_v37 = vld [vmem:[%s8803_s17 + $0xb4] ss:$8 sps:$4 sm:$0xff]   ;;  %v8475_v38 = vld [vmem:[%s8803_s17 + $0xb0] ss:$8 sps:$4 sm:$0xff]   ;;  %5662 = vmatpush1.bf16.msra.mxu1 %v8544_v2 }
  0x27   : > { %986 = vmatprep.subr.bf16.mxu0 %v12507_v1  ;;  %v8476_v39 = vld [vmem:[%s8803_s17 + $0xc4] ss:$8 sps:$4 sm:$0xff]   ;;  %v8478_v40 = vld [vmem:[%s8803_s17 + $0xc0] ss:$8 sps:$4 sm:$0xff]   ;;  %v8479_v41 = vld [vmem:[%s8803_s17 + $0xd4] ss:$8 sps:$4 sm:$0xff]  }
  0x28   : > { %v8481_v42 = vld [vmem:[%s8803_s17 + $0xd0] ss:$8 sps:$4 sm:$0xff]   ;;  %v8482_v43 = vld [vmem:[%s8803_s17 + $0xe4] ss:$8 sps:$4 sm:$0xff]   ;;  %v8484_v44 = vld [vmem:[%s8803_s17 + $0xe0] ss:$8 sps:$4 sm:$0xff]  }
  0x29   : > { %v8485_v45 = vld [vmem:[%s8803_s17 + $0xf4] ss:$8 sps:$4 sm:$0xff]   ;;  %v8487_v46 = vld [vmem:[%s8803_s17 + $0xf0] ss:$8 sps:$4 sm:$0xff]   ;;  %v8488_v47 = vld [vmem:[%s8803_s17 + $0x104] ss:$8 sps:$4 sm:$0xff]  }
  0x2a   : > { %987 = vmatpush1.bf16.msra.mxu0 %v8434_v5  ;;  %v8490_v48 = vld [vmem:[%s8803_s17 + $0x100] ss:$8 sps:$4 sm:$0xff]   ;;  %v8491_v49 = vld [vmem:[%s8803_s17 + $0x114] ss:$8 sps:$4 sm:$0xff]   ;;  %v8493_v50 = vld [vmem:[%s8803_s17 + $0x110] ss:$8 sps:$4 sm:$0xff]  }
  0x2b   : > { %988 = vmatprep.subr.bf16.mxu0 %v12507_v1  ;;  %v8494_v51 = vld [vmem:[%s8803_s17 + $0x124] ss:$8 sps:$4 sm:$0xff]   ;;  %v8496_v52 = vld [vmem:[%s8803_s17 + $0x120] ss:$8 sps:$4 sm:$0xff]   ;;  %v8497_v53 = vld [vmem:[%s8803_s17 + $0x134] ss:$8 sps:$4 sm:$0xff]  }
  0x2c   : > { %v8499_v54 = vld [vmem:[%s8803_s17 + $0x130] ss:$8 sps:$4 sm:$0xff]   ;;  %v8500_v55 = vld [vmem:[%s8803_s17 + $0x144] ss:$8 sps:$4 sm:$0xff]   ;;  %v8502_v58 = vld [vmem:[%s8803_s17 + $0x140] ss:$8 sps:$4 sm:$0xff]  }
  0x2d   : > { %v8503_v59 = vld [vmem:[%s8803_s17 + $0x154] ss:$8 sps:$4 sm:$0xff]   ;;  %v8505_v62 = vld [vmem:[%s8803_s17 + $0x150] ss:$8 sps:$4 sm:$0xff]   ;;  %v8506_v0 = vld [vmem:[%s8803_s17 + $0x164] ss:$8 sps:$4 sm:$0xff]  }
  0x2e   : > { %989 = vmatpush1.bf16.msra.mxu0 %v8435_v7  ;;  %v8545_v3 = vld [vmem:[%s12497_s4 + $0x34] ss:$8 sps:$4 sm:$0xff]   ;;  %v8547_v4 = vld [vmem:[%s12497_s4 + $0x30] ss:$8 sps:$4 sm:$0xff]   ;;  %v8508_v5 = vld [vmem:[%s8803_s17 + $0x160] ss:$8 sps:$4 sm:$0xff]  }
  0x2f   : > { %990 = vmatprep.subr.bf16.mxu0 %v12507_v1  ;;  %5663 = vmatprep.subr.bf16.mxu1 %v8545_v3  ;;  %v8509_v6 = vld [vmem:[%s8803_s17 + $0x174] ss:$8 sps:$4 sm:$0xff]   ;;  %v8511_v7 = vld [vmem:[%s8803_s17 + $0x170] ss:$8 sps:$4 sm:$0xff]   ;;  %v8520_v13 = vld [vmem:[%s8803_s17 + $0x1a0] ss:$8 sps:$4 sm:$0xff]  }
  0x30   : > { %5664 = vmatpush1.bf16.msra.mxu1 %v8547_v4  ;;  %v8515_v10 = vld [vmem:[%s8803_s17 + $0x194] ss:$8 sps:$4 sm:$0xff]   ;;  %v8517_v11 = vld [vmem:[%s8803_s17 + $0x190] ss:$8 sps:$4 sm:$0xff]   ;;  %vm5360_vm9 = vcmask 1041409   ;;  %vm5632_vm10 = vcmask 523264  }
  0x31   : > { %v8521_v14 = vld [vmem:[%s8803_s17 + $0x1b4] ss:$8 sps:$4 sm:$0xff]   ;;  %v8529_v63 = vld [vmem:[%s8803_s17 + $0x1d0] ss:$8 sps:$4 sm:$0xff]   ;;  %vm6059_vm11 = vsmask.f32 256 }
  0x32   : > { %991 = vmatpush1.bf16.msra.mxu0 %v8436_v8  ;;  %v8512_v8 = vld [vmem:[%s8803_s17 + $0x184] ss:$8 sps:$4 sm:$0xff]   ;;  %vm11574_vm12 = vmand %vm971_vm1, %vm6059_vm11  ;;  %vm6078_vm13 = vcmask 1044480   ;;  %vm6079_vm14 = vsmask.f32 4352  ;;  %s12539_s24 = smov 64  }
  0x33   : > { %992 = vmatprep.subr.bf16.mxu0 %v12507_v1  ;;  %vm11584_vm15 = vmand %vm6078_vm13, %vm6079_vm14  ;;  %s434_s15 = sand.u32 1, %s8648_s26   ;;  %s8138_s22 = sshll.u32 %s8755_s29, 10 }
  0x34   : > { %s7716_s20 = sshll.u32 %s434_s15, 6  ;;  %s12442_s16 = scalar_lea.hbm %s12506_s13, %s8138_s22 }
  0x35   : > { %s12399_s21 = scalar_lea.vmem [#allocation2], %s7716_s20  ;;  %s12450_s29 = scalar_lea.sflag [#allocation3], %s434_s15 }
  0x36   : > { %993 = vmatpush1.bf16.msra.mxu0 %v8437_v9  ;;  %v8514_v9 = vld [vmem:[%s8803_s17 + $0x180] ss:$8 sps:$4 sm:$0xff]   ;;  %s7650_s23 = sshll.u32 %s12399_s21, 4  ;;  %s12444_s23 = int_to_ptr.vmem [resolvable:$true] %s7650_s23 }
  0x37   : > { %994 = vmatprep.subr.bf16.mxu0 %v12507_v1  ;;  %s8594_s20 = scalar_lea.vmem %s12444_s23, 1024 }
  0x38   : > { %p8595_p11 = scmp.ne.s32.totalorder %s12444_s23, %s8594_s20 }
  0x3a   : > { %995 = vmatpush1.bf16.msra.mxu0 %v8438_v12  ;;  %v8518_v12 = vld [vmem:[%s8803_s17 + $0x1a4] ss:$8 sps:$4 sm:$0xff]   ;;  %p8596_p12 = pnand %p8595_p11, %p8772_p5 }
  0x3b   : > { %996 = vmatprep.subr.bf16.mxu0 %v12507_v1 }
  0x3c   : > { %p8597_p13 = pneg %p8596_p12 }
  0x3e   : > { %997 = vmatpush1.bf16.msra.mxu0 %v976_v15  ;;  %v8939_v15 = vld [vmem:[%s12495_s2] ss:$0 sm:$0xff] }
  0x41   : > { %1011 = vmatmul.mubr.bf16.vlgmr.msra.gmra.mrb[0].mxu0 %v8440_v16 }
  0x42   : > { %7795 = vmatprep.mubr.msk.bf16.mxu0 %vm874_vm0, %v8443_v17  ;;  %v8945_v17 = vld [vmem:[%s12496_s3] ss:$0 sm:$0xff] }
  0x49   : > { %1019 = vmatmul.mubr.bf16.gmra.mrb[4].mxu0 %v8445_v18  ;;  %v8660_v18 = vmov 1983009808  }
  0x4a   : > { %7796 = vmatprep.mubr.msk.bf16.mxu0 %vm874_vm0, %v8446_v19  ;;  %v1539_v19 = vunpack.c.l.s4 %v8660_v18 }
  0x51   : > { %1027 = vmatmul.mubr.bf16.gmra.mrb[8].mxu0 %v8448_v20  ;;  %v1541_v20 = vlaneseq }
  0x52   : > { %7797 = vmatprep.mubr.msk.bf16.mxu0 %vm874_vm0, %v8449_v21 }
  0x59   : > { %1035 = vmatmul.mubr.bf16.gmra.mrb[12].mxu0 %v8451_v22 }
  0x5a   : > { %7798 = vmatprep.mubr.msk.bf16.mxu0 %vm874_vm0, %v8452_v23  ;;  %v8523_v23 = vld [vmem:[%s8803_s17 + $0x1b0] ss:$8 sps:$4 sm:$0xff]  }
  0x61   : > { %1043 = vmatmul.mubr.bf16.gmra.mrb[16].mxu0 %v8454_v24 }
  0x62   : > { %7799 = vmatprep.mubr.msk.bf16.mxu0 %vm874_vm0, %v8455_v25  ;;  %v8524_v25 = vld [vmem:[%s8803_s17 + $0x1c4] ss:$8 sps:$4 sm:$0xff]  }
  0x69   : > { %1051 = vmatmul.mubr.bf16.gmra.mrb[20].mxu0 %v8457_v26 }
  0x6a   : > { %7800 = vmatprep.mubr.msk.bf16.mxu0 %vm874_vm0, %v8458_v27 }
  0x71   : > { %1059 = vmatmul.mubr.bf16.gmra.mrb[24].mxu0 %v8460_v28 }
  0x72   : > { %7801 = vmatprep.mubr.msk.bf16.mxu0 %vm874_vm0, %v8461_v29  ;;  %v1540_v29 = vunpack.c.0.s8 %v1539_v19 }
  0x79   : > { %1067 = vmatmul.mubr.bf16.gmra.mrb[28].mxu0 %v8463_v30  ;;  %v8952_v30 = vshrl.u32 %v1541_v20, 7 }
  0x7a   : > { %7802 = vmatprep.mubr.msk.bf16.mxu0 %vm874_vm0, %v8464_v31 }
  0x7b   : > { %12545 = vst [vmem:[#allocation6_spill] sm:$0xff] %v8952_v30 }
  0x81   : > { %1075 = vmatmul.mubr.bf16.gmra.mrb[32].mxu0 %v8466_v32 }
  0x82   : > { %7803 = vmatprep.mubr.msk.bf16.mxu0 %vm874_vm0, %v8467_v33 }
  0x89   : > { %1083 = vmatmul.mubr.bf16.gmra.mrb[36].mxu0 %v8469_v34  ;;  %v8957_v34 = vsub.s32 %v1540_v29, %v8952_v30 }
  0x8a   : > { %7804 = vmatprep.mubr.msk.bf16.mxu0 %vm874_vm0, %v8470_v35 }
  0x91   : > { %1091 = vmatmul.mubr.bf16.gmra.mrb[40].mxu0 %v8472_v36 }
  0x92   : > { %7805 = vmatprep.mubr.msk.bf16.mxu0 %vm874_vm0, %v8473_v37 }
  0x99   : > { %1099 = vmatmul.mubr.bf16.gmra.mrb[44].mxu0 %v8475_v38  ;;  %v8526_v38 = vld [vmem:[%s8803_s17 + $0x1c0] ss:$8 sps:$4 sm:$0xff]  }
  0x9a   : > { %7806 = vmatprep.mubr.msk.bf16.mxu0 %vm874_vm0, %v8476_v39 }
  0xa1   : > { %1107 = vmatmul.mubr.bf16.gmra.mrb[48].mxu0 %v8478_v40 }
  0xa2   : > { %7807 = vmatprep.mubr.msk.bf16.mxu0 %vm874_vm0, %v8479_v41 }
  0xa9   : > { %1115 = vmatmul.mubr.bf16.gmra.mrb[52].mxu0 %v8481_v42  ;;  %v8527_v42 = vld [vmem:[%s8803_s17 + $0x1d4] ss:$8 sps:$4 sm:$0xff]  }
  0xaa   : > { %7808 = vmatprep.mubr.msk.bf16.mxu0 %vm874_vm0, %v8482_v43 }
  0xb1   : > { %1123 = vmatmul.mubr.bf16.gmra.mrb[56].mxu0 %v8484_v44 }
  0xb2   : > { %7809 = vmatprep.mubr.msk.bf16.mxu0 %vm874_vm0, %v8485_v45 }
  0xb9   : > { %1131 = vmatmul.mubr.bf16.gmra.mrb[60].mxu0 %v8487_v46 }
  0xba   : > { %7810 = vmatprep.mubr.msk.bf16.mxu0 %vm874_vm0, %v8488_v47 }
  0xc1   : > { %1139 = vmatmul.mubr.bf16.gmra.mrb[64].mxu0 %v8490_v48 }
  0xc2   : > { %7811 = vmatprep.mubr.msk.bf16.mxu0 %vm874_vm0, %v8491_v49 }
  0xc9   : > { %1147 = vmatmul.mubr.bf16.gmra.mrb[68].mxu0 %v8493_v50 }
  0xca   : > { %7812 = vmatprep.mubr.msk.bf16.mxu0 %vm874_vm0, %v8494_v51 }
  0xd1   : > { %1155 = vmatmul.mubr.bf16.gmra.mrb[72].mxu0 %v8496_v52  ;;  %v8971_v52 = vsub.s32 1, %v8952_v30 }
  0xd2   : > { %7813 = vmatprep.mubr.msk.bf16.mxu0 %vm874_vm0, %v8497_v53 }
  0xd9   : > { %1163 = vmatmul.mubr.bf16.gmra.mrb[76].mxu0 %v8499_v54 }
  0xda   : > { %7814 = vmatprep.mubr.msk.bf16.mxu0 %vm874_vm0, %v8500_v55 }
  0xe1   : > { %1171 = vmatmul.mubr.bf16.gmra.mrb[80].mxu0 %v8502_v58 }
  0xe2   : > { %7815 = vmatprep.mubr.msk.bf16.mxu0 %vm874_vm0, %v8503_v59 }
  0xe9   : > { %1179 = vmatmul.mubr.bf16.gmra.mrb[84].mxu0 %v8505_v62 }
  0xea   : > { %7816 = vmatprep.mubr.msk.bf16.mxu0 %vm874_vm0, %v8506_v0 }
  0xf1   : > { %1187 = vmatmul.mubr.bf16.gmra.mrb[88].mxu0 %v8508_v5 }
  0xf2   : > { %7817 = vmatprep.mubr.msk.bf16.mxu0 %vm874_vm0, %v8509_v6  ;;  %v8530_v6 = vld [vmem:[%s8803_s17 + $0x1e4] ss:$8 sps:$4 sm:$0xff]  }
  0xf9   : > { %1195 = vmatmul.mubr.bf16.gmra.mrb[92].mxu0 %v8511_v7 }
  0xfa   : > { %7818 = vmatprep.mubr.msk.bf16.mxu0 %vm874_vm0, %v8512_v8 }
 0x101   : > { %1203 = vmatmul.mubr.bf16.gmra.mrb[96].mxu0 %v8514_v9 }
 0x102   : > { %7819 = vmatprep.mubr.msk.bf16.mxu0 %vm874_vm0, %v8515_v10 }
 0x109   : > { %1211 = vmatmul.mubr.bf16.gmra.mrb[100].mxu0 %v8517_v11 }
 0x10a   : > { %7820 = vmatprep.mubr.msk.bf16.mxu0 %vm874_vm0, %v8518_v12 }
 0x111   : > { %1219 = vmatmul.mubr.bf16.gmra.mrb[104].mxu0 %v8520_v13 }
 0x112   : > { %7821 = vmatprep.mubr.msk.bf16.mxu0 %vm874_vm0, %v8521_v14 }
 0x114   : > { %v1012_v16 = vpop.f32.mrb[0].mxu0 }
 0x115   : > { %v1274_v21 = vmul.f32 %v8939_v15, %v1012_v16  ;;  %v1014_v22 = vpop.f32.mrb[1].mxu0 }
 0x116   : > { %v1015_v24 = vpop.f32.mrb[2].mxu0 }
 0x117   : > { %v1345_v26 = vadd.f32 %v8945_v17, %v1274_v21  ;;  %v1275_v27 = vmul.f32 %v8939_v15, %v1015_v24  ;;  %v1017_v28 = vpop.f32.mrb[3].mxu0 }
 0x119   : > { %v1409_v31 = vmax.f32 %v1345_v26, 0.0  ;;  %v1346_v32 = vadd.f32 %v8945_v17, %v1275_v27  ;;  %1227 = vmatmul.mubr.bf16.gmra.mrb[108].mxu0 %v8523_v23 }
 0x11a   : > { %7822 = vmatprep.mubr.msk.bf16.mxu0 %vm874_vm0, %v8524_v25 }
 0x11b   : > { %v1410_v33 = vmax.f32 %v1346_v32, 0.0  ;;  %v1537_v36 = vcombine.high %v1409_v31, %v1409_v31  ;;  %v1544_v45 = vrot.slane %v1409_v31, %v8957_v34 }
 0x11c   : > { %v1020_v35 = vpop.f32.mrb[4].mxu0 }
 0x11d   : > { %v1022_v37 = vpop.f32.mrb[5].mxu0  ;;  %v1554_v39 = vcombine.high %v1410_v33, %v1410_v33  ;;  %v1276_v40 = vmul.f32 %v8939_v15, %v1020_v35  ;;  %v1551_v47 = vrot.slane %v1537_v36, %v8957_v34  ;;  %v1561_v48 = vrot.slane %v1410_v33, %v8957_v34 }
 0x11e   : > { %v1023_v41 = vpop.f32.mrb[6].mxu0  ;;  %v1552_v54 = vcombine.high %v1544_v45, %v1544_v45 }
 0x11f   : > { %v1277_v43 = vmul.f32 %v8939_v15, %v1023_v41  ;;  %v1025_v44 = vpop.f32.mrb[7].mxu0  ;;  %v1347_v46 = vadd.f32 %v8945_v17, %v1276_v40  ;;  %v1568_v50 = vrot.slane %v1554_v39, %v8957_v34  ;;  %v1553_v58 = vcombine.high %v1551_v47, %v1551_v47 }
 0x120   : > { %v1569_v59 = vcombine.high %v1561_v48, %v1561_v48 }
 0x121   : > { %v1348_v49 = vadd.f32 %v8945_v17, %v1277_v43  ;;  %1235 = vmatmul.mubr.bf16.gmra.mrb[112].mxu0 %v8526_v38  ;;  %v1411_v51 = vmax.f32 %v1347_v46, 0.0  ;;  %v1570_v0 = vcombine.high %v1568_v50, %v1568_v50 }
 0x122   : > { %7823 = vmatprep.mubr.msk.bf16.mxu0 %vm874_vm0, %v8527_v42  ;;  %v8532_v42 = vld [vmem:[%s8803_s17 + $0x1e0] ss:$8 sps:$4 sm:$0xff]  }
 0x123   : > { %v1412_v53 = vmax.f32 %v1348_v49, 0.0  ;;  %v1571_v55 = vcombine.high %v1411_v51, %v1411_v51  ;;  %v8974_v56 = vrot.slane %v1411_v51, %v8957_v34 }
 0x124   : > { %v1028_v57 = vpop.f32.mrb[8].mxu0 }
 0x125   : > { %v1588_v60 = vcombine.high %v1412_v53, %v1412_v53  ;;  %v8977_v61 = vrot.slane %v1412_v53, %v8957_v34  ;;  %v1030_v62 = vpop.f32.mrb[9].mxu0  ;;  %v8981_v2 = vrot.slane %v1571_v55, %v8957_v34  ;;  %v8985_v3 = vcombine.high %v8974_v56, %v8974_v56 }
 0x126   : > { %v2881_v4 = vmax.f32 %v1544_v45, %v8974_v56  ;;  %v1031_v5 = vpop.f32.mrb[10].mxu0  ;;  %v1278_v10 = vmul.f32 %v8939_v15, %v1028_v57 }
 0x127   : > { %v8990_v7 = vrot.slane %v1588_v60, %v8957_v34  ;;  %v8994_v8 = vcombine.high %v8977_v61, %v8977_v61  ;;  %v2885_v9 = vmax.f32 %v1561_v48, %v8977_v61  ;;  %v1033_v11 = vpop.f32.mrb[11].mxu0  ;;  %v9000_v12 = vcombine.high %v8981_v2, %v8981_v2  ;;  %v8533_v48 = vld [vmem:[%s8803_s17 + $0x1f4] ss:$8 sps:$4 sm:$0xff]  }
 0x128   : > { %v2882_v13 = vmax.f32 %v1552_v54, %v8985_v3  ;;  %v2883_v14 = vmax.f32 %v1551_v47, %v8981_v2  ;;  %v3009_v16 = vmax.f32 %v2881_v4, 0.0  ;;  %v1349_v40 = vadd.f32 %v8945_v17, %v1278_v10 }
 0x129   : > { %v9006_v18 = vcombine.high %v8990_v7, %v8990_v7  ;;  %v2886_v19 = vmax.f32 %v1569_v59, %v8994_v8  ;;  %v2887_v20 = vmax.f32 %v1568_v50, %v8990_v7  ;;  %v3013_v21 = vmax.f32 %v2885_v9, 0.0  ;;  %1243 = vmatmul.mubr.bf16.gmra.mrb[116].mxu0 %v8529_v63 }
 0x12a   : > { %v2884_v22 = vmax.f32 %v1553_v58, %v9000_v12  ;;  %v3010_v23 = vmax.f32 %v2882_v13, 0.0  ;;  %v3011_v24 = vmax.f32 %v2883_v14, 0.0  ;;  %v3252_v25 = vrot.slane %v3009_v16, %v8971_v52  ;;  %7824 = vmatprep.mubr.msk.bf16.mxu0 %vm874_vm0, %v8530_v6 }
 0x12b   : > { %v7828_v26 = vrot.slane %v3009_v16, 9  ;;  %v2888_v27 = vmax.f32 %v1570_v0, %v9006_v18  ;;  %v3014_v28 = vmax.f32 %v2886_v19, 0.0  ;;  %v3015_v29 = vmax.f32 %v2887_v20, 0.0 }
 0x12c   : > { %v3012_v31 = vmax.f32 %v2884_v22, 0.0  ;;  %v3256_v32 = vrot.slane %v3010_v23, %v8971_v52  ;;  %v3260_v33 = vrot.slane %v3011_v24, %v8971_v52  ;;  %v7829_v35 = vrot.slane %v3010_v23, 9  ;;  %v1036_v36 = vpop.f32.mrb[12].mxu0 }
 0x12d   : > { %v7830_v37 = vrot.slane %v3011_v24, 9  ;;  %v9016_v38 = vmax.f32 %v3009_v16, %v7828_v26  ;;  %v3016_v39 = vmax.f32 %v2888_v27, 0.0  ;;  %v1038_v41 = vpop.f32.mrb[13].mxu0  ;;  %v3268_v46 = vrot.slane %v3013_v21, %v8971_v52 }
 0x12e   : > { %v3264_v43 = vrot.slane %v3012_v31, %v8971_v52  ;;  %v3698_v44 = vsel %vm3697_vm3, %v3256_v32, %v3252_v25  ;;  %v7831_v45 = vrot.slane %v3012_v31, 9  ;;  %v1039_v47 = vpop.f32.mrb[14].mxu0  ;;  %v9025_v50 = vmax.f32 %v3010_v23, %v7829_v35 }
 0x12f   : > { %v3700_v49 = vsel %vm3699_vm4, %v3260_v33, %v3698_v44  ;;  %v9027_v51 = vmax.f32 %v3011_v24, %v7830_v37  ;;  %v3272_v53 = vrot.slane %v3014_v28, %v8971_v52  ;;  %v1041_v54 = vpop.f32.mrb[15].mxu0  ;;  %v3276_v55 = vrot.slane %v3015_v29, %v8971_v52 }
 0x130   : > { %v3702_v57 = vsel %vm3701_vm5, %v3264_v43, %v3700_v49  ;;  %v7832_v58 = vrot.slane %v3013_v21, 9  ;;  %v7833_v59 = vrot.slane %v3014_v28, 9  ;;  %v9032_v60 = vmax.f32 %v3012_v31, %v7831_v45 }
 0x131   : > { %v3704_v62 = vsel %vm3703_vm6, %v3268_v46, %v3702_v57  ;;  %v7834_v63 = vrot.slane %v3015_v29, 9  ;;  %v1413_v0 = vmax.f32 %v1349_v40, 0.0  ;;  %1251 = vmatmul.mubr.bf16.gmra.mrb[120].mxu0 %v8532_v42  ;;  %v7835_v6 = vrot.slane %v3016_v39, 9 }
 0x132   : > { %v3706_v4 = vsel %vm3705_vm7, %v3272_v53, %v3704_v62  ;;  %v4235_v9 = vmax.f32 %v3013_v21, %v7832_v58  ;;  %v1279_v10 = vmul.f32 %v8939_v15, %v1031_v5  ;;  %7825 = vmatprep.mubr.msk.bf16.mxu0 %vm874_vm0, %v8533_v48  ;;  %v4236_v13 = vmax.f32 %v3014_v28, %v7833_v59  ;;  %v8535_v28 = vld [vmem:[%s8803_s17 + $0x1f0] ss:$8 sps:$4 sm:$0xff]  }
 0x133   : > { %v3708_v11 = vsel %vm3707_vm8, %v3276_v55, %v3706_v4  ;;  %v9039_v14 = vmax.f32 %v3015_v29, %v7834_v63  ;;  %v1605_v16 = vcombine.high %v1413_v0, %v1413_v0  ;;  %v1612_v20 = vrot.slane %v1413_v0, %v8957_v34 }
 0x134   : > { %v3815_v19 = vsel %vm971_vm1, 0.0, %v3708_v11  ;;  %v1350_v22 = vadd.f32 %v8945_v17, %v1279_v10  ;;  %v1280_v23 = vmul.f32 %v8939_v15, %v1036_v36  ;;  %v1044_v21 = vpop.f32.mrb[16].mxu0  ;;  %v1281_v26 = vmul.f32 %v8939_v15, %v1039_v47 }
 0x135   : > { %v4375_v24 = vcombine.high %v3815_v19, %v3815_v19  ;;  %v9046_v5 = vrot.slane %v3815_v19, %v8957_v34  ;;  %v1619_v25 = vrot.slane %v1605_v16, %v8957_v34  ;;  %v1046_v27 = vpop.f32.mrb[17].mxu0  ;;  %v9051_v29 = vmax.f32 %v3016_v39, %v7835_v6 }
 0x136   : > { %v1414_v31 = vmax.f32 %v1350_v22, 0.0  ;;  %v1351_v32 = vadd.f32 %v8945_v17, %v1280_v23  ;;  %v1282_v33 = vmul.f32 %v8939_v15, %v1044_v21  ;;  %v1047_v35 = vpop.f32.mrb[18].mxu0  ;;  %v1620_v40 = vcombine.high %v1612_v20, %v1612_v20 }
 0x137   : > { %v9056_v36 = vrot.slane %v4375_v24, %v8957_v34  ;;  %v1352_v41 = vadd.f32 %v8945_v17, %v1281_v26  ;;  %v1049_v42 = vpop.f32.mrb[19].mxu0  ;;  %v1621_v43 = vcombine.high %v1619_v25, %v1619_v25  ;;  %v9071_v57 = vmul.f32 %v8939_v15, %v1047_v35 }
 0x138   : > { %v1622_v44 = vcombine.high %v1414_v31, %v1414_v31  ;;  %v1629_v39 = vrot.slane %v1414_v31, %v8957_v34  ;;  %v1415_v45 = vmax.f32 %v1351_v32, 0.0  ;;  %v9064_v49 = vadd.f32 %v8945_v17, %v1282_v33 }
 0x139   : > { %v4649_v46 = vrot.slane %v9056_v36, 1  ;;  %v4843_v47 = vmax.f32 %v4235_v9, %v9056_v36  ;;  %v1416_v48 = vmax.f32 %v1352_v41, 0.0  ;;  %1259 = vmatmul.mubr.bf16.gmra.mrb[124].mxu0 %v8535_v28 }
 0x13a   : > { %v1636_v53 = vrot.slane %v1622_v44, %v8957_v34  ;;  %v1639_v54 = vcombine.high %v1415_v45, %v1415_v45  ;;  %v9068_v55 = vrot.slane %v1415_v45, %v8957_v34  ;;  %v1637_v0 = vcombine.high %v1629_v39, %v1629_v39 }
 0x13b   : > { %v9073_v58 = vmax.f32 %v4236_v13, %v4649_v46  ;;  %v4971_v59 = vpack.c.bf16 %v4843_v47, %v4843_v47  ;;  %v1656_v62 = vcombine.high %v1416_v48, %v1416_v48  ;;  %v9076_v63 = vrot.slane %v1416_v48, %v8957_v34 }
 0x13c   : > { %v9079_v4 = vrot.slane %v1639_v54, %v8957_v34  ;;  %v9083_v6 = vcombine.high %v9068_v55, %v9068_v55  ;;  %v2889_v9 = vmax.f32 %v1612_v20, %v9068_v55  ;;  %v1052_v10 = vpop.f32.mrb[20].mxu0  ;;  %v1638_v11 = vcombine.high %v1636_v53, %v1636_v53 }
 0x13d   : > { %12546 = vst [vmem:[#allocation7_spill] sm:$0xff] %v9073_v58  ;;  %v9087_v13 = vrot.slane %v1656_v62, %v8957_v34  ;;  %v9091_v16 = vcombine.high %v9076_v63, %v9076_v63  ;;  %v2893_v19 = vmax.f32 %v1629_v39, %v9076_v63  ;;  %v1054_v22 = vpop.f32.mrb[21].mxu0  ;;  %v9101_v27 = vunpack.c.l.b16 %v4971_v59 }
 0x13e   : > { %v9096_v23 = vcombine.high %v9079_v4, %v9079_v4  ;;  %v2890_v21 = vmax.f32 %v1620_v40, %v9083_v6  ;;  %v2891_v20 = vmax.f32 %v1619_v25, %v9079_v4  ;;  %v3017_v24 = vmax.f32 %v2889_v9, %v8974_v56  ;;  %v1055_v26 = vpop.f32.mrb[22].mxu0 }
 0x13f   : > { %12547 = vst [vmem:[#allocation8_spill] sm:$0xff] %v9101_v27  ;;  %v9105_v28 = vcombine.high %v9087_v13, %v9087_v13  ;;  %v2894_v31 = vmax.f32 %v1637_v0, %v9091_v16  ;;  %v2895_v32 = vmax.f32 %v1636_v53, %v9087_v13  ;;  %v1057_v33 = vpop.f32.mrb[23].mxu0  ;;  %v3021_v44 = vmax.f32 %v2893_v19, %v8977_v61 }
 0x140   : > { %v2892_v35 = vmax.f32 %v1621_v43, %v9096_v23  ;;  %v3018_v40 = vmax.f32 %v2890_v21, %v8985_v3  ;;  %v3019_v25 = vmax.f32 %v2891_v20, %v8981_v2  ;;  %v3280_v56 = vrot.slane %v3017_v24, %v8971_v52 }
 0x141   : > { %v7836_v41 = vrot.slane %v3017_v24, 9  ;;  %v2896_v42 = vmax.f32 %v1638_v11, %v9105_v28  ;;  %v3022_v39 = vmax.f32 %v2894_v31, %v8994_v8  ;;  %v3023_v2 = vmax.f32 %v2895_v32, %v8990_v7 }
 0x142   : > { %v3020_v45 = vmax.f32 %v2892_v35, %v9000_v12  ;;  %v3284_v46 = vrot.slane %v3018_v40, %v8971_v52  ;;  %v3288_v47 = vrot.slane %v3019_v25, %v8971_v52  ;;  %v7837_v43 = vrot.slane %v3018_v40, 9 }
 0x143   : > { %v7838_v48 = vrot.slane %v3019_v25, 9  ;;  %v9122_v53 = vmax.f32 %v2896_v42, %v9006_v18  ;;  %v9126_v59 = vmax.f32 %v3017_v24, %v7836_v41  ;;  %v3296_v11 = vrot.slane %v3021_v44, %v8971_v52 }
 0x144   : > { %v3292_v54 = vrot.slane %v3020_v45, %v8971_v52  ;;  %v3709_v61 = vsel %vm3697_vm3, %v3284_v46, %v3280_v56  ;;  %v7839_v8 = vrot.slane %v3020_v45, 9  ;;  %v1060_v12 = vpop.f32.mrb[24].mxu0  ;;  %v9129_v0 = vmax.f32 %v3018_v40, %v7837_v43 }
 0x145   : > { %v3710_v62 = vsel %vm3699_vm4, %v3288_v47, %v3709_v61  ;;  %v9131_v9 = vmax.f32 %v3019_v25, %v7838_v48  ;;  %v1062_v7 = vpop.f32.mrb[25].mxu0  ;;  %v3300_v18 = vrot.slane %v3022_v39, %v8971_v52  ;;  %v7840_v21 = vrot.slane %v3021_v44, 9 }
 0x146   : > { %v9134_v19 = vmax.f32 %v3020_v45, %v7839_v8  ;;  %v3711_v22 = vsel %vm3701_vm5, %v3292_v54, %v3710_v62  ;;  %v1063_v20 = vpop.f32.mrb[26].mxu0  ;;  %v3304_v24 = vrot.slane %v3023_v2, %v8971_v52  ;;  %v7841_v32 = vrot.slane %v3022_v39, 9 }
 0x147   : > { %v3712_v31 = vsel %vm3703_vm6, %v3296_v11, %v3711_v22  ;;  %v7842_v33 = vrot.slane %v3023_v2, 9  ;;  %v1065_v35 = vpop.f32.mrb[27].mxu0  ;;  %v1417_v56 = vmax.f32 %v9064_v49, 0.0  ;;  %v1354_v41 = vadd.f32 %v8945_v17, %v9071_v57 }
 0x148   : > { %v3713_v40 = vsel %vm3705_vm7, %v3300_v18, %v3712_v31  ;;  %v4243_v45 = vmax.f32 %v3021_v44, %v7840_v21  ;;  %v9146_v46 = vmax.f32 %v3022_v39, %v7841_v32  ;;  %v1284_v47 = vmul.f32 %v8939_v15, %v1052_v10 }
 0x149   : > { %v3714_v42 = vsel %vm3707_vm8, %v3304_v24, %v3713_v40  ;;  %v1673_v48 = vcombine.high %v1417_v56, %v1417_v56  ;;  %v1680_v54 = vrot.slane %v1417_v56, %v8957_v34  ;;  %v1418_v61 = vmax.f32 %v1354_v41, 0.0 }
 0x14a   : > { %v3816_v43 = vsel %vm971_vm1, 0.0, %v3714_v42  ;;  %v1355_v49 = vadd.f32 %v8945_v17, %v1284_v47  ;;  %v1285_v57 = vmul.f32 %v8939_v15, %v1055_v26  ;;  %v9156_v11 = vmax.f32 %v3023_v2, %v7842_v33 }
 0x14b   : > { %v4392_v8 = vcombine.high %v3816_v43, %v3816_v43  ;;  %v9152_v62 = vrot.slane %v3816_v43, %v8957_v34  ;;  %v1687_v44 = vrot.slane %v1673_v48, %v8957_v34  ;;  %v1690_v39 = vcombine.high %v1418_v61, %v1418_v61 }
 0x14c   : > { %v9160_v10 = vrot.slane %v1418_v61, %v8957_v34  ;;  %v1068_v7 = vpop.f32.mrb[28].mxu0  ;;  %v1688_v22 = vcombine.high %v1680_v54, %v1680_v54  ;;  %v1419_v21 = vmax.f32 %v1355_v49, 0.0  ;;  %v1356_v24 = vadd.f32 %v8945_v17, %v1285_v57 }
 0x14d   : > { %v9163_v18 = vrot.slane %v4392_v8, %v8957_v34  ;;  %v1070_v31 = vpop.f32.mrb[29].mxu0  ;;  %v1689_v26 = vcombine.high %v1687_v44, %v1687_v44  ;;  %v1704_v2 = vrot.slane %v1690_v39, %v8957_v34  ;;  %v1286_v33 = vmul.f32 %v8939_v15, %v1060_v12 }
 0x14e   : > { %v9169_v35 = vpop.f32.mrb[30].mxu0  ;;  %v1707_v56 = vcombine.high %v1419_v21, %v1419_v21  ;;  %v9173_v41 = vrot.slane %v1419_v21, %v8957_v34  ;;  %v1420_v42 = vmax.f32 %v1356_v24, 0.0  ;;  %v1705_v43 = vcombine.high %v9160_v10, %v9160_v10 }
 0x14f   : > { %v4851_v40 = vmax.f32 %v4243_v45, %v9163_v18  ;;  %v1073_v47 = vpop.f32.mrb[31].mxu0  ;;  %v1706_v48 = vcombine.high %v1704_v2, %v1704_v2  ;;  %v1357_v61 = vadd.f32 %v8945_v17, %v1286_v33  ;;  %v1287_v8 = vmul.f32 %v8939_v15, %v1063_v20 }
 0x150   : > { %v9180_v12 = vrot.slane %v1707_v56, %v8957_v34  ;;  %v9184_v45 = vcombine.high %v9173_v41, %v9173_v41  ;;  %v2897_v57 = vmax.f32 %v1680_v54, %v9173_v41  ;;  %v1724_v39 = vcombine.high %v1420_v42, %v1420_v42 }
 0x151   : > { %v4979_v49 = vpack.c.bf16 %v4851_v40, %v4851_v40  ;;  %v9188_v21 = vrot.slane %v1420_v42, %v8957_v34  ;;  %v1421_v24 = vmax.f32 %v1357_v61, 0.0  ;;  %v9191_v31 = vmul.f32 %v8939_v15, %v1068_v7 }
 0x152   : > { %v9197_v20 = vcombine.high %v9180_v12, %v9180_v12  ;;  %v2898_v40 = vmax.f32 %v1688_v22, %v9184_v45  ;;  %v2899_v56 = vmax.f32 %v1687_v44, %v9180_v12  ;;  %v3025_v54 = vmax.f32 %v2897_v57, %v9068_v55 }
 0x153   : > { %v9193_v33 = vunpack.c.l.b16 %v4979_v49  ;;  %v9203_v47 = vrot.slane %v1724_v39, %v8957_v34  ;;  %v9207_v42 = vcombine.high %v9188_v21, %v9188_v21  ;;  %v2901_v7 = vmax.f32 %v9160_v10, %v9188_v21 }
 0x154   : > { %v9211_v61 = vpop.f32.mrb[32].mxu0  ;;  %v2900_v49 = vmax.f32 %v1689_v26, %v9197_v20  ;;  %v3026_v22 = vmax.f32 %v2898_v40, %v9083_v6  ;;  %v3027_v44 = vmax.f32 %v2899_v56, %v9079_v4  ;;  %v1358_v55 = vadd.f32 %v8945_v17, %v1287_v8 }
 0x155   : > { %12548 = vst [vmem:[#allocation9_spill] sm:$0xff] %v9193_v33  ;;  %v1078_v57 = vpop.f32.mrb[33].mxu0  ;;  %v3308_v39 = vrot.slane %v3025_v54, %v8971_v52  ;;  %v7844_v1 = vrot.slane %v3025_v54, 9  ;;  %v9220_v3 = vcombine.high %v9203_v47, %v9203_v47  ;;  %v2902_v10 = vmax.f32 %v1705_v43, %v9207_v42 }
 0x156   : > { %v1079_v32 = vpop.f32.mrb[34].mxu0  ;;  %v3028_v37 = vmax.f32 %v2900_v49, %v9096_v23  ;;  %v3312_v26 = vrot.slane %v3026_v22, %v8971_v52  ;;  %v3316_v6 = vrot.slane %v3027_v44, %v8971_v52  ;;  %v7845_v4 = vrot.slane %v3026_v22, 9 }
 0x157   : > { %v1081_v40 = vpop.f32.mrb[35].mxu0  ;;  %v7846_v56 = vrot.slane %v3027_v44, 9  ;;  %v2903_v57 = vmax.f32 %v1704_v2, %v9203_v47  ;;  %v2904_v25 = vmax.f32 %v1706_v48, %v9220_v3  ;;  %v9231_v58 = vmax.f32 %v3025_v54, %v7844_v1 }
 0x158   : > { %v3320_v30 = vrot.slane %v3028_v37, %v8971_v52  ;;  %v3715_v43 = vsel %vm3697_vm3, %v3312_v26, %v3308_v39  ;;  %v7847_v27 = vrot.slane %v3028_v37, 9  ;;  %v9234_v49 = vmax.f32 %v3026_v22, %v7845_v4 }
 0x159   : > { %12549 = vst [vmem:[#allocation10_spill] sm:$0xff] %v9231_v58  ;;  %v3716_v23 = vsel %vm3699_vm4, %v3316_v6, %v3715_v43  ;;  %v3029_v40 = vmax.f32 %v2901_v7, %v9076_v63  ;;  %v3030_v8 = vmax.f32 %v2902_v10, %v9091_v16  ;;  %v9238_v33 = vmax.f32 %v3027_v44, %v7846_v56 }
 0x15a   : > { %12550 = vst [vmem:[#allocation11_spill] sm:$0xff] %v9234_v49  ;;  %v3031_v2 = vmax.f32 %v2903_v57, %v9087_v13  ;;  %v9242_v48 = vmax.f32 %v2904_v25, %v9105_v28  ;;  %v3717_v39 = vsel %vm3701_vm5, %v3320_v30, %v3716_v23  ;;  %v9245_v26 = vmax.f32 %v3028_v37, %v7847_v27 }
 0x15b   : > { %12551 = vst [vmem:[#allocation12_spill] sm:$0xff] %v9238_v33  ;;  %v3324_v1 = vrot.slane %v3029_v40, %v8971_v52  ;;  %v7848_v54 = vrot.slane %v3029_v40, 9  ;;  %v7849_v22 = vrot.slane %v3030_v8, 9  ;;  %v3328_v63 = vrot.slane %v3030_v8, %v8971_v52 }
 0x15c   : > { %12552 = vst [vmem:[#allocation13_spill] sm:$0xff] %v9242_v48  ;;  %12553 = vst [vmem:[#allocation14_spill] sm:$0xff] %v9245_v26  ;;  %v9248_v6 = vpop.f32.mrb[36].mxu0  ;;  %v3332_v16 = vrot.slane %v3031_v2, %v8971_v52  ;;  %v7850_v7 = vrot.slane %v3031_v2, 9  ;;  %v1741_v44 = vcombine.high %v1421_v24, %v1421_v24  ;;  %v1748_v37 = vrot.slane %v1421_v24, %v8957_v34 }
 0x15d   : > { %v1086_v13 = vpop.f32.mrb[37].mxu0  ;;  %v3718_v28 = vsel %vm3703_vm6, %v3324_v1, %v3717_v39  ;;  %v4251_v30 = vmax.f32 %v3029_v40, %v7848_v54  ;;  %v9258_v4 = vmax.f32 %v3030_v8, %v7849_v22  ;;  %v1422_v57 = vmax.f32 %v1358_v55, 0.0 }
 0x15e   : > { %v9255_v27 = vpop.f32.mrb[38].mxu0  ;;  %v3719_v10 = vsel %vm3705_vm7, %v3328_v63, %v3718_v28  ;;  %v1755_v56 = vrot.slane %v1741_v44, %v8957_v34  ;;  %v9262_v13 = vmax.f32 %v3031_v2, %v7850_v7  ;;  %v1359_v39 = vadd.f32 %v8945_v17, %v9191_v31 }
 0x15f   : > { %12554 = vst [vmem:[#allocation15_spill] sm:$0xff] %v9258_v4  ;;  %v1089_v43 = vpop.f32.mrb[39].mxu0  ;;  %v3720_v23 = vsel %vm3707_vm8, %v3332_v16, %v3719_v10  ;;  %v1289_v24 = vmul.f32 %v8939_v15, %v9169_v35  ;;  %v1756_v1 = vcombine.high %v1748_v37, %v1748_v37  ;;  %v1758_v54 = vcombine.high %v1422_v57, %v1422_v57 }
 0x160   : > { %12555 = vst [vmem:[#allocation16_spill] sm:$0xff] %v9262_v13  ;;  %v3817_v40 = vsel %vm971_vm1, 0.0, %v3720_v23  ;;  %v9270_v8 = vrot.slane %v1422_v57, %v8957_v34  ;;  %v1423_v63 = vmax.f32 %v1359_v39, 0.0  ;;  %v1757_v16 = vcombine.high %v1755_v56, %v1755_v56 }
 0x161   : > { %v4409_v22 = vcombine.high %v3817_v40, %v3817_v40  ;;  %v9273_v55 = vrot.slane %v3817_v40, %v8957_v34  ;;  %v1360_v2 = vadd.f32 %v8945_v17, %v1289_v24  ;;  %v1772_v31 = vrot.slane %v1758_v54, %v8957_v34 }
 0x162   : > { %v1290_v35 = vmul.f32 %v8939_v15, %v9211_v61  ;;  %v1291_v7 = vmul.f32 %v8939_v15, %v1079_v32  ;;  %v1773_v28 = vcombine.high %v9270_v8, %v9270_v8  ;;  %v1775_v10 = vcombine.high %v1423_v63, %v1423_v63 }
 0x163   : > { %12556 = vst [vmem:[#allocation17_spill] sm:$0xff] %v9273_v55  ;;  %v9281_v44 = vrot.slane %v4409_v22, %v8957_v34  ;;  %v9286_v57 = vrot.slane %v1423_v63, %v8957_v34  ;;  %v1774_v39 = vcombine.high %v1772_v31, %v1772_v31  ;;  %v1424_v24 = vmax.f32 %v1360_v2, 0.0 }
 0x164   : > { %v9288_v43 = vpop.f32.mrb[40].mxu0  ;;  %v1361_v61 = vadd.f32 %v8945_v17, %v1290_v35  ;;  %v9294_v32 = vrot.slane %v1775_v10, %v8957_v34  ;;  %v1362_v35 = vadd.f32 %v8945_v17, %v1291_v7 }
 0x165   : > { %12557 = vst [vmem:[#allocation18_spill] sm:$0xff] %v9281_v44  ;;  %v1094_v40 = vpop.f32.mrb[41].mxu0  ;;  %v4859_v15 = vmax.f32 %v4251_v30, %v9281_v44  ;;  %v9298_v54 = vcombine.high %v9286_v57, %v9286_v57  ;;  %v2905_v22 = vmax.f32 %v1748_v37, %v9286_v57  ;;  %v1792_v25 = vcombine.high %v1424_v24, %v1424_v24 }
 0x166   : > { %v9301_v63 = vpop.f32.mrb[42].mxu0  ;;  %v9304_v23 = vrot.slane %v1424_v24, %v8957_v34  ;;  %v1425_v2 = vmax.f32 %v1361_v61, 0.0  ;;  %v9309_v10 = vcombine.high %v9294_v32, %v9294_v32  ;;  %v2907_v4 = vmax.f32 %v1755_v56, %v9294_v32 }
 0x167   : > { %v1097_v40 = vpop.f32.mrb[43].mxu0  ;;  %v4987_v30 = vpack.c.bf16 %v4859_v15, %v4859_v15  ;;  %v2906_v13 = vmax.f32 %v1756_v1, %v9298_v54  ;;  %v3033_v37 = vmax.f32 %v2905_v22, %v9173_v41  ;;  %v9315_v26 = vrot.slane %v1792_v25, %v8957_v34 }
 0x168   : > { %v9319_v24 = vcombine.high %v9304_v23, %v9304_v23  ;;  %v2909_v17 = vmax.f32 %v9270_v8, %v9304_v23  ;;  %v2908_v61 = vmax.f32 %v1757_v16, %v9309_v10  ;;  %v3035_v56 = vmax.f32 %v2907_v4, %v9180_v12 }
 0x169   : > { %v9323_v7 = vunpack.c.l.b16 %v4987_v30  ;;  %v3034_v1 = vmax.f32 %v2906_v13, %v9184_v45  ;;  %v7852_v15 = vrot.slane %v3033_v37, 9  ;;  %v9330_v41 = vcombine.high %v9315_v26, %v9315_v26 }
 0x16a   : > { %v2910_v25 = vmax.f32 %v1773_v28, %v9319_v24  ;;  %v1426_v22 = vmax.f32 %v1362_v35, 0.0  ;;  %v3036_v40 = vmax.f32 %v2908_v61, %v9197_v20  ;;  %v3336_v8 = vrot.slane %v3033_v37, %v8971_v52 }
 0x16b   : > { %12558 = vst [vmem:[#allocation19_spill] sm:$0xff] %v9323_v7  ;;  %v3340_v30 = vrot.slane %v3034_v1, %v8971_v52  ;;  %v3344_v16 = vrot.slane %v3035_v56, %v8971_v52  ;;  %v7853_v45 = vrot.slane %v3034_v1, 9  ;;  %v7854_v4 = vrot.slane %v3035_v56, 9 }
 0x16c   : > { %v9337_v33 = vpop.f32.mrb[44].mxu0  ;;  %v2911_v13 = vmax.f32 %v1772_v31, %v9315_v26  ;;  %v3348_v28 = vrot.slane %v3036_v40, %v8971_v52  ;;  %v7855_v20 = vrot.slane %v3036_v40, 9  ;;  %v2912_v61 = vmax.f32 %v1774_v39, %v9330_v41 }
 0x16d   : > { %v1102_v49 = vpop.f32.mrb[45].mxu0  ;;  %v3721_v35 = vsel %vm3697_vm3, %v3340_v30, %v3336_v8  ;;  %v9347_v55 = vmax.f32 %v3033_v37, %v7852_v15  ;;  %v9349_v48 = vmax.f32 %v3034_v1, %v7853_v45  ;;  %v3037_v12 = vmax.f32 %v2909_v17, %v9188_v21 }
 0x16e   : > { %v9344_v58 = vpop.f32.mrb[46].mxu0  ;;  %v3722_v44 = vsel %vm3699_vm4, %v3344_v16, %v3721_v35  ;;  %v9352_v31 = vmax.f32 %v3035_v56, %v7854_v4  ;;  %v3038_v49 = vmax.f32 %v2910_v25, %v9207_v42  ;;  %v3039_v8 = vmax.f32 %v2911_v13, %v9203_v47 }
 0x16f   : > { %v1105_v7 = vpop.f32.mrb[47].mxu0  ;;  %v9357_v30 = vmax.f32 %v2912_v61, %v9220_v3  ;;  %v3352_v39 = vrot.slane %v3037_v12, %v8971_v52  ;;  %v3723_v16 = vsel %vm3701_vm5, %v3348_v28, %v3722_v44  ;;  %v7856_v37 = vrot.slane %v3037_v12, 9 }
 0x170   : > { %v1809_v15 = vcombine.high %v1425_v2, %v1425_v2  ;;  %v9361_v1 = vmax.f32 %v3036_v40, %v7855_v20  ;;  %v3356_v21 = vrot.slane %v3038_v49, %v8971_v52  ;;  %v7857_v17 = vrot.slane %v3038_v49, 9 }
 0x171   : > { %v7858_v7 = vrot.slane %v3039_v8, 9  ;;  %v3360_v56 = vrot.slane %v3039_v8, %v8971_v52  ;;  %v3724_v42 = vsel %vm3703_vm6, %v3352_v39, %v3723_v16  ;;  %v9368_v3 = vrot.slane %v1425_v2, %v8957_v34 }
 0x172   : > { %v3725_v25 = vsel %vm3705_vm7, %v3356_v21, %v3724_v42  ;;  %v4259_v44 = vmax.f32 %v3037_v12, %v7856_v37  ;;  %v9371_v45 = vmax.f32 %v3038_v49, %v7857_v17  ;;  %v9374_v40 = vrot.slane %v1809_v15, %v8957_v34 }
 0x173   : > { %v3726_v13 = vsel %vm3707_vm8, %v3360_v56, %v3725_v25  ;;  %v9379_v28 = vmax.f32 %v3039_v8, %v7858_v7  ;;  %v1826_v35 = vcombine.high %v1426_v22, %v1426_v22  ;;  %v9382_v20 = vrot.slane %v1426_v22, %v8957_v34 }
 0x174   : > { %12559 = vst [vmem:[#allocation20_spill] sm:$0xff] %v9371_v45  ;;  %v9376_v4 = vpop.f32.mrb[48].mxu0  ;;  %v3818_v61 = vsel %vm971_vm1, 0.0, %v3726_v13  ;;  %v4390_v39 = vcombine.high %v9046_v5, %v9046_v5  ;;  %v12561_v15 = vrot.slane %v9122_v53, 9  ;;  %v4391_v7 = vcombine.high %v9056_v36, %v9056_v36 }
 0x175   : > { %12560 = vst [vmem:[#allocation21_spill] sm:$0xff] %v9379_v28  ;;  %v1110_v2 = vpop.f32.mrb[49].mxu0  ;;  %v4426_v8 = vcombine.high %v3818_v61, %v3818_v61  ;;  %v9394_v37 = vrot.slane %v3818_v61, %v8957_v34  ;;  %v9397_v22 = vrot.slane %v1826_v35, %v8957_v34  ;;  %v4407_v56 = vcombine.high %v9152_v62, %v9152_v62 }
 0x176   : > { %v9391_v16 = vpop.f32.mrb[50].mxu0  ;;  %v4246_v21 = vmax.f32 %v9122_v53, %v12561_v15  ;;  %v4408_v42 = vcombine.high %v9163_v18, %v9163_v18  ;;  %v4648_v25 = vrot.slane %v4390_v39, 1  ;;  %v4653_v53 = vrot.slane %v9163_v18, 1 }
 0x177   : > { %v1113_v17 = vpop.f32.mrb[51].mxu0  ;;  %v9409_v13 = vrot.slane %v4426_v8, %v8957_v34  ;;  %v4650_v61 = vrot.slane %v4391_v7, 1  ;;  %v4652_v15 = vrot.slane %v4407_v56, 1  ;;  %v12562_v49 = vrot.slane %v9046_v5, 1 }
 0x178   : > { %v4654_v36 = vrot.slane %v4408_v42, 1  ;;  %v4839_v17 = vmax.f32 %v9016_v38, %v9046_v5  ;;  %v4841_v12 = vmax.f32 %v9027_v51, %v4390_v39  ;;  %v4842_v35 = vmax.f32 %v9032_v60, %v4648_v25 }
 0x179   : > { %v4867_v47 = vmax.f32 %v4259_v44, %v9409_v13  ;;  %v4840_v8 = vmax.f32 %v9025_v50, %v12562_v49  ;;  %v4845_v2 = vmax.f32 %v9039_v14, %v4391_v7  ;;  %v4846_v18 = vmax.f32 %v9051_v29, %v4650_v61 }
 0x17a   : > { %v4847_v28 = vmax.f32 %v9126_v59, %v9152_v62  ;;  %v12563_v45 = vrot.slane %v9152_v62, 1  ;;  %v4849_v50 = vmax.f32 %v9131_v9, %v4407_v56  ;;  %v4850_v51 = vmax.f32 %v9134_v19, %v4652_v15 }
 0x17b   : > { %v4995_v5 = vpack.c.bf16 %v4867_v47, %v4867_v47  ;;  %v4852_v60 = vmax.f32 %v9146_v46, %v4653_v53  ;;  %v4853_v29 = vmax.f32 %v9156_v11, %v4408_v42  ;;  %v4854_v49 = vmax.f32 %v4246_v21, %v4654_v36 }
 0x17c   : > { %v4848_v38 = vmax.f32 %v9129_v0, %v12563_v45  ;;  %v9430_v44 = vpop.f32.mrb[52].mxu0  ;;  %v4967_v39 = vpack.c.bf16 %v4839_v17, %v4839_v17  ;;  %v4968_v59 = vpack.c.bf16 %v4840_v8, %v4840_v8  ;;  %v4969_v62 = vpack.c.bf16 %v4841_v12, %v4841_v12  ;;  %v12565_v45 = vld [vmem:[#allocation7_spill] sm:$0xff] }
 0x17d   : > { %v1118_v14 = vpop.f32.mrb[53].mxu0  ;;  %v4970_v47 = vpack.c.bf16 %v4842_v35, %v4842_v35  ;;  %v4972_v9 = vpack.c.bf16 %v12565_v45, %v12565_v45  ;;  %v4973_v56 = vpack.c.bf16 %v4845_v2, %v4845_v2  ;;  %v4974_v46 = vpack.c.bf16 %v4846_v18, %v4846_v18 }
 0x17e   : > { %v9436_v7 = vpop.f32.mrb[54].mxu0  ;;  %v4975_v25 = vpack.c.bf16 %v4847_v28, %v4847_v28  ;;  %v4976_v53 = vpack.c.bf16 %v4848_v38, %v4848_v38  ;;  %v9442_v61 = vunpack.c.l.b16 %v4995_v5  ;;  %v4977_v11 = vpack.c.bf16 %v4849_v50, %v4849_v50 }
 0x17f   : > { %12564 = vst [vmem:[#allocation22_spill] sm:$0xff] %v9436_v7  ;;  %v1121_v19 = vpop.f32.mrb[55].mxu0  ;;  %v4978_v21 = vpack.c.bf16 %v4850_v51, %v4850_v51  ;;  %v4980_v42 = vpack.c.bf16 %v4852_v60, %v4852_v60  ;;  %v4981_v15 = vpack.c.bf16 %v4853_v29, %v4853_v29  ;;  %v4982_v36 = vpack.c.bf16 %v4854_v49, %v4854_v49 }
 0x180   : > { %v5231_v17 = vunpack.c.l.b16 %v4967_v39  ;;  %v5232_v8 = vunpack.c.l.b16 %v4968_v59  ;;  %v5233_v14 = vunpack.c.l.b16 %v4969_v62  ;;  %v5234_v12 = vunpack.c.l.b16 %v4970_v47 }
 0x181   : > { %v5236_v35 = vunpack.c.l.b16 %v4972_v9  ;;  %v5237_v0 = vunpack.c.l.b16 %v4973_v56  ;;  %v5238_v7 = vunpack.c.l.b16 %v4974_v46  ;;  %v5239_v45 = vunpack.c.l.b16 %v4975_v25 }
 0x182   : > { %v5240_v19 = vunpack.c.l.b16 %v4976_v53  ;;  %v5241_v2 = vunpack.c.l.b16 %v4977_v11  ;;  %v5242_v28 = vunpack.c.l.b16 %v4978_v21  ;;  %v5244_v38 = vunpack.c.l.b16 %v4980_v42 }
 0x183   : > { %v5245_v5 = vunpack.c.l.b16 %v4981_v15  ;;  %v5246_v50 = vunpack.c.l.b16 %v4982_v36  ;;  %v5359_v60 = vrot.slane %v5232_v8, 7  ;;  %v5362_v29 = vrot.slane %v5233_v14, 6  ;;  %v9454_v8 = vld [vmem:[%s12495_s2] ss:$0 sm:$0xff] }
 0x184   : > { %v9444_v18 = vpop.f32.mrb[56].mxu0  ;;  %v5364_v49 = vrot.slane %v5234_v12, 5  ;;  %v5368_v39 = vrot.slane %v5236_v35, 3  ;;  %v5370_v62 = vrot.slane %v5237_v0, 2  ;;  %v5372_v47 = vrot.slane %v5238_v7, 1  ;;  %v12566_v35 = vld [vmem:[#allocation8_spill] sm:$0xff] }
 0x185   : > { %v1126_v51 = vpop.f32.mrb[57].mxu0  ;;  %v5374_v9 = vrot.slane %v5240_v19, 7  ;;  %v5376_v56 = vrot.slane %v5241_v2, 6  ;;  %v5361_v25 = vsel %vm5360_vm9, %v5359_v60, %v5231_v17  ;;  %v5378_v53 = vrot.slane %v5242_v28, 5 }
 0x186   : > { %v9446_v59 = vpop.f32.mrb[58].mxu0  ;;  %v5382_v11 = vrot.slane %v5244_v38, 3  ;;  %v5384_v21 = vrot.slane %v5245_v5, 2  ;;  %v5363_v42 = vsel %vm3697_vm3, %v5362_v29, %v5361_v25  ;;  %v5386_v36 = vrot.slane %v5246_v50, 1  ;;  %v12568_v5 = vld [vmem:[#allocation9_spill] sm:$0xff] }
 0x187   : > { %v1129_v46 = vpop.f32.mrb[59].mxu0  ;;  %v5375_v15 = vsel %vm5360_vm9, %v5374_v9, %v5239_v45  ;;  %v1292_v7 = vmul.f32 %v9454_v8, %v9248_v6  ;;  %v5365_v0 = vsel %vm3699_vm4, %v5364_v49, %v5363_v42  ;;  %v1293_v14 = vmul.f32 %v9454_v8, %v9255_v27  ;;  %v9471_v6 = vld [vmem:[%s12496_s3] ss:$0 sm:$0xff] }
 0x188   : > { %v5377_v17 = vsel %vm3697_vm3, %v5376_v56, %v5375_v15  ;;  %v1294_v12 = vmul.f32 %v9454_v8, %v9288_v43  ;;  %v12567_v45 = vrot.slane %v12566_v35, 4  ;;  %v1295_v38 = vmul.f32 %v9454_v8, %v9301_v63 }
 0x189   : > { %v5379_v2 = vsel %vm3699_vm4, %v5378_v53, %v5377_v17  ;;  %v1363_v28 = vadd.f32 %v9471_v6, %v1292_v7  ;;  %v12569_v43 = vrot.slane %v12568_v5, 4  ;;  %v1364_v51 = vadd.f32 %v9471_v6, %v1293_v14 }
 0x18a   : > { %v5367_v19 = vsel %vm3701_vm5, %v12567_v45, %v5365_v0  ;;  %v1365_v60 = vadd.f32 %v9471_v6, %v1294_v12  ;;  %v1366_v46 = vadd.f32 %v9471_v6, %v1295_v38 }
 0x18b   : > { %v5369_v27 = vsel %vm3703_vm6, %v5368_v39, %v5367_v19  ;;  %v5381_v50 = vsel %vm3701_vm5, %v12569_v43, %v5379_v2  ;;  %v1427_v56 = vmax.f32 %v1363_v28, 0.0  ;;  %v1428_v53 = vmax.f32 %v1364_v51, 0.0 }
 0x18c   : > { %v9482_v29 = vpop.f32.mrb[60].mxu0  ;;  %v5371_v49 = vsel %vm3705_vm7, %v5370_v62, %v5369_v27  ;;  %v5383_v9 = vsel %vm3703_vm6, %v5382_v11, %v5381_v50  ;;  %v1429_v42 = vmax.f32 %v1365_v60, 0.0  ;;  %v12570_v43 = vcombine.high %v9368_v3, %v9368_v3 }
 0x18d   : > { %v1134_v63 = vpop.f32.mrb[61].mxu0  ;;  %v5373_v39 = vsel %vm3707_vm8, %v5372_v47, %v5371_v49  ;;  %v5385_v25 = vsel %vm3705_vm7, %v5384_v21, %v5383_v9  ;;  %v1843_v17 = vcombine.high %v1427_v56, %v1427_v56  ;;  %v9494_v62 = vrot.slane %v1427_v56, %v8957_v34 }
 0x18e   : > { %v9489_v15 = vpop.f32.mrb[62].mxu0  ;;  %v5387_v0 = vsel %vm3707_vm8, %v5386_v36, %v5385_v25  ;;  %v1860_v12 = vcombine.high %v1428_v53, %v1428_v53  ;;  %v9497_v35 = vrot.slane %v1428_v53, %v8957_v34  ;;  %v9499_v47 = vmax.f32 %v1366_v46, 0.0 }
 0x18f   : > { %v1137_v11 = vpop.f32.mrb[63].mxu0  ;;  %v5584_v14 = vpack.c.b16 %v5387_v0, %v5373_v39  ;;  %v9502_v21 = vrot.slane %v1843_v17, %v8957_v34  ;;  %v9506_v45 = vcombine.high %v9494_v62, %v9494_v62  ;;  %v2913_v36 = vmax.f32 %v9368_v3, %v9494_v62 }
 0x190   : > { %v1877_v19 = vcombine.high %v1429_v42, %v1429_v42  ;;  %v9512_v2 = vrot.slane %v1860_v12, %v8957_v34  ;;  %v9516_v28 = vcombine.high %v9497_v35, %v9497_v35  ;;  %v2917_v38 = vmax.f32 %v9382_v20, %v9497_v35 }
 0x191   : > { %7964 = vmatmul.mubr.msk.bf16.vlgmr.msra.gmra.mrb[0].mxu1 %vm5632_vm10, %v5584_v14  ;;  %v9521_v27 = vrot.slane %v1429_v42, %v8957_v34  ;;  %v9525_v5 = vcombine.high %v9502_v21, %v9502_v21  ;;  %v2914_v50 = vmax.f32 %v12570_v43, %v9506_v45  ;;  %v2915_v51 = vmax.f32 %v9374_v40, %v9502_v21 }
 0x192   : > { %v3041_v60 = vmax.f32 %v2913_v36, %v9286_v57  ;;  %v12571_v49 = vmov 0   ;;  %v9537_v9 = vcombine.high %v9512_v2, %v9512_v2  ;;  %v12572_v56 = vcombine.high %v9382_v20, %v9382_v20 }
 0x193   : > { %5699 = vmatprep.mubr.bf16.mxu1 %v12571_v49  ;;  %v2919_v3 = vmax.f32 %v9397_v22, %v9512_v2  ;;  %v3045_v63 = vmax.f32 %v2917_v38, %v9304_v23  ;;  %v12573_v57 = vcombine.high %v9374_v40, %v9374_v40  ;;  %v3042_v53 = vmax.f32 %v2914_v50, %v9298_v54 }
 0x194   : > { %v2918_v46 = vmax.f32 %v12572_v56, %v9516_v28  ;;  %v9546_v39 = vpop.f32.mrb[64].mxu0  ;;  %v3043_v42 = vmax.f32 %v2915_v51, %v9294_v32  ;;  %v3364_v0 = vrot.slane %v3041_v60, %v8971_v52  ;;  %v7860_v17 = vrot.slane %v3041_v60, 9 }
 0x195   : > { %v2916_v25 = vmax.f32 %v12573_v57, %v9525_v5  ;;  %v1142_v20 = vpop.f32.mrb[65].mxu0  ;;  %v12574_v11 = vcombine.high %v9397_v22, %v9397_v22  ;;  %v3047_v12 = vmax.f32 %v2919_v3, %v9315_v26  ;;  %v3368_v54 = vrot.slane %v3042_v53, %v8971_v52 }
 0x196   : > { %v3046_v14 = vmax.f32 %v2918_v46, %v9319_v24  ;;  %v9561_v36 = vpop.f32.mrb[66].mxu0  ;;  %v3372_v32 = vrot.slane %v3043_v42, %v8971_v52  ;;  %v7861_v38 = vrot.slane %v3042_v53, 9  ;;  %v7862_v50 = vrot.slane %v3043_v42, 9 }
 0x197   : > { %v2920_v23 = vmax.f32 %v12574_v11, %v9537_v9  ;;  %v3044_v40 = vmax.f32 %v2916_v25, %v9309_v10  ;;  %v1145_v43 = vpop.f32.mrb[67].mxu0  ;;  %v9566_v51 = vmax.f32 %v3041_v60, %v7860_v17  ;;  %v9572_v24 = vrot.slane %v1877_v19, %v8957_v34 }
 0x198   : > { %v3727_v56 = vsel %vm3697_vm3, %v3368_v54, %v3364_v0  ;;  %v3380_v46 = vrot.slane %v3045_v63, %v8971_v52  ;;  %v9578_v57 = vmax.f32 %v3042_v53, %v7861_v38  ;;  %v9580_v25 = vmax.f32 %v3043_v42, %v7862_v50 }
 0x199   : > { %12575 = vst [vmem:[#allocation7_spill] sm:$0xff] %v9566_v51  ;;  %v9569_v22 = vmax.f32 %v2920_v23, %v9330_v41  ;;  %v3376_v26 = vrot.slane %v3044_v40, %v8971_v52  ;;  %v7863_v10 = vrot.slane %v3044_v40, 9  ;;  %v3728_v3 = vsel %vm3699_vm4, %v3372_v32, %v3727_v56 }
 0x19a   : > { %12577 = vst [vmem:[#allocation9_spill] sm:$0xff] %v9578_v57  ;;  %12578 = vst [vmem:[#allocation23_spill] sm:$0xff] %v9580_v25  ;;  %v3384_v60 = vrot.slane %v3046_v14, %v8971_v52  ;;  %v3388_v41 = vrot.slane %v3047_v12, %v8971_v52  ;;  %v7864_v20 = vrot.slane %v3045_v63, 9  ;;  %v7865_v17 = vrot.slane %v3046_v14, 9 }
 0x19b   : > { %12576 = vst [vmem:[#allocation8_spill] sm:$0xff] %v9569_v22  ;;  %v3729_v19 = vsel %vm3701_vm5, %v3376_v26, %v3728_v3  ;;  %v9585_v11 = vmax.f32 %v3044_v40, %v7863_v10  ;;  %v7866_v23 = vrot.slane %v3047_v12, 9  ;;  %v1892_v43 = vcombine.high %v9521_v27, %v9521_v27 }
 0x19c   : > { %v3730_v0 = vsel %vm3703_vm6, %v3380_v46, %v3729_v19  ;;  %v9589_v32 = vpop.f32.mrb[68].mxu0  ;;  %v4267_v42 = vmax.f32 %v3045_v63, %v7864_v20  ;;  %v9592_v38 = vmax.f32 %v3046_v14, %v7865_v17  ;;  %v1893_v40 = vcombine.high %v9572_v24, %v9572_v24 }
 0x19d   : > { %12579 = vst [vmem:[#allocation24_spill] sm:$0xff] %v9585_v11  ;;  %12580 = vst [vmem:[#allocation25_spill] sm:$0xff] %v9589_v32  ;;  %v3731_v53 = vsel %vm3705_vm7, %v3384_v60, %v3730_v0  ;;  %v1150_v50 = vpop.f32.mrb[69].mxu0  ;;  %v1894_v56 = vcombine.high %v9499_v47, %v9499_v47  ;;  %v1901_v10 = vrot.slane %v9499_v47, %v8957_v34 }
 0x19e   : > { %12581 = vst [vmem:[#allocation26_spill] sm:$0xff] %v9592_v38  ;;  %v3732_v26 = vsel %vm3707_vm8, %v3388_v41, %v3731_v53  ;;  %v9603_v46 = vpop.f32.mrb[70].mxu0  ;;  %v1296_v14 = vmul.f32 %v9454_v8, %v9337_v33  ;;  %v1297_v3 = vmul.f32 %v9454_v8, %v9344_v58  ;;  %v1298_v60 = vmul.f32 %v9454_v8, %v9376_v4 }
 0x19f   : > { %12582 = vst [vmem:[#allocation27_spill] sm:$0xff] %v9603_v46  ;;  %v3819_v63 = vsel %vm971_vm1, 0.0, %v3732_v26  ;;  %v1153_v41 = vpop.f32.mrb[71].mxu0  ;;  %v9612_v19 = vmax.f32 %v3047_v12, %v7866_v23  ;;  %v1908_v47 = vrot.slane %v1894_v56, %v8957_v34  ;;  %v1299_v58 = vmul.f32 %v9454_v8, %v9391_v16  ;;  %v12586_v56 = vld [vmem:[#allocation13_spill] sm:$0xff]  ;;  %v12590_v46 = vld [vmem:[#allocation18_spill] sm:$0xff] }
 0x1a0   : > { %v4443_v20 = vcombine.high %v3819_v63, %v3819_v63  ;;  %v9615_v17 = vrot.slane %v3819_v63, %v8957_v34  ;;  %v1367_v0 = vadd.f32 %v9471_v6, %v1296_v14  ;;  %v1368_v53 = vadd.f32 %v9471_v6, %v1297_v3  ;;  %v12589_v12 = vld [vmem:[#allocation17_spill] sm:$0xff] }
 0x1a1   : > { %12583 = vst [vmem:[#allocation28_spill] sm:$0xff] %v9612_v19  ;;  %v1369_v33 = vadd.f32 %v9471_v6, %v1298_v60  ;;  %v1909_v23 = vcombine.high %v1901_v10, %v1901_v10  ;;  %v1910_v50 = vcombine.high %v1908_v47, %v1908_v47  ;;  %v12587_v54 = vrot.slane %v12586_v56, 9 }
 0x1a2   : > { %12584 = vst [vmem:[#allocation29_spill] sm:$0xff] %v9615_v17  ;;  %v9624_v4 = vrot.slane %v4443_v20, %v8957_v34  ;;  %v1431_v26 = vmax.f32 %v1367_v0, 0.0  ;;  %v1432_v63 = vmax.f32 %v1368_v53, 0.0  ;;  %v1370_v60 = vadd.f32 %v9471_v6, %v1299_v58 }
 0x1a3   : > { %v1433_v41 = vmax.f32 %v1369_v33, 0.0  ;;  %v9630_v14 = vmax.f32 %v12586_v56, %v12587_v54  ;;  %v12588_v16 = vrot.slane %v9357_v30, 9  ;;  %v9641_v7 = vcombine.high %v12589_v12, %v12589_v12 }
 0x1a4   : > { %12585 = vst [vmem:[#allocation30_spill] sm:$0xff] %v9624_v4  ;;  %v4875_v3 = vmax.f32 %v4267_v42, %v9624_v4  ;;  %v1911_v0 = vcombine.high %v1431_v26, %v1431_v26  ;;  %v9644_v53 = vrot.slane %v1431_v26, %v8957_v34  ;;  %v1928_v33 = vcombine.high %v1432_v63, %v1432_v63 }
 0x1a5   : > { %v9637_v20 = vmax.f32 %v9357_v30, %v12588_v16  ;;  %v9647_v54 = vrot.slane %v1432_v63, %v8957_v34  ;;  %v1945_v56 = vcombine.high %v1433_v41, %v1433_v41  ;;  %v9650_v58 = vrot.slane %v1433_v41, %v8957_v34 }
 0x1a6   : > { %v5003_v42 = vpack.c.bf16 %v4875_v3, %v4875_v3  ;;  %v9654_v30 = vcombine.high %v12590_v46, %v12590_v46  ;;  %v9657_v16 = vrot.slane %v1911_v0, %v8957_v34  ;;  %v9661_v26 = vcombine.high %v9644_v53, %v9644_v53 }
 0x1a7   : > { %v2921_v63 = vmax.f32 %v9521_v27, %v9644_v53  ;;  %v9666_v3 = vrot.slane %v1928_v33, %v8957_v34  ;;  %v9672_v41 = vcombine.high %v9647_v54, %v9647_v54  ;;  %v2925_v19 = vmax.f32 %v1901_v10, %v9647_v54 }
 0x1a8   : > { %v9668_v32 = vunpack.c.l.b16 %v5003_v42  ;;  %v9675_v0 = vmax.f32 %v1370_v60, 0.0  ;;  %v9679_v38 = vcombine.high %v9657_v16, %v9657_v16  ;;  %v2922_v11 = vmax.f32 %v1892_v43, %v9661_v26  ;;  %v9685_v42 = vpop.f32.mrb[72].mxu0 }
 0x1a9   : > { %v2923_v27 = vmax.f32 %v9572_v24, %v9657_v16  ;;  %v3049_v33 = vmax.f32 %v2921_v63, %v9494_v62  ;;  %12592 = vst [vmem:[#allocation17_spill] sm:$0xff] %v9685_v42  ;;  %v9689_v25 = vcombine.high %v9666_v3, %v9666_v3  ;;  %v2926_v10 = vmax.f32 %v1909_v23, %v9672_v41  ;;  %v1158_v51 = vpop.f32.mrb[73].mxu0 }
 0x1aa   : > { %12591 = vst [vmem:[#allocation13_spill] sm:$0xff] %v9668_v32  ;;  %v2927_v60 = vmax.f32 %v1908_v47, %v9666_v3  ;;  %v9694_v57 = vrot.slane %v1945_v56, %v8957_v34  ;;  %v2924_v43 = vmax.f32 %v1893_v40, %v9679_v38  ;;  %v3050_v24 = vmax.f32 %v2922_v11, %v9506_v45  ;;  %v9700_v42 = vpop.f32.mrb[74].mxu0 }
 0x1ab   : > { %v3051_v62 = vmax.f32 %v2923_v27, %v9502_v21  ;;  %v3392_v63 = vrot.slane %v3049_v33, %v8971_v52  ;;  %12593 = vst [vmem:[#allocation18_spill] sm:$0xff] %v9700_v42  ;;  %v7868_v4 = vrot.slane %v3049_v33, 9  ;;  %v2928_v17 = vmax.f32 %v1910_v50, %v9689_v25  ;;  %v1161_v56 = vpop.f32.mrb[75].mxu0 }
 0x1ac   : > { %v3053_v23 = vmax.f32 %v2925_v19, %v9497_v35  ;;  %v3054_v47 = vmax.f32 %v2926_v10, %v9516_v28  ;;  %v3052_v51 = vmax.f32 %v2924_v43, %v9525_v5  ;;  %v3396_v40 = vrot.slane %v3050_v24, %v8971_v52  ;;  %v9708_v21 = vpop.f32.mrb[76].mxu0 }
 0x1ad   : > { %v3400_v45 = vrot.slane %v3051_v62, %v8971_v52  ;;  %v7869_v11 = vrot.slane %v3050_v24, 9  ;;  %12594 = vst [vmem:[#allocation31_spill] sm:$0xff] %v9708_v21  ;;  %v7870_v42 = vrot.slane %v3051_v62, 9  ;;  %v3055_v22 = vmax.f32 %v2927_v60, %v9512_v2  ;;  %v1166_v35 = vpop.f32.mrb[77].mxu0 }
 0x1ae   : > { %v9713_v50 = vmax.f32 %v2928_v17, %v9537_v9  ;;  %v3404_v28 = vrot.slane %v3052_v51, %v8971_v52  ;;  %v3733_v5 = vsel %vm3697_vm3, %v3396_v40, %v3392_v63  ;;  %v7871_v19 = vrot.slane %v3052_v51, 9  ;;  %v9725_v2 = vpop.f32.mrb[78].mxu0 }
 0x1af   : > { %v9717_v10 = vmax.f32 %v3049_v33, %v7868_v4  ;;  %v3734_v43 = vsel %vm3699_vm4, %v3400_v45, %v3733_v5  ;;  %v9720_v56 = vmax.f32 %v3050_v24, %v7869_v11  ;;  %v9722_v21 = vmax.f32 %v3051_v62, %v7870_v42  ;;  %12597 = vst [vmem:[#allocation34_spill] sm:$0xff] %v9725_v2  ;;  %v1169_v40 = vpop.f32.mrb[79].mxu0  ;;  %v12601_v62 = vld [vmem:[#allocation10_spill] sm:$0xff] }
 0x1b0   : > { %v3408_v27 = vrot.slane %v3053_v23, %v8971_v52  ;;  %v9727_v9 = vmax.f32 %v3052_v51, %v7871_v19  ;;  %v3412_v17 = vrot.slane %v3054_v47, %v8971_v52  ;;  %v3735_v60 = vsel %vm3701_vm5, %v3404_v28, %v3734_v43  ;;  %v12603_v51 = vld [vmem:[#allocation11_spill] sm:$0xff] }
 0x1b1   : > { %12595 = vst [vmem:[#allocation32_spill] sm:$0xff] %v9720_v56  ;;  %12596 = vst [vmem:[#allocation33_spill] sm:$0xff] %v9722_v21  ;;  %v7872_v63 = vrot.slane %v3053_v23, 9  ;;  %v3416_v4 = vrot.slane %v3055_v22, %v8971_v52  ;;  %v7873_v24 = vrot.slane %v3054_v47, 9  ;;  %v7874_v45 = vrot.slane %v3055_v22, 9 }
 0x1b2   : > { %12598 = vst [vmem:[#allocation35_spill] sm:$0xff] %v9727_v9  ;;  %v3736_v33 = vsel %vm3703_vm6, %v3408_v27, %v3735_v60  ;;  %v1962_v27 = vcombine.high %v9675_v0, %v9675_v0  ;;  %v9747_v43 = vrot.slane %v9675_v0, %v8957_v34  ;;  %v4656_v40 = vrot.slane %v9641_v7, 1  ;;  %v12607_v9 = vld [vmem:[#allocation16_spill] sm:$0xff] }
 0x1b3   : > { %v3737_v42 = vsel %vm3705_vm7, %v3412_v17, %v3736_v33  ;;  %v4275_v11 = vmax.f32 %v3053_v23, %v7872_v63  ;;  %v9738_v5 = vmax.f32 %v3054_v47, %v7873_v24  ;;  %v4441_v23 = vcombine.high %v9394_v37, %v9394_v37 }
 0x1b4   : > { %v3738_v35 = vsel %vm3707_vm8, %v3416_v4, %v3737_v42  ;;  %v4442_v17 = vcombine.high %v9409_v13, %v9409_v13  ;;  %v9753_v47 = vmax.f32 %v3055_v22, %v7874_v45  ;;  %v9760_v4 = vrot.slane %v1962_v27, %v8957_v34 }
 0x1b5   : > { %12599 = vst [vmem:[#allocation36_spill] sm:$0xff] %v9738_v5  ;;  %v3820_v19 = vsel %vm971_vm1, 0.0, %v3738_v35  ;;  %v4657_v33 = vrot.slane %v12590_v46, 1  ;;  %v4658_v24 = vrot.slane %v9654_v30, 1  ;;  %v4660_v45 = vrot.slane %v4441_v23, 1  ;;  %v12604_v46 = vld [vmem:[#allocation12_spill] sm:$0xff] }
 0x1b6   : > { %12600 = vst [vmem:[#allocation37_spill] sm:$0xff] %v9753_v47  ;;  %v4460_v60 = vcombine.high %v3820_v19, %v3820_v19  ;;  %v9756_v63 = vrot.slane %v3820_v19, %v8957_v34  ;;  %v4661_v35 = vrot.slane %v9409_v13, 1  ;;  %v4662_v19 = vrot.slane %v4442_v17, 1  ;;  %v12606_v5 = vld [vmem:[#allocation15_spill] sm:$0xff] }
 0x1b7   : > { %v4855_v27 = vmax.f32 %v12601_v62, %v12589_v12  ;;  %v12602_v28 = vrot.slane %v12589_v12, 1  ;;  %v4857_v2 = vmax.f32 %v12604_v46, %v9641_v7  ;;  %v4860_v22 = vmax.f32 %v12606_v5, %v4657_v33  ;;  %v12610_v5 = vld [vmem:[#allocation20_spill] sm:$0xff]  ;;  %v12611_v46 = vld [vmem:[#allocation21_spill] sm:$0xff] }
 0x1b8   : > { %v9767_v42 = vrot.slane %v4460_v60, %v8957_v34  ;;  %v12605_v60 = vld [vmem:[#allocation14_spill] sm:$0xff]  ;;  %v4861_v13 = vmax.f32 %v12607_v9, %v9654_v30  ;;  %v4862_v21 = vmax.f32 %v9630_v14, %v4658_v24  ;;  %v4863_v62 = vmax.f32 %v9347_v55, %v9394_v37 }
 0x1b9   : > { %v4856_v0 = vmax.f32 %v12603_v51, %v12602_v28  ;;  %v4858_v47 = vmax.f32 %v12605_v60, %v4656_v40  ;;  %v12608_v12 = vrot.slane %v9394_v37, 1  ;;  %v4865_v7 = vmax.f32 %v9352_v31, %v4441_v23  ;;  %v9790_v28 = vpop.f32.mrb[80].mxu0 }
 0x1ba   : > { %v4883_v32 = vmax.f32 %v4275_v11, %v9767_v42  ;;  %12609 = vst [vmem:[#allocation10_spill] sm:$0xff] %v9790_v28  ;;  %v4866_v40 = vmax.f32 %v9361_v1, %v4660_v45  ;;  %v4868_v33 = vmax.f32 %v12610_v5, %v4661_v35  ;;  %v4869_v30 = vmax.f32 %v12611_v46, %v4442_v17  ;;  %v1174_v9 = vpop.f32.mrb[81].mxu0 }
 0x1bb   : > { %v4864_v51 = vmax.f32 %v9349_v48, %v12608_v12  ;;  %v4870_v14 = vmax.f32 %v9637_v20, %v4662_v19  ;;  %v4983_v24 = vpack.c.bf16 %v4855_v27, %v4855_v27  ;;  %v4984_v55 = vpack.c.bf16 %v4856_v0, %v4856_v0  ;;  %v9796_v37 = vpop.f32.mrb[82].mxu0 }
 0x1bc   : > { %v5011_v11 = vpack.c.bf16 %v4883_v32, %v4883_v32  ;;  %v4985_v60 = vpack.c.bf16 %v4857_v2, %v4857_v2  ;;  %12612 = vst [vmem:[#allocation11_spill] sm:$0xff] %v9796_v37  ;;  %v4986_v31 = vpack.c.bf16 %v4858_v47, %v4858_v47  ;;  %v4988_v23 = vpack.c.bf16 %v4860_v22, %v4860_v22  ;;  %v1177_v12 = vpop.f32.mrb[83].mxu0 }
 0x1bd   : > { %v4989_v32 = vpack.c.bf16 %v4861_v13, %v4861_v13  ;;  %v4990_v1 = vpack.c.bf16 %v4862_v21, %v4862_v21  ;;  %v4991_v45 = vpack.c.bf16 %v4863_v62, %v4863_v62  ;;  %v4992_v35 = vpack.c.bf16 %v4864_v51, %v4864_v51 }
 0x1be   : > { %v4993_v5 = vpack.c.bf16 %v4865_v7, %v4865_v7  ;;  %v9800_v17 = vunpack.c.l.b16 %v5011_v11  ;;  %v4994_v46 = vpack.c.bf16 %v4866_v40, %v4866_v40  ;;  %v4996_v20 = vpack.c.bf16 %v4868_v33, %v4868_v33 }
 0x1bf   : > { %v4997_v19 = vpack.c.bf16 %v4869_v30, %v4869_v30  ;;  %v4998_v0 = vpack.c.bf16 %v4870_v14, %v4870_v14  ;;  %v5247_v2 = vunpack.c.l.b16 %v4983_v24  ;;  %v5248_v27 = vunpack.c.l.b16 %v4984_v55 }
 0x1c0   : > { %v5249_v9 = vunpack.c.l.b16 %v4985_v60  ;;  %v5250_v37 = vunpack.c.l.b16 %v4986_v31  ;;  %v5252_v28 = vunpack.c.l.b16 %v4988_v23  ;;  %v5253_v48 = vunpack.c.l.b16 %v4989_v32 }
 0x1c1   : > { %v5254_v47 = vunpack.c.l.b16 %v4990_v1  ;;  %v5255_v22 = vunpack.c.l.b16 %v4991_v45  ;;  %v5256_v13 = vunpack.c.l.b16 %v4992_v35  ;;  %v5257_v12 = vunpack.c.l.b16 %v4993_v5 }
 0x1c2   : > { %v5258_v21 = vunpack.c.l.b16 %v4994_v46  ;;  %v5260_v62 = vunpack.c.l.b16 %v4996_v20  ;;  %v5261_v51 = vunpack.c.l.b16 %v4997_v19  ;;  %v5262_v7 = vunpack.c.l.b16 %v4998_v0  ;;  %v12615_v19 = vld [vmem:[#allocation22_spill] sm:$0xff] }
 0x1c3   : > { %v5388_v11 = vrot.slane %v5248_v27, 7  ;;  %v5390_v56 = vrot.slane %v5249_v9, 6  ;;  %v5392_v40 = vrot.slane %v5250_v37, 5  ;;  %v5396_v33 = vrot.slane %v5252_v28, 3  ;;  %v12613_v28 = vld [vmem:[#allocation19_spill] sm:$0xff] }
 0x1c4   : > { %v5398_v30 = vrot.slane %v5253_v48, 2  ;;  %v5400_v24 = vrot.slane %v5254_v47, 1  ;;  %v5402_v55 = vrot.slane %v5256_v13, 7  ;;  %v5404_v60 = vrot.slane %v5257_v12, 6 }
 0x1c5   : > { %v5389_v14 = vsel %vm5360_vm9, %v5388_v11, %v5247_v2  ;;  %v5406_v23 = vrot.slane %v5258_v21, 5  ;;  %v5410_v32 = vrot.slane %v5260_v62, 3  ;;  %v5412_v1 = vrot.slane %v5261_v51, 2  ;;  %v12637_v11 = vld [vmem:[#allocation26_spill] sm:$0xff] }
 0x1c6   : > { %v5391_v31 = vsel %vm3697_vm3, %v5390_v56, %v5389_v14  ;;  %v5403_v35 = vsel %vm5360_vm9, %v5402_v55, %v5255_v22  ;;  %v5414_v5 = vrot.slane %v5262_v7, 1  ;;  %v1300_v37 = vmul.f32 %v9454_v8, %v9430_v44 }
 0x1c7   : > { %v5393_v45 = vsel %vm3699_vm4, %v5392_v40, %v5391_v31  ;;  %v12614_v48 = vrot.slane %v12613_v28, 4  ;;  %v5405_v20 = vsel %vm3697_vm3, %v5404_v60, %v5403_v35  ;;  %v1301_v56 = vmul.f32 %v9454_v8, %v12615_v19 }
 0x1c8   : > { %v1302_v0 = vmul.f32 %v9454_v8, %v9444_v18  ;;  %v5407_v27 = vsel %vm3699_vm4, %v5406_v23, %v5405_v20  ;;  %v1371_v9 = vadd.f32 %v9471_v6, %v1300_v37  ;;  %v1303_v44 = vmul.f32 %v9454_v8, %v9446_v59 }
 0x1c9   : > { %v5395_v46 = vsel %vm3701_vm5, %v12614_v48, %v5393_v45  ;;  %v12616_v22 = vrot.slane %v9442_v61, 4  ;;  %v1372_v12 = vadd.f32 %v9471_v6, %v1301_v56  ;;  %v12617_v19 = vcombine.high %v9650_v58, %v9650_v58 }
 0x1ca   : > { %v5397_v2 = vsel %vm3703_vm6, %v5396_v33, %v5395_v46  ;;  %v1373_v21 = vadd.f32 %v9471_v6, %v1302_v0  ;;  %v1435_v51 = vmax.f32 %v1371_v9, 0.0  ;;  %v1374_v7 = vadd.f32 %v9471_v6, %v1303_v44 }
 0x1cb   : > { %v5399_v47 = vsel %vm3705_vm7, %v5398_v30, %v5397_v2  ;;  %v5409_v13 = vsel %vm3701_vm5, %v12616_v22, %v5407_v27  ;;  %v1436_v40 = vmax.f32 %v1372_v12, 0.0  ;;  %v12618_v9 = vcombine.high %v9747_v43, %v9747_v43 }
 0x1cc   : > { %v5401_v18 = vsel %vm3707_vm8, %v5400_v24, %v5399_v47  ;;  %v5411_v62 = vsel %vm3703_vm6, %v5410_v32, %v5409_v13  ;;  %v1437_v33 = vmax.f32 %v1373_v21, 0.0  ;;  %v1979_v30 = vcombine.high %v1435_v51, %v1435_v51  ;;  %v9845_v32 = vpop.f32.mrb[84].mxu0 }
 0x1cd   : > { %v5413_v59 = vsel %vm3705_vm7, %v5412_v1, %v5411_v62  ;;  %v9834_v14 = vrot.slane %v1435_v51, %v8957_v34  ;;  %v9838_v24 = vmul.f32 %v9454_v8, %v9482_v29  ;;  %v1996_v60 = vcombine.high %v1436_v40, %v1436_v40 }
 0x1ce   : > { %v5415_v61 = vsel %vm3707_vm8, %v5414_v5, %v5413_v59  ;;  %v9841_v31 = vrot.slane %v1436_v40, %v8957_v34  ;;  %v9843_v23 = vmax.f32 %v1374_v7, 0.0  ;;  %v9848_v1 = vrot.slane %v1979_v30, %v8957_v34  ;;  %v1182_v5 = vpop.f32.mrb[85].mxu0 }
 0x1cf   : > { %v5585_v55 = vpack.c.b16 %v5415_v61, %v5401_v18  ;;  %v9852_v45 = vcombine.high %v9834_v14, %v9834_v14  ;;  %v2929_v29 = vmax.f32 %v9650_v58, %v9834_v14  ;;  %v2013_v35 = vcombine.high %v1437_v33, %v1437_v33  ;;  %v9919_v30 = vpop.f32.mrb[86].mxu0 }
 0x1d0   : > { %v9858_v37 = vrot.slane %v1996_v60, %v8957_v34  ;;  %v9862_v28 = vcombine.high %v9841_v31, %v9841_v31  ;;  %v2933_v48 = vmax.f32 %v9747_v43, %v9841_v31  ;;  %v9867_v46 = vrot.slane %v1437_v33, %v8957_v34  ;;  %v1185_v5 = vpop.f32.mrb[87].mxu0 }
 0x1d1   : > { %7965 = vmatmul.mubr.msk.bf16.gmra.mrb[4].mxu1 %vm5632_vm10, %v5585_v55  ;;  %v9871_v20 = vcombine.high %v9848_v1, %v9848_v1  ;;  %v2930_v56 = vmax.f32 %v12617_v19, %v9852_v45  ;;  %v2931_v0 = vmax.f32 %v9694_v57, %v9848_v1  ;;  %v3057_v2 = vmax.f32 %v2929_v29, %v9644_v53 }
 0x1d2   : > { %5709 = vmatprep.mubr.bf16.mxu1 %v12571_v49  ;;  %v9883_v27 = vcombine.high %v9858_v37, %v9858_v37  ;;  %v2934_v44 = vmax.f32 %v12618_v9, %v9862_v28  ;;  %v2935_v58 = vmax.f32 %v9760_v4, %v9858_v37  ;;  %v3061_v47 = vmax.f32 %v2933_v48, %v9647_v54 }
 0x1d3   : > { %v12619_v53 = vcombine.high %v9694_v57, %v9694_v57  ;;  %v3058_v13 = vmax.f32 %v2930_v56, %v9661_v26  ;;  %v3059_v12 = vmax.f32 %v2931_v0, %v9657_v16  ;;  %v3420_v21 = vrot.slane %v3057_v2, %v8971_v52 }
 0x1d4   : > { %v7876_v18 = vrot.slane %v3057_v2, 9  ;;  %v12620_v43 = vcombine.high %v9760_v4, %v9760_v4  ;;  %v3062_v51 = vmax.f32 %v2934_v44, %v9672_v41  ;;  %v3063_v54 = vmax.f32 %v2935_v58, %v9666_v3 }
 0x1d5   : > { %v2932_v22 = vmax.f32 %v12619_v53, %v9871_v20  ;;  %v3424_v57 = vrot.slane %v3058_v13, %v8971_v52  ;;  %v3428_v26 = vrot.slane %v3059_v12, %v8971_v52  ;;  %v7877_v59 = vrot.slane %v3058_v13, 9 }
 0x1d6   : > { %v2936_v62 = vmax.f32 %v12620_v43, %v9883_v27  ;;  %v7878_v16 = vrot.slane %v3059_v12, 9  ;;  %v9908_v40 = vmax.f32 %v3057_v2, %v7876_v18  ;;  %v9914_v4 = vrot.slane %v2013_v35, %v8957_v34 }
 0x1d7   : > { %v3060_v7 = vmax.f32 %v2932_v22, %v9679_v38  ;;  %v3739_v3 = vsel %vm3697_vm3, %v3424_v57, %v3420_v21  ;;  %v3436_v38 = vrot.slane %v3061_v47, %v8971_v52  ;;  %v9922_v60 = vmax.f32 %v3058_v13, %v7877_v59 }
 0x1d8   : > { %v9911_v33 = vmax.f32 %v2936_v62, %v9689_v25  ;;  %v3740_v55 = vsel %vm3699_vm4, %v3428_v26, %v3739_v3  ;;  %v9924_v29 = vmax.f32 %v3059_v12, %v7878_v16  ;;  %v3440_v25 = vrot.slane %v3062_v51, %v8971_v52 }
 0x1d9   : > { %v3432_v41 = vrot.slane %v3060_v7, %v8971_v52  ;;  %v7879_v61 = vrot.slane %v3060_v7, 9  ;;  %v3444_v35 = vrot.slane %v3063_v54, %v8971_v52  ;;  %v7880_v19 = vrot.slane %v3061_v47, 9 }
 0x1da   : > { %v7881_v56 = vrot.slane %v3062_v51, 9  ;;  %v7882_v9 = vrot.slane %v3063_v54, 9  ;;  %v2028_v13 = vcombine.high %v9867_v46, %v9867_v46  ;;  %v2029_v21 = vcombine.high %v9914_v4, %v9914_v4 }
 0x1db   : > { %v3741_v48 = vsel %vm3701_vm5, %v3432_v41, %v3740_v55  ;;  %v9929_v0 = vmax.f32 %v3060_v7, %v7879_v61  ;;  %v4283_v53 = vmax.f32 %v3061_v47, %v7880_v19  ;;  %v2030_v18 = vcombine.high %v9843_v23, %v9843_v23 }
 0x1dc   : > { %v3742_v2 = vsel %vm3703_vm6, %v3436_v38, %v3741_v48  ;;  %v9934_v22 = vmax.f32 %v3062_v51, %v7881_v56  ;;  %v9945_v43 = vrot.slane %v9843_v23, %v8957_v34  ;;  %v1375_v47 = vadd.f32 %v9471_v6, %v9838_v24 }
 0x1dd   : > { %v3743_v58 = vsel %vm3705_vm7, %v3440_v25, %v3742_v2  ;;  %v1305_v51 = vmul.f32 %v9454_v8, %v9489_v15  ;;  %v1306_v7 = vmul.f32 %v9454_v8, %v9546_v39  ;;  %v9954_v57 = vmax.f32 %v3063_v54, %v7882_v9 }
 0x1de   : > { %v3744_v12 = vsel %vm3707_vm8, %v3444_v35, %v3743_v58  ;;  %v9960_v23 = vrot.slane %v2030_v18, %v8957_v34  ;;  %v1439_v16 = vmax.f32 %v1375_v47, 0.0  ;;  %v1307_v15 = vmul.f32 %v9454_v8, %v9561_v36  ;;  %v12621_v36 = vld [vmem:[#allocation8_spill] sm:$0xff]  ;;  %v12624_v47 = vld [vmem:[#allocation29_spill] sm:$0xff] }
 0x1df   : > { %v3821_v62 = vsel %vm971_vm1, 0.0, %v3744_v12  ;;  %v1376_v41 = vadd.f32 %v9471_v6, %v1305_v51  ;;  %v1377_v24 = vadd.f32 %v9471_v6, %v1306_v7  ;;  %v2045_v54 = vcombine.high %v9945_v43, %v9945_v43 }
 0x1e0   : > { %v4477_v26 = vcombine.high %v3821_v62, %v3821_v62  ;;  %v9957_v59 = vrot.slane %v3821_v62, %v8957_v34  ;;  %v2046_v61 = vcombine.high %v9960_v23, %v9960_v23  ;;  %v2047_v38 = vcombine.high %v1439_v16, %v1439_v16 }
 0x1e1   : > { %v2054_v55 = vrot.slane %v1439_v16, %v8957_v34  ;;  %v1440_v25 = vmax.f32 %v1376_v41, 0.0  ;;  %v9975_v5 = vmax.f32 %v1377_v24, 0.0  ;;  %v9979_v8 = vadd.f32 %v9471_v6, %v1307_v15 }
 0x1e2   : > { %v9967_v3 = vrot.slane %v4477_v26, %v8957_v34  ;;  %v12622_v48 = vrot.slane %v12621_v36, 9  ;;  %v12623_v56 = vrot.slane %v9713_v50, 9  ;;  %v2061_v9 = vrot.slane %v2047_v38, %v8957_v34  ;;  %v10006_v38 = vpop.f32.mrb[88].mxu0 }
 0x1e3   : > { %v2062_v58 = vcombine.high %v2054_v55, %v2054_v55  ;;  %v2937_v12 = vmax.f32 %v9867_v46, %v2054_v55  ;;  %v2064_v18 = vcombine.high %v1440_v25, %v1440_v25  ;;  %v2071_v6 = vrot.slane %v1440_v25, %v8957_v34  ;;  %12626 = vst [vmem:[#allocation14_spill] sm:$0xff] %v10006_v38 }
 0x1e4   : > { %v4891_v35 = vmax.f32 %v4283_v53, %v9967_v3  ;;  %v9984_v19 = vmax.f32 %v12621_v36, %v12622_v48  ;;  %v9989_v2 = vmax.f32 %v9713_v50, %v12623_v56  ;;  %v2081_v62 = vcombine.high %v9975_v5, %v9975_v5 }
 0x1e5   : > { %v9998_v51 = vcombine.high %v12624_v47, %v12624_v47  ;;  %v2063_v7 = vcombine.high %v2061_v9, %v2061_v9  ;;  %v2938_v26 = vmax.f32 %v2028_v13, %v2062_v58  ;;  %v2939_v50 = vmax.f32 %v9914_v4, %v2061_v9  ;;  %v1190_v4 = vpop.f32.mrb[89].mxu0 }
 0x1e6   : > { %v5019_v53 = vpack.c.bf16 %v4891_v35, %v4891_v35  ;;  %v3065_v16 = vmax.f32 %v2937_v12, %v9834_v14  ;;  %v2078_v46 = vrot.slane %v2064_v18, %v8957_v34  ;;  %v2079_v24 = vcombine.high %v2071_v6, %v2071_v6  ;;  %v10015_v9 = vpop.f32.mrb[90].mxu0 }
 0x1e7   : > { %v2941_v15 = vmax.f32 %v9945_v43, %v2071_v6  ;;  %v2940_v55 = vmax.f32 %v2029_v21, %v2063_v7  ;;  %v3066_v25 = vmax.f32 %v2938_v26, %v9852_v45  ;;  %v3067_v35 = vmax.f32 %v2939_v50, %v9848_v1  ;;  %12627 = vst [vmem:[#allocation15_spill] sm:$0xff] %v10015_v9  ;;  %v1193_v1 = vpop.f32.mrb[91].mxu0 }
 0x1e8   : > { %v10002_v41 = vunpack.c.l.b16 %v5019_v53  ;;  %v10012_v13 = vrot.slane %v9975_v5, %v8957_v34  ;;  %v3448_v14 = vrot.slane %v3065_v16, %v8971_v52  ;;  %v7884_v36 = vrot.slane %v3065_v16, 9  ;;  %v10022_v6 = vpop.f32.mrb[92].mxu0 }
 0x1e9   : > { %v2080_v48 = vcombine.high %v2078_v46, %v2078_v46  ;;  %v2942_v56 = vmax.f32 %v2045_v54, %v2079_v24  ;;  %v3068_v43 = vmax.f32 %v2940_v55, %v9871_v20  ;;  %v3452_v21 = vrot.slane %v3066_v25, %v8971_v52  ;;  %12628 = vst [vmem:[#allocation16_spill] sm:$0xff] %v10022_v6  ;;  %v1198_v50 = vpop.f32.mrb[93].mxu0 }
 0x1ea   : > { %12625 = vst [vmem:[#allocation12_spill] sm:$0xff] %v10002_v41  ;;  %v3456_v45 = vrot.slane %v3067_v35, %v8971_v52  ;;  %v7885_v58 = vrot.slane %v3066_v25, 9  ;;  %v7886_v5 = vrot.slane %v3067_v35, 9  ;;  %v2943_v18 = vmax.f32 %v9960_v23, %v2078_v46 }
 0x1eb   : > { %v2944_v53 = vmax.f32 %v2046_v61, %v2080_v48  ;;  %v3460_v54 = vrot.slane %v3068_v43, %v8971_v52  ;;  %v3745_v7 = vsel %vm3697_vm3, %v3452_v21, %v3448_v14  ;;  %v7887_v26 = vrot.slane %v3068_v43, 9  ;;  %v10036_v14 = vpop.f32.mrb[94].mxu0 }
 0x1ec   : > { %v4287_v20 = vmax.f32 %v3065_v16, %v7884_v36  ;;  %v3746_v24 = vsel %vm3699_vm4, %v3456_v45, %v3745_v7  ;;  %v10027_v55 = vmax.f32 %v3066_v25, %v7885_v58  ;;  %v3069_v4 = vmax.f32 %v2941_v15, %v9841_v31  ;;  %12629 = vst [vmem:[#allocation20_spill] sm:$0xff] %v10036_v14  ;;  %v1201_v21 = vpop.f32.mrb[95].mxu0  ;;  %v12638_v14 = vld [vmem:[#allocation28_spill] sm:$0xff] }
 0x1ed   : > { %v3070_v1 = vmax.f32 %v2942_v56, %v9862_v28  ;;  %v10031_v12 = vmax.f32 %v3067_v35, %v7886_v5  ;;  %v3071_v23 = vmax.f32 %v2943_v18, %v9858_v37  ;;  %v3072_v61 = vmax.f32 %v2944_v53, %v9883_v27 }
 0x1ee   : > { %v3747_v46 = vsel %vm3701_vm5, %v3460_v54, %v3746_v24  ;;  %v10038_v16 = vmax.f32 %v3068_v43, %v7887_v26  ;;  %v3464_v36 = vrot.slane %v3069_v4, %v8971_v52  ;;  %v7888_v25 = vrot.slane %v3069_v4, 9  ;;  %v12630_v54 = vld [vmem:[#allocation30_spill] sm:$0xff]  ;;  %v12635_v24 = vld [vmem:[#allocation24_spill] sm:$0xff] }
 0x1ef   : > { %v7889_v48 = vrot.slane %v3070_v1, 9  ;;  %v3468_v31 = vrot.slane %v3070_v1, %v8971_v52  ;;  %v7890_v28 = vrot.slane %v3071_v23, 9  ;;  %v7891_v15 = vrot.slane %v3072_v61, 9 }
 0x1f0   : > { %v10043_v35 = vrot.slane %v2081_v62, %v8957_v34  ;;  %v3472_v37 = vrot.slane %v3071_v23, %v8971_v52  ;;  %v3748_v27 = vsel %vm3703_vm6, %v3464_v36, %v3747_v46  ;;  %v4291_v56 = vmax.f32 %v3069_v4, %v7888_v25 }
 0x1f1   : > { %v4292_v45 = vmax.f32 %v3070_v1, %v7889_v48  ;;  %v3749_v43 = vsel %vm3705_vm7, %v3468_v31, %v3748_v27  ;;  %v10048_v58 = vmax.f32 %v3071_v23, %v7890_v28  ;;  %v10050_v5 = vmax.f32 %v3072_v61, %v7891_v15  ;;  %v10098_v27 = vpop.f32.mrb[96].mxu0 }
 0x1f2   : > { %v3750_v53 = vsel %vm3707_vm8, %v3472_v37, %v3749_v43  ;;  %v1442_v62 = vmax.f32 %v9979_v8, 0.0  ;;  %v4459_v7 = vcombine.high %v12630_v54, %v12630_v54  ;;  %v4475_v26 = vcombine.high %v9756_v63, %v9756_v63  ;;  %12636 = vst [vmem:[#allocation21_spill] sm:$0xff] %v10098_v27 }
 0x1f3   : > { %v3822_v50 = vsel %vm971_vm1, 0.0, %v3750_v53  ;;  %v4476_v4 = vcombine.high %v9767_v42, %v9767_v42  ;;  %v4664_v1 = vrot.slane %v9998_v51, 1  ;;  %v4665_v46 = vrot.slane %v12630_v54, 1  ;;  %v12631_v53 = vld [vmem:[#allocation7_spill] sm:$0xff]  ;;  %v12633_v54 = vld [vmem:[#allocation9_spill] sm:$0xff] }
 0x1f4   : > { %v4494_v23 = vcombine.high %v3822_v50, %v3822_v50  ;;  %v10067_v61 = vrot.slane %v3822_v50, %v8957_v34  ;;  %v2098_v8 = vcombine.high %v1442_v62, %v1442_v62  ;;  %v10071_v36 = vrot.slane %v1442_v62, %v8957_v34 }
 0x1f5   : > { %v4666_v25 = vrot.slane %v4459_v7, 1  ;;  %v4668_v48 = vrot.slane %v4475_v26, 1  ;;  %v4669_v21 = vrot.slane %v9767_v42, 1  ;;  %v4670_v37 = vrot.slane %v4476_v4, 1 }
 0x1f6   : > { %v10075_v31 = vrot.slane %v4494_v23, %v8957_v34  ;;  %v10079_v28 = vcombine.high %v10067_v61, %v10067_v61  ;;  %v10082_v15 = vmax.f32 %v4287_v20, %v10067_v61  ;;  %v10086_v43 = vrot.slane %v2098_v8, %v8957_v34  ;;  %v12634_v20 = vld [vmem:[#allocation23_spill] sm:$0xff]  ;;  %v12642_v8 = vld [vmem:[#allocation33_spill] sm:$0xff] }
 0x1f7   : > { %v4871_v62 = vmax.f32 %v12631_v53, %v12624_v47  ;;  %v12632_v42 = vrot.slane %v12624_v47, 1  ;;  %v4873_v44 = vmax.f32 %v12634_v20, %v9998_v51  ;;  %v4874_v18 = vmax.f32 %v12635_v24, %v4664_v1  ;;  %v12640_v1 = vld [vmem:[#allocation32_spill] sm:$0xff] }
 0x1f8   : > { %v4677_v23 = vrot.slane %v10075_v31, 1  ;;  %v4899_v39 = vmax.f32 %v4291_v56, %v10075_v31  ;;  %v4876_v53 = vmax.f32 %v12637_v11, %v4665_v46  ;;  %v4877_v47 = vmax.f32 %v12638_v14, %v4459_v7  ;;  %v12643_v11 = vld [vmem:[#allocation35_spill] sm:$0xff]  ;;  %v12644_v14 = vld [vmem:[#allocation36_spill] sm:$0xff] }
 0x1f9   : > { %v4872_v50 = vmax.f32 %v12633_v54, %v12632_v42  ;;  %v4878_v42 = vmax.f32 %v9984_v19, %v4666_v25  ;;  %v1206_v54 = vpop.f32.mrb[97].mxu0  ;;  %v4879_v51 = vmax.f32 %v9717_v10, %v9756_v63  ;;  %v12639_v24 = vrot.slane %v9756_v63, 1  ;;  %v12645_v19 = vld [vmem:[#allocation37_spill] sm:$0xff] }
 0x1fa   : > { %v10105_v6 = vmax.f32 %v4292_v45, %v4677_v23  ;;  %v5027_v56 = vpack.c.bf16 %v4899_v39, %v4899_v39  ;;  %v10112_v27 = vpop.f32.mrb[98].mxu0  ;;  %v4881_v9 = vmax.f32 %v12642_v8, %v4475_v26  ;;  %v4882_v46 = vmax.f32 %v12643_v11, %v4668_v48 }
 0x1fb   : > { %v4880_v20 = vmax.f32 %v12640_v1, %v12639_v24  ;;  %12641 = vst [vmem:[#allocation19_spill] sm:$0xff] %v10112_v27  ;;  %v4884_v7 = vmax.f32 %v12644_v14, %v4669_v21  ;;  %v4885_v25 = vmax.f32 %v12645_v19, %v4476_v4  ;;  %v1209_v45 = vpop.f32.mrb[99].mxu0  ;;  %v4886_v63 = vmax.f32 %v9989_v2, %v4670_v37 }
 0x1fc   : > { %v4999_v23 = vpack.c.bf16 %v4871_v62, %v4871_v62  ;;  %v5000_v54 = vpack.c.bf16 %v4872_v50, %v4872_v50  ;;  %v5001_v24 = vpack.c.bf16 %v4873_v44, %v4873_v44  ;;  %v5002_v1 = vpack.c.bf16 %v4874_v18, %v4874_v18 }
 0x1fd   : > { %v5004_v26 = vpack.c.bf16 %v4876_v53, %v4876_v53  ;;  %v10123_v8 = vunpack.c.l.b16 %v5027_v56  ;;  %v5005_v48 = vpack.c.bf16 %v4877_v47, %v4877_v47  ;;  %v5006_v21 = vpack.c.bf16 %v4878_v42, %v4878_v42 }
 0x1fe   : > { %v5007_v11 = vpack.c.bf16 %v4879_v51, %v4879_v51  ;;  %v5008_v4 = vpack.c.bf16 %v4880_v20, %v4880_v20  ;;  %v5009_v14 = vpack.c.bf16 %v4881_v9, %v4881_v9  ;;  %v5010_v19 = vpack.c.bf16 %v4882_v46, %v4882_v46 }
 0x1ff   : > { %v5012_v45 = vpack.c.bf16 %v4884_v7, %v4884_v7  ;;  %v5013_v39 = vpack.c.bf16 %v4885_v25, %v4885_v25  ;;  %v5014_v27 = vpack.c.bf16 %v4886_v63, %v4886_v63  ;;  %v5263_v41 = vunpack.c.l.b16 %v4999_v23 }
 0x200   : > { %v5264_v10 = vunpack.c.l.b16 %v5000_v54  ;;  %v5265_v38 = vunpack.c.l.b16 %v5001_v24  ;;  %v5266_v2 = vunpack.c.l.b16 %v5002_v1  ;;  %v5268_v37 = vunpack.c.l.b16 %v5004_v26 }
 0x201   : > { %v5269_v62 = vunpack.c.l.b16 %v5005_v48  ;;  %v5270_v44 = vunpack.c.l.b16 %v5006_v21  ;;  %v5271_v18 = vunpack.c.l.b16 %v5007_v11  ;;  %v5272_v50 = vunpack.c.l.b16 %v5008_v4 }
 0x202   : > { %v5273_v53 = vunpack.c.l.b16 %v5009_v14  ;;  %v5274_v56 = vunpack.c.l.b16 %v5010_v19  ;;  %v5276_v47 = vunpack.c.l.b16 %v5012_v45  ;;  %v5277_v42 = vunpack.c.l.b16 %v5013_v39  ;;  %v12647_v14 = vld [vmem:[#allocation27_spill] sm:$0xff]  ;;  %v12648_v45 = vld [vmem:[#allocation17_spill] sm:$0xff] }
 0x203   : > { %v5278_v51 = vunpack.c.l.b16 %v5014_v27  ;;  %v5416_v20 = vrot.slane %v5264_v10, 7  ;;  %v5418_v9 = vrot.slane %v5265_v38, 6  ;;  %v5420_v46 = vrot.slane %v5266_v2, 5  ;;  %v10131_v38 = vld [vmem:[%s12495_s2] ss:$0 sm:$0xff]  ;;  %v12646_v27 = vld [vmem:[#allocation25_spill] sm:$0xff] }
 0x204   : > { %v5424_v7 = vrot.slane %v5268_v37, 3  ;;  %v5426_v25 = vrot.slane %v5269_v62, 2  ;;  %v5428_v63 = vrot.slane %v5270_v44, 1  ;;  %v5430_v23 = vrot.slane %v5272_v50, 7  ;;  %v12649_v37 = vld [vmem:[#allocation13_spill] sm:$0xff] }
 0x205   : > { %v5432_v54 = vrot.slane %v5273_v53, 6  ;;  %v5417_v24 = vsel %vm5360_vm9, %v5416_v20, %v5263_v41  ;;  %v5434_v1 = vrot.slane %v5274_v56, 5  ;;  %v5438_v26 = vrot.slane %v5276_v47, 3  ;;  %v10148_v50 = vld [vmem:[%s12496_s3] ss:$0 sm:$0xff] }
 0x206   : > { %v5440_v48 = vrot.slane %v5277_v42, 2  ;;  %v5419_v21 = vsel %vm3697_vm3, %v5418_v9, %v5417_v24  ;;  %v5431_v11 = vsel %vm5360_vm9, %v5430_v23, %v5271_v18  ;;  %v5442_v4 = vrot.slane %v5278_v51, 1  ;;  %v12651_v56 = vld [vmem:[#allocation18_spill] sm:$0xff] }
 0x207   : > { %v1308_v39 = vmul.f32 %v10131_v38, %v12646_v27  ;;  %v5421_v10 = vsel %vm3699_vm4, %v5420_v46, %v5419_v21  ;;  %v5433_v41 = vsel %vm3697_vm3, %v5432_v54, %v5431_v11  ;;  %v1309_v19 = vmul.f32 %v10131_v38, %v12647_v14 }
 0x208   : > { %v1310_v2 = vmul.f32 %v10131_v38, %v12648_v45  ;;  %v12650_v62 = vrot.slane %v12649_v37, 4  ;;  %v5435_v18 = vsel %vm3699_vm4, %v5434_v1, %v5433_v41  ;;  %v1311_v47 = vmul.f32 %v10131_v38, %v12651_v56 }
 0x209   : > { %v1379_v53 = vadd.f32 %v10148_v50, %v1308_v39  ;;  %v12652_v51 = vrot.slane %v9800_v17, 4  ;;  %v1380_v9 = vadd.f32 %v10148_v50, %v1309_v19  ;;  %v10164_v17 = vpop.f32.mrb[100].mxu0 }
 0x20a   : > { %v5423_v44 = vsel %vm3701_vm5, %v12650_v62, %v5421_v10  ;;  %v1381_v46 = vadd.f32 %v10148_v50, %v1310_v2  ;;  %v1382_v1 = vadd.f32 %v10148_v50, %v1311_v47  ;;  %12653 = vst [vmem:[#allocation22_spill] sm:$0xff] %v10164_v17  ;;  %v12654_v47 = vcombine.high %v10012_v13, %v10012_v13 }
 0x20b   : > { %v5425_v42 = vsel %vm3703_vm6, %v5424_v7, %v5423_v44  ;;  %v5437_v20 = vsel %vm3701_vm5, %v12652_v51, %v5435_v18  ;;  %v1443_v24 = vmax.f32 %v1379_v53, 0.0  ;;  %v1444_v7 = vmax.f32 %v1380_v9, 0.0 }
 0x20c   : > { %v5427_v23 = vsel %vm3705_vm7, %v5426_v25, %v5425_v42  ;;  %v5439_v54 = vsel %vm3703_vm6, %v5438_v26, %v5437_v20  ;;  %v1445_v27 = vmax.f32 %v1381_v46, 0.0  ;;  %v1214_v26 = vpop.f32.mrb[101].mxu0  ;;  %v12655_v46 = vcombine.high %v10071_v36, %v10071_v36 }
 0x20d   : > { %v5429_v21 = vsel %vm3707_vm8, %v5428_v63, %v5427_v23  ;;  %v5441_v11 = vsel %vm3705_vm7, %v5440_v48, %v5439_v54  ;;  %v2115_v41 = vcombine.high %v1443_v24, %v1443_v24  ;;  %v10169_v25 = vrot.slane %v1443_v24, %v8957_v34 }
 0x20e   : > { %v5443_v10 = vsel %vm3707_vm8, %v5442_v4, %v5441_v11  ;;  %v2132_v19 = vcombine.high %v1444_v7, %v1444_v7  ;;  %v10172_v45 = vrot.slane %v1444_v7, %v8957_v34  ;;  %v10174_v63 = vmax.f32 %v1382_v1, 0.0 }
 0x20f   : > { %v5586_v14 = vpack.c.b16 %v5443_v10, %v5429_v21  ;;  %v10177_v48 = vrot.slane %v2115_v41, %v8957_v34  ;;  %v10181_v2 = vcombine.high %v10169_v25, %v10169_v25  ;;  %v2945_v4 = vmax.f32 %v10012_v13, %v10169_v25 }
 0x210   : > { %v2149_v37 = vcombine.high %v1445_v27, %v1445_v27  ;;  %v10187_v62 = vrot.slane %v2132_v19, %v8957_v34  ;;  %v10191_v44 = vcombine.high %v10172_v45, %v10172_v45  ;;  %v2949_v18 = vmax.f32 %v10071_v36, %v10172_v45 }
 0x211   : > { %7966 = vmatmul.mubr.msk.bf16.gmra.mrb[8].mxu1 %vm5632_vm10, %v5586_v14  ;;  %v10196_v53 = vrot.slane %v1445_v27, %v8957_v34  ;;  %v10200_v56 = vcombine.high %v10177_v48, %v10177_v48  ;;  %v2946_v42 = vmax.f32 %v12654_v47, %v10181_v2  ;;  %v2947_v51 = vmax.f32 %v10043_v35, %v10177_v48 }
 0x212   : > { %v3073_v20 = vmax.f32 %v2945_v4, 0.0  ;;  %5719 = vmatprep.mubr.bf16.mxu1 %v12571_v49  ;;  %v10211_v9 = vcombine.high %v10187_v62, %v10187_v62  ;;  %v2950_v23 = vmax.f32 %v12655_v46, %v10191_v44  ;;  %v2951_v54 = vmax.f32 %v10086_v43, %v10187_v62 }
 0x213   : > { %v3077_v13 = vmax.f32 %v2949_v18, 0.0  ;;  %v12656_v24 = vcombine.high %v10043_v35, %v10043_v35  ;;  %v3074_v21 = vmax.f32 %v2946_v42, 0.0  ;;  %v3075_v11 = vmax.f32 %v2947_v51, 0.0  ;;  %v10230_v35 = vpop.f32.mrb[102].mxu0 }
 0x214   : > { %v3476_v7 = vrot.slane %v3073_v20, %v8971_v52  ;;  %v7892_v27 = vrot.slane %v3073_v20, 9  ;;  %v12657_v10 = vcombine.high %v10086_v43, %v10086_v43  ;;  %v3078_v41 = vmax.f32 %v2950_v23, 0.0  ;;  %12658 = vst [vmem:[#allocation8_spill] sm:$0xff] %v10230_v35 }
 0x215   : > { %v2948_v1 = vmax.f32 %v12656_v24, %v10200_v56  ;;  %v3079_v26 = vmax.f32 %v2951_v54, 0.0  ;;  %v3480_v19 = vrot.slane %v3074_v21, %v8971_v52  ;;  %v3484_v4 = vrot.slane %v3075_v11, %v8971_v52  ;;  %v1217_v24 = vpop.f32.mrb[103].mxu0 }
 0x216   : > { %v2952_v36 = vmax.f32 %v12657_v10, %v10211_v9  ;;  %v7893_v18 = vrot.slane %v3074_v21, 9  ;;  %v7894_v47 = vrot.slane %v3075_v11, 9  ;;  %v10232_v42 = vmax.f32 %v3073_v20, %v7892_v27 }
 0x217   : > { %v3076_v14 = vmax.f32 %v2948_v1, 0.0  ;;  %v10235_v46 = vrot.slane %v2149_v37, %v8957_v34  ;;  %v3751_v23 = vsel %vm3697_vm3, %v3480_v19, %v3476_v7  ;;  %v3492_v1 = vrot.slane %v3077_v13, %v8971_v52 }
 0x218   : > { %12659 = vst [vmem:[#allocation29_spill] sm:$0xff] %v10232_v42  ;;  %v3080_v51 = vmax.f32 %v2952_v36, 0.0  ;;  %v3752_v10 = vsel %vm3699_vm4, %v3484_v4, %v3751_v23  ;;  %v10241_v39 = vmax.f32 %v3074_v21, %v7893_v18  ;;  %v10243_v35 = vmax.f32 %v3075_v11, %v7894_v47 }
 0x219   : > { %v3488_v43 = vrot.slane %v3076_v14, %v8971_v52  ;;  %v7895_v54 = vrot.slane %v3076_v14, 9  ;;  %v3496_v20 = vrot.slane %v3078_v41, %v8971_v52  ;;  %v3500_v27 = vrot.slane %v3079_v26, %v8971_v52 }
 0x21a   : > { %12660 = vst [vmem:[#allocation30_spill] sm:$0xff] %v10241_v39  ;;  %12661 = vst [vmem:[#allocation7_spill] sm:$0xff] %v10243_v35  ;;  %v7896_v36 = vrot.slane %v3077_v13, 9  ;;  %v7897_v24 = vrot.slane %v3078_v41, 9  ;;  %v7898_v19 = vrot.slane %v3079_v26, 9  ;;  %v7899_v42 = vrot.slane %v3080_v51, 9 }
 0x21b   : > { %v3753_v37 = vsel %vm3701_vm5, %v3488_v43, %v3752_v10  ;;  %v10248_v17 = vmax.f32 %v3076_v14, %v7895_v54  ;;  %v2164_v11 = vcombine.high %v10196_v53, %v10196_v53  ;;  %v2165_v43 = vcombine.high %v10235_v46, %v10235_v46  ;;  %v12665_v10 = vld [vmem:[#allocation34_spill] sm:$0xff] }
 0x21c   : > { %v3754_v7 = vsel %vm3703_vm6, %v3492_v1, %v3753_v37  ;;  %v4299_v21 = vmax.f32 %v3077_v13, %v7896_v36  ;;  %v4300_v18 = vmax.f32 %v3078_v41, %v7897_v24  ;;  %v10255_v23 = vmax.f32 %v3079_v26, %v7898_v19  ;;  %v12664_v13 = vld [vmem:[#allocation31_spill] sm:$0xff]  ;;  %v12667_v36 = vld [vmem:[#allocation10_spill] sm:$0xff] }
 0x21d   : > { %12662 = vst [vmem:[#allocation9_spill] sm:$0xff] %v10248_v17  ;;  %v3755_v4 = vsel %vm3705_vm7, %v3496_v20, %v3754_v7  ;;  %v2166_v14 = vcombine.high %v10174_v63, %v10174_v63  ;;  %v2173_v1 = vrot.slane %v10174_v63, %v8957_v34  ;;  %v1312_v41 = vmul.f32 %v10131_v38, %v12664_v13 }
 0x21e   : > { %v3756_v47 = vsel %vm3707_vm8, %v3500_v27, %v3755_v4  ;;  %12663 = vst [vmem:[#allocation23_spill] sm:$0xff] %v10255_v23  ;;  %v1313_v20 = vmul.f32 %v10131_v38, %v12665_v10  ;;  %v1314_v24 = vmul.f32 %v10131_v38, %v12667_v36  ;;  %v10276_v7 = vmax.f32 %v3080_v51, %v7899_v42  ;;  %v12669_v4 = vld [vmem:[#allocation11_spill] sm:$0xff] }
 0x21f   : > { %v3823_v54 = vsel %vm971_vm1, 0.0, %v3756_v47  ;;  %v10272_v37 = vrot.slane %v2166_v14, %v8957_v34  ;;  %v1383_v63 = vadd.f32 %v10148_v50, %v1312_v41  ;;  %v1315_v47 = vmul.f32 %v10131_v38, %v12669_v4 }
 0x220   : > { %v4511_v27 = vcombine.high %v3823_v54, %v3823_v54  ;;  %v10269_v26 = vrot.slane %v3823_v54, %v8957_v34  ;;  %12668 = vst [vmem:[#allocation26_spill] sm:$0xff] %v10276_v7  ;;  %v1384_v19 = vadd.f32 %v10148_v50, %v1313_v20  ;;  %v2181_v10 = vcombine.high %v2173_v1, %v2173_v1 }
 0x221   : > { %v1385_v14 = vadd.f32 %v10148_v50, %v1314_v24  ;;  %v2182_v36 = vcombine.high %v10272_v37, %v10272_v37  ;;  %v1447_v42 = vmax.f32 %v1383_v63, 0.0  ;;  %v10290_v41 = vadd.f32 %v10148_v50, %v1315_v47 }
 0x222   : > { %12666 = vst [vmem:[#allocation24_spill] sm:$0xff] %v10269_v26  ;;  %v10283_v13 = vrot.slane %v4511_v27, %v8957_v34  ;;  %v1448_v51 = vmax.f32 %v1384_v19, 0.0  ;;  %v12671_v27 = vrot.slane %v9911_v33, 9 }
 0x223   : > { %v1449_v7 = vmax.f32 %v1385_v14, 0.0  ;;  %v2183_v23 = vcombine.high %v1447_v42, %v1447_v42  ;;  %v10300_v24 = vrot.slane %v1447_v42, %v8957_v34  ;;  %v10311_v14 = vpop.f32.mrb[104].mxu0 }
 0x224   : > { %12670 = vst [vmem:[#allocation28_spill] sm:$0xff] %v10283_v13  ;;  %v4681_v20 = vrot.slane %v10283_v13, 1  ;;  %v4907_v4 = vmax.f32 %v4299_v21, %v10283_v13  ;;  %v10297_v54 = vmax.f32 %v9911_v33, %v12671_v27  ;;  %v2200_v17 = vcombine.high %v1448_v51, %v1448_v51  ;;  %12673 = vst [vmem:[#allocation33_spill] sm:$0xff] %v10311_v14 }
 0x225   : > { %v10303_v63 = vrot.slane %v1448_v51, %v8957_v34  ;;  %v2217_v35 = vcombine.high %v1449_v7, %v1449_v7  ;;  %v10309_v21 = vcombine.high %v9957_v59, %v9957_v59  ;;  %v10314_v33 = vrot.slane %v2183_v23, %v8957_v34 }
 0x226   : > { %v10305_v19 = vmax.f32 %v4300_v18, %v4681_v20  ;;  %v5035_v47 = vpack.c.bf16 %v4907_v4, %v4907_v4  ;;  %v10318_v42 = vcombine.high %v10300_v24, %v10300_v24  ;;  %v2953_v51 = vmax.f32 %v10196_v53, %v10300_v24  ;;  %v1222_v20 = vpop.f32.mrb[105].mxu0 }
 0x227   : > { %12674 = vst [vmem:[#allocation35_spill] sm:$0xff] %v10314_v33  ;;  %v10323_v18 = vrot.slane %v2200_v17, %v8957_v34  ;;  %v10329_v27 = vcombine.high %v10303_v63, %v10303_v63  ;;  %v2957_v23 = vmax.f32 %v2173_v1, %v10303_v63  ;;  %v10333_v14 = vrot.slane %v1449_v7, %v8957_v34 }
 0x228   : > { %12672 = vst [vmem:[#allocation32_spill] sm:$0xff] %v10305_v19  ;;  %v10325_v4 = vunpack.c.l.b16 %v5035_v47  ;;  %v10335_v19 = vpop.f32.mrb[106].mxu0  ;;  %v10339_v53 = vcombine.high %v10314_v33, %v10314_v33  ;;  %v2954_v17 = vmax.f32 %v2164_v11, %v10318_v42  ;;  %v2955_v47 = vmax.f32 %v10235_v46, %v10314_v33 }
 0x229   : > { %12675 = vst [vmem:[#allocation36_spill] sm:$0xff] %v10329_v27  ;;  %12676 = vst [vmem:[#allocation37_spill] sm:$0xff] %v10335_v19  ;;  %v3081_v20 = vmax.f32 %v2953_v51, %v10169_v25  ;;  %v1225_v39 = vpop.f32.mrb[107].mxu0  ;;  %v10347_v1 = vcombine.high %v10323_v18, %v10323_v18  ;;  %v2958_v7 = vmax.f32 %v2181_v10, %v10329_v27 }
 0x22a   : > { %12677 = vst [vmem:[#allocation25_spill] sm:$0xff] %v10339_v53  ;;  %v2959_v19 = vmax.f32 %v10272_v37, %v10323_v18  ;;  %v10353_v13 = vrot.slane %v2217_v35, %v8957_v34  ;;  %v10355_v26 = vpop.f32.mrb[108].mxu0  ;;  %v2956_v11 = vmax.f32 %v2165_v43, %v10339_v53  ;;  %v3082_v46 = vmax.f32 %v2954_v17, %v10181_v2 }
 0x22b   : > { %12678 = vst [vmem:[#allocation27_spill] sm:$0xff] %v10355_v26  ;;  %v3083_v39 = vmax.f32 %v2955_v47, %v10177_v48  ;;  %v3504_v25 = vrot.slane %v3081_v20, %v8971_v52  ;;  %v1230_v51 = vpop.f32.mrb[109].mxu0  ;;  %v7900_v33 = vrot.slane %v3081_v20, 9  ;;  %v2960_v10 = vmax.f32 %v2182_v36, %v10347_v1 }
 0x22c   : > { %v3085_v27 = vmax.f32 %v2957_v23, %v10172_v45  ;;  %v3086_v37 = vmax.f32 %v2958_v7, %v10191_v44  ;;  %v3084_v35 = vmax.f32 %v2956_v11, %v10200_v56  ;;  %v3508_v26 = vrot.slane %v3082_v46, %v8971_v52  ;;  %v10367_v2 = vpop.f32.mrb[110].mxu0 }
 0x22d   : > { %v3512_v43 = vrot.slane %v3083_v39, %v8971_v52  ;;  %v7901_v53 = vrot.slane %v3082_v46, 9  ;;  %12679 = vst [vmem:[#allocation17_spill] sm:$0xff] %v10367_v2  ;;  %v7902_v17 = vrot.slane %v3083_v39, 9  ;;  %v3087_v47 = vmax.f32 %v2959_v19, %v10187_v62  ;;  %v1233_v45 = vpop.f32.mrb[111].mxu0 }
 0x22e   : > { %v10372_v36 = vmax.f32 %v2960_v10, %v10211_v9  ;;  %v3516_v44 = vrot.slane %v3084_v35, %v8971_v52  ;;  %v3757_v56 = vsel %vm3697_vm3, %v3508_v26, %v3504_v25  ;;  %v7903_v23 = vrot.slane %v3084_v35, 9 }
 0x22f   : > { %v10376_v7 = vmax.f32 %v3081_v20, %v7900_v33  ;;  %v3758_v11 = vsel %vm3699_vm4, %v3512_v43, %v3757_v56  ;;  %v10379_v51 = vmax.f32 %v3082_v46, %v7901_v53  ;;  %v10381_v2 = vmax.f32 %v3083_v39, %v7902_v17 }
 0x230   : > { %v3520_v48 = vrot.slane %v3085_v27, %v8971_v52  ;;  %v10384_v62 = vmax.f32 %v3084_v35, %v7903_v23  ;;  %v3524_v9 = vrot.slane %v3086_v37, %v8971_v52  ;;  %v3759_v19 = vsel %vm3701_vm5, %v3516_v44, %v3758_v11 }
 0x231   : > { %v7904_v10 = vrot.slane %v3085_v27, 9  ;;  %v3528_v26 = vrot.slane %v3087_v47, %v8971_v52  ;;  %v7905_v20 = vrot.slane %v3086_v37, 9  ;;  %v7906_v25 = vrot.slane %v3087_v47, 9 }
 0x232   : > { %v3760_v33 = vsel %vm3703_vm6, %v3520_v48, %v3759_v19  ;;  %v1450_v44 = vmax.f32 %v10290_v41, 0.0  ;;  %v4493_v56 = vcombine.high %v9967_v3, %v9967_v3  ;;  %v4672_v23 = vrot.slane %v10309_v21, 1 }
 0x233   : > { %v3761_v53 = vsel %vm3705_vm7, %v3524_v9, %v3760_v33  ;;  %v4307_v39 = vmax.f32 %v3085_v27, %v7904_v10  ;;  %v10395_v17 = vmax.f32 %v3086_v37, %v7905_v20  ;;  %v4510_v27 = vcombine.high %v10075_v31, %v10075_v31 }
 0x234   : > { %v3762_v43 = vsel %vm3707_vm8, %v3528_v26, %v3761_v53  ;;  %v2234_v37 = vcombine.high %v1450_v44, %v1450_v44  ;;  %v10410_v19 = vrot.slane %v1450_v44, %v8957_v34  ;;  %v10412_v10 = vmax.f32 %v3087_v47, %v7906_v25 }
 0x235   : > { %v3824_v48 = vsel %vm971_vm1, 0.0, %v3762_v43  ;;  %v4673_v41 = vrot.slane %v9967_v3, 1  ;;  %v4674_v26 = vrot.slane %v4493_v56, 1  ;;  %v4676_v33 = vrot.slane %v10079_v28, 1 }
 0x236   : > { %v4528_v11 = vcombine.high %v3824_v48, %v3824_v48  ;;  %v10407_v9 = vrot.slane %v3824_v48, %v8957_v34  ;;  %v10421_v53 = vrot.slane %v2234_v37, %v8957_v34  ;;  %v4678_v43 = vrot.slane %v4510_v27, 1  ;;  %v10423_v48 = vpop.f32.mrb[112].mxu0 }
 0x237   : > { %v4887_v47 = vmax.f32 %v9908_v40, %v9957_v59  ;;  %v12680_v25 = vrot.slane %v9957_v59, 1  ;;  %v4889_v44 = vmax.f32 %v9924_v29, %v10309_v21  ;;  %v1238_v46 = vpop.f32.mrb[113].mxu0  ;;  %v2249_v37 = vcombine.high %v10410_v19, %v10410_v19 }
 0x238   : > { %v10417_v20 = vrot.slane %v4528_v11, %v8957_v34  ;;  %v4890_v11 = vmax.f32 %v9929_v0, %v4672_v23  ;;  %v4892_v45 = vmax.f32 %v9934_v22, %v4673_v41  ;;  %v4893_v35 = vmax.f32 %v9954_v57, %v4493_v56  ;;  %v10438_v40 = vpop.f32.mrb[114].mxu0 }
 0x239   : > { %v4888_v3 = vmax.f32 %v9922_v60, %v12680_v25  ;;  %v4894_v59 = vmax.f32 %v10297_v54, %v4674_v26  ;;  %v12681_v60 = vrot.slane %v10067_v61, 1  ;;  %v4897_v0 = vmax.f32 %v10031_v12, %v10079_v28  ;;  %v1241_v46 = vpop.f32.mrb[115].mxu0 }
 0x23a   : > { %v4915_v31 = vmax.f32 %v4307_v39, %v10417_v20  ;;  %v4898_v21 = vmax.f32 %v10038_v16, %v4676_v33  ;;  %v4901_v23 = vmax.f32 %v10048_v58, %v4510_v27  ;;  %v4902_v22 = vmax.f32 %v10050_v5, %v4678_v43 }
 0x23b   : > { %v4896_v29 = vmax.f32 %v10027_v55, %v12681_v60  ;;  %v5015_v57 = vpack.c.bf16 %v4887_v47, %v4887_v47  ;;  %v5016_v56 = vpack.c.bf16 %v4888_v3, %v4888_v3  ;;  %v5017_v41 = vpack.c.bf16 %v4889_v44, %v4889_v44 }
 0x23c   : > { %v5043_v39 = vpack.c.bf16 %v4915_v31, %v4915_v31  ;;  %v5018_v25 = vpack.c.bf16 %v4890_v11, %v4890_v11  ;;  %v5020_v54 = vpack.c.bf16 %v4892_v45, %v4892_v45  ;;  %v2250_v61 = vcombine.high %v10421_v53, %v10421_v53 }
 0x23d   : > { %v5021_v55 = vpack.c.bf16 %v4893_v35, %v4893_v35  ;;  %v5022_v26 = vpack.c.bf16 %v4894_v59, %v4894_v59  ;;  %v5023_v12 = vpack.c.bf16 %v10082_v15, %v10082_v15  ;;  %v5024_v16 = vpack.c.bf16 %v4896_v29, %v4896_v29 }
 0x23e   : > { %v5025_v28 = vpack.c.bf16 %v4897_v0, %v4897_v0  ;;  %v5026_v33 = vpack.c.bf16 %v4898_v21, %v4898_v21  ;;  %v5029_v31 = vpack.c.bf16 %v4901_v23, %v4901_v23  ;;  %v10453_v58 = vunpack.c.l.b16 %v5043_v39 }
 0x23f   : > { %v5030_v5 = vpack.c.bf16 %v4902_v22, %v4902_v22  ;;  %v5279_v27 = vunpack.c.l.b16 %v5015_v57  ;;  %v5280_v43 = vunpack.c.l.b16 %v5016_v56  ;;  %v5281_v47 = vunpack.c.l.b16 %v5017_v41 }
 0x240   : > { %v5282_v3 = vunpack.c.l.b16 %v5018_v25  ;;  %v5284_v45 = vunpack.c.l.b16 %v5020_v54  ;;  %v5285_v44 = vunpack.c.l.b16 %v5021_v55  ;;  %v5286_v11 = vunpack.c.l.b16 %v5022_v26 }
 0x241   : > { %v5287_v60 = vunpack.c.l.b16 %v5023_v12  ;;  %v5288_v35 = vunpack.c.l.b16 %v5024_v16  ;;  %v5289_v59 = vunpack.c.l.b16 %v5025_v28  ;;  %v5290_v46 = vunpack.c.l.b16 %v5026_v33 }
 0x242   : > { %v12682_v15 = vpack.c.bf16 %v10105_v6, %v10105_v6  ;;  %v5293_v0 = vunpack.c.l.b16 %v5029_v31  ;;  %v5294_v21 = vunpack.c.l.b16 %v5030_v5  ;;  %v5444_v39 = vrot.slane %v5280_v43, 7 }
 0x243   : > { %v5446_v23 = vrot.slane %v5281_v47, 6  ;;  %v5448_v22 = vrot.slane %v5282_v3, 5  ;;  %v5452_v57 = vrot.slane %v5284_v45, 3  ;;  %v5454_v56 = vrot.slane %v5285_v44, 2  ;;  %v12683_v3 = vld [vmem:[#allocation14_spill] sm:$0xff]  ;;  %v12684_v45 = vld [vmem:[#allocation12_spill] sm:$0xff] }
 0x244   : > { %v5292_v29 = vunpack.c.l.b16 %v12682_v15  ;;  %v5456_v41 = vrot.slane %v5286_v11, 1  ;;  %v5458_v25 = vrot.slane %v5288_v35, 7  ;;  %v5460_v54 = vrot.slane %v5289_v59, 6  ;;  %v12686_v59 = vld [vmem:[#allocation15_spill] sm:$0xff] }
 0x245   : > { %v5445_v55 = vsel %vm5360_vm9, %v5444_v39, %v5279_v27  ;;  %v5462_v26 = vrot.slane %v5290_v46, 5  ;;  %v5468_v16 = vrot.slane %v5293_v0, 2  ;;  %v5470_v33 = vrot.slane %v5294_v21, 1 }
 0x246   : > { %v5466_v12 = vrot.slane %v5292_v29, 3  ;;  %v5447_v28 = vsel %vm3697_vm3, %v5446_v23, %v5445_v55  ;;  %v5459_v6 = vsel %vm5360_vm9, %v5458_v25, %v5287_v60  ;;  %v1316_v31 = vmul.f32 %v10131_v38, %v9845_v32 }
 0x247   : > { %v5449_v5 = vsel %vm3699_vm4, %v5448_v22, %v5447_v28  ;;  %v5461_v43 = vsel %vm3697_vm3, %v5460_v54, %v5459_v6  ;;  %v1317_v47 = vmul.f32 %v10131_v38, %v9919_v30  ;;  %v1318_v27 = vmul.f32 %v10131_v38, %v12683_v3 }
 0x248   : > { %v12685_v44 = vrot.slane %v12684_v45, 4  ;;  %v5463_v60 = vsel %vm3699_vm4, %v5462_v26, %v5461_v43  ;;  %v1387_v35 = vadd.f32 %v10148_v50, %v1316_v31  ;;  %v1319_v32 = vmul.f32 %v10131_v38, %v12686_v59 }
 0x249   : > { %v12687_v15 = vrot.slane %v10123_v8, 4  ;;  %v1388_v29 = vadd.f32 %v10148_v50, %v1317_v47  ;;  %v1389_v0 = vadd.f32 %v10148_v50, %v1318_v27 }
 0x24a   : > { %v5451_v11 = vsel %vm3701_vm5, %v12685_v44, %v5449_v5  ;;  %v1451_v23 = vmax.f32 %v1387_v35, 0.0  ;;  %v1390_v22 = vadd.f32 %v10148_v50, %v1319_v32  ;;  %v12689_v35 = vcombine.high %v10333_v14, %v10333_v14 }
 0x24b   : > { %v5453_v46 = vsel %vm3703_vm6, %v5452_v57, %v5451_v11  ;;  %v5465_v30 = vsel %vm3701_vm5, %v12687_v15, %v5463_v60  ;;  %v1452_v57 = vmax.f32 %v1388_v29, 0.0  ;;  %v1453_v55 = vmax.f32 %v1389_v0, 0.0 }
 0x24c   : > { %v5455_v21 = vsel %vm3705_vm7, %v5454_v56, %v5453_v46  ;;  %v5467_v39 = vsel %vm3703_vm6, %v5466_v12, %v5465_v30  ;;  %v2251_v28 = vcombine.high %v1451_v23, %v1451_v23  ;;  %v10490_v6 = vrot.slane %v1451_v23, %v8957_v34  ;;  %v10492_v56 = vpop.f32.mrb[116].mxu0 }
 0x24d   : > { %v5457_v25 = vsel %vm3707_vm8, %v5456_v41, %v5455_v21  ;;  %v5469_v54 = vsel %vm3705_vm7, %v5468_v16, %v5467_v39  ;;  %12688 = vst [vmem:[#allocation13_spill] sm:$0xff] %v10492_v56  ;;  %v2268_v31 = vcombine.high %v1452_v57, %v1452_v57  ;;  %v10495_v5 = vrot.slane %v1452_v57, %v8957_v34  ;;  %v1246_v16 = vpop.f32.mrb[117].mxu0  ;;  %v12691_v39 = vld [vmem:[#allocation35_spill] sm:$0xff]  ;;  %v12693_v57 = vld [vmem:[#allocation25_spill] sm:$0xff] }
 0x24e   : > { %v5471_v26 = vsel %vm3707_vm8, %v5470_v33, %v5469_v54  ;;  %v10497_v41 = vmax.f32 %v1390_v22, 0.0  ;;  %v10500_v43 = vrot.slane %v2251_v28, %v8957_v34  ;;  %v10504_v33 = vcombine.high %v10490_v6, %v10490_v6 }
 0x24f   : > { %v5587_v12 = vpack.c.b16 %v5471_v26, %v5457_v25  ;;  %v2961_v47 = vmax.f32 %v10333_v14, %v10490_v6  ;;  %v2285_v3 = vcombine.high %v1453_v55, %v1453_v55  ;;  %v10510_v27 = vrot.slane %v2268_v31, %v8957_v34 }
 0x250   : > { %v10514_v45 = vcombine.high %v10495_v5, %v10495_v5  ;;  %v2965_v44 = vmax.f32 %v10410_v19, %v10495_v5  ;;  %v10519_v11 = vrot.slane %v1453_v55, %v8957_v34  ;;  %v10523_v60 = vcombine.high %v10500_v43, %v10500_v43 }
 0x251   : > { %7967 = vmatmul.mubr.msk.bf16.gmra.mrb[12].mxu1 %vm5632_vm10, %v5587_v12  ;;  %v2962_v59 = vmax.f32 %v12689_v35, %v10504_v33  ;;  %v2963_v32 = vmax.f32 %v10353_v13, %v10500_v43  ;;  %v3089_v46 = vmax.f32 %v2961_v47, %v10300_v24  ;;  %v10535_v15 = vcombine.high %v10510_v27, %v10510_v27 }
 0x252   : > { %5729 = vmatprep.mubr.bf16.mxu1 %v12571_v49  ;;  %v2966_v30 = vmax.f32 %v2249_v37, %v10514_v45  ;;  %v2967_v14 = vmax.f32 %v10421_v53, %v10510_v27  ;;  %v3093_v29 = vmax.f32 %v2965_v44, %v10303_v63  ;;  %v12690_v24 = vcombine.high %v10353_v13, %v10353_v13  ;;  %v12692_v37 = vld [vmem:[#allocation36_spill] sm:$0xff] }
 0x253   : > { %v3090_v21 = vmax.f32 %v2962_v59, %v10318_v42  ;;  %v3091_v23 = vmax.f32 %v2963_v32, %v12691_v39  ;;  %v3532_v22 = vrot.slane %v3089_v46, %v8971_v52  ;;  %v7908_v25 = vrot.slane %v3089_v46, 9 }
 0x254   : > { %v2964_v0 = vmax.f32 %v12690_v24, %v10523_v60  ;;  %v2968_v19 = vmax.f32 %v2250_v61, %v10535_v15  ;;  %v3094_v54 = vmax.f32 %v2966_v30, %v12692_v37  ;;  %v3095_v63 = vmax.f32 %v2967_v14, %v10323_v18  ;;  %v10568_v61 = vpop.f32.mrb[118].mxu0 }
 0x255   : > { %v3536_v13 = vrot.slane %v3090_v21, %v8971_v52  ;;  %v3540_v42 = vrot.slane %v3091_v23, %v8971_v52  ;;  %v7909_v26 = vrot.slane %v3090_v21, 9  ;;  %v7910_v28 = vrot.slane %v3091_v23, 9  ;;  %12694 = vst [vmem:[#allocation18_spill] sm:$0xff] %v10568_v61  ;;  %v1249_v35 = vpop.f32.mrb[119].mxu0 }
 0x256   : > { %v3092_v55 = vmax.f32 %v2964_v0, %v12693_v57  ;;  %v10560_v12 = vmax.f32 %v3089_v46, %v7908_v25  ;;  %v10563_v31 = vmax.f32 %v2968_v19, %v10347_v1  ;;  %v10566_v53 = vrot.slane %v2285_v3, %v8957_v34 }
 0x257   : > { %v3763_v16 = vsel %vm3697_vm3, %v3536_v13, %v3532_v22  ;;  %v3548_v44 = vrot.slane %v3093_v29, %v8971_v52  ;;  %v10574_v32 = vmax.f32 %v3090_v21, %v7909_v26  ;;  %v10576_v46 = vmax.f32 %v3091_v23, %v7910_v28  ;;  %v12698_v28 = vld [vmem:[#allocation16_spill] sm:$0xff] }
 0x258   : > { %v3544_v18 = vrot.slane %v3092_v55, %v8971_v52  ;;  %v7911_v47 = vrot.slane %v3092_v55, 9  ;;  %v3764_v59 = vsel %vm3699_vm4, %v3540_v42, %v3763_v16  ;;  %v3552_v1 = vrot.slane %v3094_v54, %v8971_v52  ;;  %v12700_v16 = vld [vmem:[#allocation21_spill] sm:$0xff] }
 0x259   : > { %12695 = vst [vmem:[#allocation31_spill] sm:$0xff] %v10576_v46  ;;  %v3556_v3 = vrot.slane %v3095_v63, %v8971_v52  ;;  %v7912_v14 = vrot.slane %v3093_v29, 9  ;;  %v7913_v24 = vrot.slane %v3094_v54, 9  ;;  %v7914_v22 = vrot.slane %v3095_v63, 9 }
 0x25a   : > { %v3765_v30 = vsel %vm3701_vm5, %v3544_v18, %v3764_v59  ;;  %v10581_v0 = vmax.f32 %v3092_v55, %v7911_v47  ;;  %v2300_v37 = vcombine.high %v10519_v11, %v10519_v11  ;;  %v2301_v13 = vcombine.high %v10566_v53, %v10566_v53 }
 0x25b   : > { %v3766_v39 = vsel %vm3703_vm6, %v3548_v44, %v3765_v30  ;;  %v4315_v19 = vmax.f32 %v3093_v29, %v7912_v14  ;;  %v10586_v23 = vmax.f32 %v3094_v54, %v7913_v24  ;;  %v2302_v55 = vcombine.high %v10497_v41, %v10497_v41  ;;  %v12699_v54 = vld [vmem:[#allocation20_spill] sm:$0xff]  ;;  %v12702_v14 = vld [vmem:[#allocation19_spill] sm:$0xff] }
 0x25c   : > { %12696 = vst [vmem:[#allocation34_spill] sm:$0xff] %v10581_v0  ;;  %v3767_v21 = vsel %vm3705_vm7, %v3552_v1, %v3766_v39  ;;  %v2309_v42 = vrot.slane %v10497_v41, %v8957_v34  ;;  %v1320_v29 = vmul.f32 %v10131_v38, %v12698_v28  ;;  %v1321_v18 = vmul.f32 %v10131_v38, %v12699_v54 }
 0x25d   : > { %12697 = vst [vmem:[#allocation10_spill] sm:$0xff] %v10586_v23  ;;  %v3768_v57 = vsel %vm3707_vm8, %v3556_v3, %v3767_v21  ;;  %v1322_v47 = vmul.f32 %v10131_v38, %v12700_v16  ;;  %v10604_v44 = vmax.f32 %v3095_v63, %v7914_v22  ;;  %v10610_v1 = vrot.slane %v2302_v55, %v8957_v34 }
 0x25e   : > { %v3825_v26 = vsel %vm971_vm1, 0.0, %v3768_v57  ;;  %v1391_v41 = vadd.f32 %v10148_v50, %v1320_v29  ;;  %v1392_v3 = vadd.f32 %v10148_v50, %v1321_v18  ;;  %v1323_v24 = vmul.f32 %v10131_v38, %v12702_v14  ;;  %v12704_v18 = vld [vmem:[#allocation24_spill] sm:$0xff] }
 0x25f   : > { %12701 = vst [vmem:[#allocation11_spill] sm:$0xff] %v10604_v44  ;;  %v4545_v35 = vcombine.high %v3825_v26, %v3825_v26  ;;  %v10607_v59 = vrot.slane %v3825_v26, %v8957_v34  ;;  %v1393_v30 = vadd.f32 %v10148_v50, %v1322_v47  ;;  %v2317_v22 = vcombine.high %v2309_v42, %v2309_v42  ;;  %v12705_v47 = vld [vmem:[#allocation28_spill] sm:$0xff] }
 0x260   : > { %v2318_v21 = vcombine.high %v10610_v1, %v10610_v1  ;;  %v1455_v57 = vmax.f32 %v1391_v41, 0.0  ;;  %v1456_v55 = vmax.f32 %v1392_v3, 0.0  ;;  %v12703_v28 = vrot.slane %v10372_v36, 9 }
 0x261   : > { %v10618_v39 = vrot.slane %v4545_v35, %v8957_v34  ;;  %v1457_v26 = vmax.f32 %v1393_v30, 0.0  ;;  %v1394_v38 = vadd.f32 %v10148_v50, %v1323_v24  ;;  %v10632_v16 = vcombine.high %v12704_v18, %v12704_v18 }
 0x262   : > { %v10626_v29 = vmax.f32 %v10372_v36, %v12703_v28  ;;  %v10636_v35 = vcombine.high %v12705_v47, %v12705_v47  ;;  %v2319_v41 = vcombine.high %v1455_v57, %v1455_v57  ;;  %v10639_v3 = vrot.slane %v1455_v57, %v8957_v34  ;;  %v10663_v47 = vpop.f32.mrb[120].mxu0 }
 0x263   : > { %v4923_v54 = vmax.f32 %v4315_v19, %v10618_v39  ;;  %v2336_v30 = vcombine.high %v1456_v55, %v1456_v55  ;;  %v10642_v36 = vrot.slane %v1456_v55, %v8957_v34  ;;  %v2353_v19 = vcombine.high %v1457_v26, %v1457_v26  ;;  %12706 = vst [vmem:[#allocation14_spill] sm:$0xff] %v10663_v47  ;;  %v1254_v8 = vpop.f32.mrb[121].mxu0 }
 0x264   : > { %v10645_v50 = vrot.slane %v1457_v26, %v8957_v34  ;;  %v10649_v24 = vcombine.high %v10407_v9, %v10407_v9  ;;  %v10652_v28 = vrot.slane %v2319_v41, %v8957_v34  ;;  %v10656_v57 = vcombine.high %v10639_v3, %v10639_v3  ;;  %v10682_v47 = vpop.f32.mrb[122].mxu0 }
 0x265   : > { %v5051_v14 = vpack.c.bf16 %v4923_v54, %v4923_v54  ;;  %v2969_v55 = vmax.f32 %v10519_v11, %v10639_v3  ;;  %v10661_v54 = vrot.slane %v2336_v30, %v8957_v34  ;;  %v10669_v63 = vcombine.high %v10642_v36, %v10642_v36  ;;  %12708 = vst [vmem:[#allocation15_spill] sm:$0xff] %v10682_v47 }
 0x266   : > { %v2973_v41 = vmax.f32 %v2309_v42, %v10642_v36  ;;  %v10672_v25 = vmax.f32 %v1394_v38, 0.0  ;;  %v10676_v61 = vcombine.high %v10652_v28, %v10652_v28  ;;  %v2970_v11 = vmax.f32 %v2300_v37, %v10656_v57  ;;  %v1257_v37 = vpop.f32.mrb[123].mxu0 }
 0x267   : > { %v10665_v26 = vunpack.c.l.b16 %v5051_v14  ;;  %v2971_v30 = vmax.f32 %v10566_v53, %v10652_v28  ;;  %v3097_v14 = vmax.f32 %v2969_v55, %v10490_v6  ;;  %v10686_v56 = vcombine.high %v10661_v54, %v10661_v54  ;;  %v10698_v47 = vpop.f32.mrb[124].mxu0 }
 0x268   : > { %v2974_v42 = vmax.f32 %v2317_v22, %v10669_v63  ;;  %v2975_v8 = vmax.f32 %v10610_v1, %v10661_v54  ;;  %v10692_v38 = vrot.slane %v2353_v19, %v8957_v34  ;;  %v2972_v44 = vmax.f32 %v2301_v13, %v10676_v61  ;;  %12709 = vst [vmem:[#allocation35_spill] sm:$0xff] %v10698_v47  ;;  %v1262_v19 = vpop.f32.mrb[125].mxu0 }
 0x269   : > { %12707 = vst [vmem:[#allocation12_spill] sm:$0xff] %v10665_v26  ;;  %v3098_v53 = vmax.f32 %v2970_v11, %v10504_v33  ;;  %v3099_v6 = vmax.f32 %v2971_v30, %v10500_v43  ;;  %v3560_v55 = vrot.slane %v3097_v14, %v8971_v52  ;;  %v7916_v23 = vrot.slane %v3097_v14, 9  ;;  %v10706_v43 = vpop.f32.mrb[126].mxu0 }
 0x26a   : > { %v2976_v22 = vmax.f32 %v2318_v21, %v10686_v56  ;;  %v3101_v0 = vmax.f32 %v2973_v41, %v10495_v5  ;;  %v3102_v1 = vmax.f32 %v2974_v42, %v10514_v45  ;;  %v3100_v37 = vmax.f32 %v2972_v44, %v10523_v60  ;;  %12710 = vst [vmem:[#allocation36_spill] sm:$0xff] %v10706_v43  ;;  %v1265_v5 = vpop.f32.mrb[127].mxu0 }
 0x26b   : > { %v3564_v13 = vrot.slane %v3098_v53, %v8971_v52  ;;  %v3568_v33 = vrot.slane %v3099_v6, %v8971_v52  ;;  %v7917_v11 = vrot.slane %v3098_v53, 9  ;;  %v7918_v47 = vrot.slane %v3099_v6, 9  ;;  %v12718_v5 = vld [vmem:[#allocation7_spill] sm:$0xff] }
 0x26c   : > { %v3103_v46 = vmax.f32 %v2975_v8, %v10510_v27  ;;  %v10711_v21 = vmax.f32 %v2976_v22, %v10535_v15  ;;  %v3572_v45 = vrot.slane %v3100_v37, %v8971_v52  ;;  %v7919_v44 = vrot.slane %v3100_v37, 9 }
 0x26d   : > { %v3769_v60 = vsel %vm3697_vm3, %v3564_v13, %v3560_v55  ;;  %v10715_v41 = vmax.f32 %v3097_v14, %v7916_v23  ;;  %v10718_v19 = vmax.f32 %v3098_v53, %v7917_v11  ;;  %v10720_v43 = vmax.f32 %v3099_v6, %v7918_v47 }
 0x26e   : > { %v3770_v42 = vsel %vm3699_vm4, %v3568_v33, %v3769_v60  ;;  %v3576_v30 = vrot.slane %v3101_v0, %v8971_v52  ;;  %v10723_v27 = vmax.f32 %v3100_v37, %v7919_v44  ;;  %v3580_v15 = vrot.slane %v3102_v1, %v8971_v52  ;;  %v12719_v37 = vld [vmem:[#allocation9_spill] sm:$0xff] }
 0x26f   : > { %12711 = vst [vmem:[#allocation25_spill] sm:$0xff] %v10720_v43  ;;  %v3771_v8 = vsel %vm3701_vm5, %v3572_v45, %v3770_v42  ;;  %v7920_v22 = vrot.slane %v3101_v0, 9  ;;  %v3584_v55 = vrot.slane %v3103_v46, %v8971_v52  ;;  %v7921_v14 = vrot.slane %v3102_v1, 9 }
 0x270   : > { %12712 = vst [vmem:[#allocation16_spill] sm:$0xff] %v10723_v27  ;;  %v3772_v23 = vsel %vm3703_vm6, %v3576_v30, %v3771_v8  ;;  %v7922_v13 = vrot.slane %v3103_v46, 9  ;;  %v2370_v30 = vcombine.high %v10672_v25, %v10672_v25  ;;  %v10743_v60 = vrot.slane %v10672_v25, %v8957_v34 }
 0x271   : > { %v3773_v53 = vsel %vm3705_vm7, %v3580_v15, %v3772_v23  ;;  %v4323_v6 = vmax.f32 %v3101_v0, %v7920_v22  ;;  %v10734_v11 = vmax.f32 %v3102_v1, %v7921_v14  ;;  %v4544_v0 = vcombine.high %v10417_v20, %v10417_v20 }
 0x272   : > { %v3774_v33 = vsel %vm3707_vm8, %v3584_v55, %v3773_v53  ;;  %v4680_v44 = vrot.slane %v10632_v16, 1  ;;  %v10748_v42 = vmax.f32 %v3103_v46, %v7922_v13  ;;  %v4682_v8 = vrot.slane %v10636_v35, 1  ;;  %v12715_v53 = vld [vmem:[#allocation29_spill] sm:$0xff] }
 0x273   : > { %12713 = vst [vmem:[#allocation20_spill] sm:$0xff] %v10734_v11  ;;  %v3826_v45 = vsel %vm971_vm1, 0.0, %v3774_v33  ;;  %v10755_v22 = vrot.slane %v2370_v30, %v8957_v34  ;;  %v4684_v55 = vrot.slane %v10649_v24, 1  ;;  %v4685_v23 = vrot.slane %v10417_v20, 1  ;;  %v12717_v30 = vld [vmem:[#allocation30_spill] sm:$0xff]  ;;  %v12720_v20 = vld [vmem:[#allocation23_spill] sm:$0xff] }
 0x274   : > { %12714 = vst [vmem:[#allocation21_spill] sm:$0xff] %v10748_v42  ;;  %v4562_v1 = vcombine.high %v3826_v45, %v3826_v45  ;;  %v10751_v15 = vrot.slane %v3826_v45, %v8957_v34  ;;  %v4686_v13 = vrot.slane %v4544_v0, 1  ;;  %v4903_v33 = vmax.f32 %v12715_v53, %v12704_v18  ;;  %v12721_v11 = vld [vmem:[#allocation26_spill] sm:$0xff] }
 0x275   : > { %v12716_v45 = vrot.slane %v12704_v18, 1  ;;  %v4905_v25 = vmax.f32 %v12718_v5, %v10632_v16  ;;  %v4906_v26 = vmax.f32 %v12719_v37, %v4680_v44  ;;  %v4909_v42 = vmax.f32 %v12720_v20, %v10636_v35 }
 0x276   : > { %v10762_v14 = vrot.slane %v4562_v1, %v8957_v34  ;;  %v4910_v46 = vmax.f32 %v12721_v11, %v4682_v8  ;;  %v4911_v27 = vmax.f32 %v10376_v7, %v10407_v9  ;;  %v12722_v53 = vrot.slane %v10407_v9, 1 }
 0x277   : > { %v4904_v47 = vmax.f32 %v12717_v30, %v12716_v45  ;;  %v4913_v45 = vmax.f32 %v10381_v2, %v10649_v24  ;;  %v4914_v16 = vmax.f32 %v10384_v62, %v4684_v55  ;;  %v4916_v37 = vmax.f32 %v10395_v17, %v4685_v23  ;;  %v12723_v30 = vld [vmem:[#allocation32_spill] sm:$0xff] }
 0x278   : > { %v4931_v1 = vmax.f32 %v4323_v6, %v10762_v14  ;;  %v4912_v18 = vmax.f32 %v10379_v51, %v12722_v53  ;;  %v4917_v35 = vmax.f32 %v10412_v10, %v4544_v0  ;;  %v4918_v6 = vmax.f32 %v10626_v29, %v4686_v13 }
 0x279   : > { %v5031_v11 = vpack.c.bf16 %v4903_v33, %v4903_v33  ;;  %v5032_v44 = vpack.c.bf16 %v4904_v47, %v4904_v47  ;;  %v5033_v8 = vpack.c.bf16 %v4905_v25, %v4905_v25  ;;  %v5034_v7 = vpack.c.bf16 %v4906_v26, %v4906_v26 }
 0x27a   : > { %v5059_v5 = vpack.c.bf16 %v4931_v1, %v4931_v1  ;;  %v5036_v9 = vpack.c.bf16 %v12723_v30, %v12723_v30  ;;  %v5037_v51 = vpack.c.bf16 %v4909_v42, %v4909_v42  ;;  %v5038_v24 = vpack.c.bf16 %v4910_v46, %v4910_v46 }
 0x27b   : > { %v5039_v62 = vpack.c.bf16 %v4911_v27, %v4911_v27  ;;  %v5040_v55 = vpack.c.bf16 %v4912_v18, %v4912_v18  ;;  %v5041_v17 = vpack.c.bf16 %v4913_v45, %v4913_v45  ;;  %v5042_v23 = vpack.c.bf16 %v4914_v16, %v4914_v16 }
 0x27c   : > { %v5044_v10 = vpack.c.bf16 %v4916_v37, %v4916_v37  ;;  %v5045_v0 = vpack.c.bf16 %v4917_v35, %v4917_v35  ;;  %v10792_v20 = vunpack.c.l.b16 %v5059_v5  ;;  %v5046_v29 = vpack.c.bf16 %v4918_v6, %v4918_v6 }
 0x27d   : > { %v5295_v47 = vunpack.c.l.b16 %v5031_v11  ;;  %v5296_v25 = vunpack.c.l.b16 %v5032_v44  ;;  %v5297_v26 = vunpack.c.l.b16 %v5033_v8  ;;  %v5298_v13 = vunpack.c.l.b16 %v5034_v7 }
 0x27e   : > { %v5300_v33 = vunpack.c.l.b16 %v5036_v9  ;;  %v5301_v1 = vunpack.c.l.b16 %v5037_v51  ;;  %v5302_v42 = vunpack.c.l.b16 %v5038_v24  ;;  %v5303_v53 = vunpack.c.l.b16 %v5039_v62 }
 0x27f   : > { %v5304_v30 = vunpack.c.l.b16 %v5040_v55  ;;  %v5305_v2 = vunpack.c.l.b16 %v5041_v17  ;;  %v5306_v46 = vunpack.c.l.b16 %v5042_v23  ;;  %v5308_v27 = vunpack.c.l.b16 %v5044_v10  ;;  %v10800_v17 = vld [vmem:[%s12495_s2] ss:$0 sm:$0xff] }
 0x280   : > { %v5309_v18 = vunpack.c.l.b16 %v5045_v0  ;;  %v5310_v45 = vunpack.c.l.b16 %v5046_v29  ;;  %v5472_v16 = vrot.slane %v5296_v25, 7  ;;  %v5474_v37 = vrot.slane %v5297_v26, 6  ;;  %v12724_v23 = vld [vmem:[#allocation22_spill] sm:$0xff]  ;;  %v12725_v29 = vld [vmem:[#allocation8_spill] sm:$0xff]  ;;  %v12726_v25 = vld [vmem:[#allocation33_spill] sm:$0xff] }
 0x281   : > { %v5476_v35 = vrot.slane %v5298_v13, 5  ;;  %v5480_v5 = vrot.slane %v5300_v33, 3  ;;  %v5482_v43 = vrot.slane %v5301_v1, 2  ;;  %v5484_v6 = vrot.slane %v5302_v42, 1  ;;  %v10817_v42 = vld [vmem:[%s12496_s3] ss:$0 sm:$0xff] }
 0x282   : > { %v5486_v11 = vrot.slane %v5304_v30, 7  ;;  %v5488_v44 = vrot.slane %v5305_v2, 6  ;;  %v5473_v8 = vsel %vm5360_vm9, %v5472_v16, %v5295_v47  ;;  %v5490_v7 = vrot.slane %v5306_v46, 5  ;;  %v12728_v30 = vld [vmem:[#allocation37_spill] sm:$0xff] }
 0x283   : > { %v5494_v9 = vrot.slane %v5308_v27, 3  ;;  %v5496_v51 = vrot.slane %v5309_v18, 2  ;;  %v5475_v24 = vsel %vm3697_vm3, %v5474_v37, %v5473_v8  ;;  %v5498_v55 = vrot.slane %v5310_v45, 1  ;;  %v10831_v8 = vpop.f32.mrb[0].mxu1 }
 0x284   : > { %v5487_v62 = vsel %vm5360_vm9, %v5486_v11, %v5303_v53  ;;  %v1324_v10 = vmul.f32 %v10800_v17, %v12724_v23  ;;  %v5477_v2 = vsel %vm3699_vm4, %v5476_v35, %v5475_v24  ;;  %v1325_v47 = vmul.f32 %v10800_v17, %v12725_v29  ;;  %12730 = vst [vmem:[#allocation19_spill] sm:$0xff] %v10831_v8 }
 0x285   : > { %v5489_v0 = vsel %vm3697_vm3, %v5488_v44, %v5487_v62  ;;  %v1326_v26 = vmul.f32 %v10800_v17, %v12726_v25  ;;  %v12727_v13 = vrot.slane %v10325_v4, 4  ;;  %v1327_v46 = vmul.f32 %v10800_v17, %v12728_v30  ;;  %v10835_v62 = vpop.f32.mrb[1].mxu1 }
 0x286   : > { %v5491_v1 = vsel %vm3699_vm4, %v5490_v7, %v5489_v0  ;;  %v1395_v53 = vadd.f32 %v10817_v42, %v1324_v10  ;;  %v12729_v18 = vrot.slane %v10453_v58, 4  ;;  %v1396_v45 = vadd.f32 %v10817_v42, %v1325_v47  ;;  %12731 = vst [vmem:[#allocation24_spill] sm:$0xff] %v10835_v62 }
 0x287   : > { %v5479_v33 = vsel %vm3701_vm5, %v12727_v13, %v5477_v2  ;;  %v1397_v16 = vadd.f32 %v10817_v42, %v1326_v26  ;;  %v1398_v44 = vadd.f32 %v10817_v42, %v1327_v46  ;;  %v12732_v30 = vcombine.high %v10645_v50, %v10645_v50 }
 0x288   : > { %v5481_v27 = vsel %vm3703_vm6, %v5480_v5, %v5479_v33  ;;  %v5493_v4 = vsel %vm3701_vm5, %v12729_v18, %v5491_v1  ;;  %v1459_v11 = vmax.f32 %v1395_v53, 0.0  ;;  %v1460_v58 = vmax.f32 %v1396_v45, 0.0 }
 0x289   : > { %v5483_v37 = vsel %vm3705_vm7, %v5482_v43, %v5481_v27  ;;  %v5495_v35 = vsel %vm3703_vm6, %v5494_v9, %v5493_v4  ;;  %v1461_v24 = vmax.f32 %v1397_v16, 0.0  ;;  %v10881_v4 = vpop.f32.mrb[2].mxu1  ;;  %v12734_v16 = vcombine.high %v10743_v60, %v10743_v60 }
 0x28a   : > { %v5485_v7 = vsel %vm3707_vm8, %v5484_v6, %v5483_v37  ;;  %v5497_v5 = vsel %vm3705_vm7, %v5496_v51, %v5495_v35  ;;  %v2387_v43 = vcombine.high %v1459_v11, %v1459_v11  ;;  %v10840_v9 = vrot.slane %v1459_v11, %v8957_v34  ;;  %12733 = vst [vmem:[#allocation28_spill] sm:$0xff] %v10881_v4  ;;  %v10894_v11 = vpop.f32.mrb[3].mxu1 }
 0x28b   : > { %v5499_v10 = vsel %vm3707_vm8, %v5498_v55, %v5497_v5  ;;  %v2404_v0 = vcombine.high %v1460_v58, %v1460_v58  ;;  %v10843_v29 = vrot.slane %v1460_v58, %v8957_v34  ;;  %v10845_v6 = vmax.f32 %v1398_v44, 0.0  ;;  %12735 = vst [vmem:[#allocation29_spill] sm:$0xff] %v10894_v11 }
 0x28c   : > { %v5588_v2 = vpack.c.b16 %v5499_v10, %v5485_v7  ;;  %v10848_v51 = vrot.slane %v2387_v43, %v8957_v34  ;;  %v10852_v47 = vcombine.high %v10840_v9, %v10840_v9  ;;  %v2977_v55 = vmax.f32 %v10645_v50, %v10840_v9 }
 0x28d   : > { %v2421_v25 = vcombine.high %v1461_v24, %v1461_v24  ;;  %v10858_v26 = vrot.slane %v2404_v0, %v8957_v34  ;;  %v10862_v13 = vcombine.high %v10843_v29, %v10843_v29  ;;  %v2981_v33 = vmax.f32 %v10743_v60, %v10843_v29 }
 0x28e   : > { %7968 = vmatmul.mubr.msk.bf16.gmra.mrb[16].mxu1 %vm5632_vm10, %v5588_v2  ;;  %v10867_v1 = vrot.slane %v1461_v24, %v8957_v34  ;;  %v10871_v53 = vcombine.high %v10848_v51, %v10848_v51  ;;  %v2978_v46 = vmax.f32 %v12732_v30, %v10852_v47  ;;  %v2979_v27 = vmax.f32 %v10692_v38, %v10848_v51 }
 0x28f   : > { %v3105_v18 = vmax.f32 %v2977_v55, %v10639_v3  ;;  %5739 = vmatprep.mubr.bf16.mxu1 %v12571_v49  ;;  %v10885_v45 = vcombine.high %v10858_v26, %v10858_v26  ;;  %v2982_v37 = vmax.f32 %v12734_v16, %v10862_v13  ;;  %v2983_v50 = vmax.f32 %v10755_v22, %v10858_v26 }
 0x290   : > { %v3109_v35 = vmax.f32 %v2981_v33, %v10642_v36  ;;  %v12736_v3 = vcombine.high %v10692_v38, %v10692_v38  ;;  %v3106_v7 = vmax.f32 %v2978_v46, %v10656_v57  ;;  %v3107_v5 = vmax.f32 %v2979_v27, %v10652_v28 }
 0x291   : > { %v3588_v58 = vrot.slane %v3105_v18, %v8971_v52  ;;  %v7924_v60 = vrot.slane %v3105_v18, 9  ;;  %v12737_v24 = vcombine.high %v10755_v22, %v10755_v22  ;;  %v3110_v36 = vmax.f32 %v2982_v37, %v10669_v63 }
 0x292   : > { %v2980_v44 = vmax.f32 %v12736_v3, %v10871_v53  ;;  %v3111_v43 = vmax.f32 %v2983_v50, %v10661_v54  ;;  %v3592_v38 = vrot.slane %v3106_v7, %v8971_v52  ;;  %v3596_v57 = vrot.slane %v3107_v5, %v8971_v52 }
 0x293   : > { %v2984_v10 = vmax.f32 %v12737_v24, %v10885_v45  ;;  %v7925_v0 = vrot.slane %v3106_v7, 9  ;;  %v7926_v28 = vrot.slane %v3107_v5, 9  ;;  %v10912_v55 = vmax.f32 %v3105_v18, %v7924_v60 }
 0x294   : > { %v3108_v2 = vmax.f32 %v2980_v44, %v10676_v61  ;;  %v10918_v22 = vrot.slane %v2421_v25, %v8957_v34  ;;  %v3775_v54 = vsel %vm3697_vm3, %v3592_v38, %v3588_v58  ;;  %v3604_v61 = vrot.slane %v3109_v35, %v8971_v52 }
 0x295   : > { %v10915_v33 = vmax.f32 %v2984_v10, %v10686_v56  ;;  %v3776_v46 = vsel %vm3699_vm4, %v3596_v57, %v3775_v54  ;;  %v10924_v27 = vmax.f32 %v3106_v7, %v7925_v0  ;;  %v10926_v16 = vmax.f32 %v3107_v5, %v7926_v28 }
 0x296   : > { %v3600_v63 = vrot.slane %v3108_v2, %v8971_v52  ;;  %v7927_v30 = vrot.slane %v3108_v2, 9  ;;  %v3608_v18 = vrot.slane %v3110_v36, %v8971_v52  ;;  %v3612_v56 = vrot.slane %v3111_v43, %v8971_v52 }
 0x297   : > { %v7928_v37 = vrot.slane %v3109_v35, 9  ;;  %v7929_v50 = vrot.slane %v3110_v36, 9  ;;  %v7930_v58 = vrot.slane %v3111_v43, 9  ;;  %v2436_v10 = vcombine.high %v10867_v1, %v10867_v1 }
 0x298   : > { %v3777_v25 = vsel %vm3701_vm5, %v3600_v63, %v3776_v46  ;;  %v10931_v3 = vmax.f32 %v3108_v2, %v7927_v30  ;;  %v2437_v57 = vcombine.high %v10918_v22, %v10918_v22  ;;  %v2438_v2 = vcombine.high %v10845_v6, %v10845_v6  ;;  %v12739_v63 = vld [vmem:[#allocation27_spill] sm:$0xff] }
 0x299   : > { %v3778_v44 = vsel %vm3703_vm6, %v3604_v61, %v3777_v25  ;;  %v4331_v24 = vmax.f32 %v3109_v35, %v7928_v37  ;;  %v10936_v5 = vmax.f32 %v3110_v36, %v7929_v50  ;;  %v2445_v0 = vrot.slane %v10845_v6, %v8957_v34  ;;  %v12740_v36 = vld [vmem:[#allocation17_spill] sm:$0xff] }
 0x29a   : > { %v3779_v7 = vsel %vm3705_vm7, %v3608_v18, %v3778_v44  ;;  %v1328_v35 = vmul.f32 %v10800_v17, %v12739_v63  ;;  %v1329_v54 = vmul.f32 %v10800_v17, %v12740_v36  ;;  %v1330_v30 = vmul.f32 %v10800_v17, %v10423_v48 }
 0x29b   : > { %12738 = vst [vmem:[#allocation30_spill] sm:$0xff] %v10936_v5  ;;  %v3780_v38 = vsel %vm3707_vm8, %v3612_v56, %v3779_v7  ;;  %v10954_v61 = vmax.f32 %v3111_v43, %v7930_v58  ;;  %v2452_v56 = vrot.slane %v2438_v2, %v8957_v34  ;;  %v1331_v50 = vmul.f32 %v10800_v17, %v10438_v40 }
 0x29c   : > { %v3827_v28 = vsel %vm971_vm1, 0.0, %v3780_v38  ;;  %v1399_v6 = vadd.f32 %v10817_v42, %v1328_v35  ;;  %v1400_v25 = vadd.f32 %v10817_v42, %v1329_v54  ;;  %v1401_v37 = vadd.f32 %v10817_v42, %v1330_v30 }
 0x29d   : > { %12741 = vst [vmem:[#allocation7_spill] sm:$0xff] %v10954_v61  ;;  %v4579_v46 = vcombine.high %v3827_v28, %v3827_v28  ;;  %v10957_v18 = vrot.slane %v3827_v28, %v8957_v34  ;;  %v2453_v43 = vcombine.high %v2445_v0, %v2445_v0  ;;  %v2454_v58 = vcombine.high %v2452_v56, %v2452_v56 }
 0x29e   : > { %v1463_v7 = vmax.f32 %v1399_v6, 0.0  ;;  %v1464_v38 = vmax.f32 %v1400_v25, 0.0  ;;  %v1465_v28 = vmax.f32 %v1401_v37, 0.0  ;;  %v12742_v2 = vrot.slane %v10563_v31, 9 }
 0x29f   : > { %v10966_v44 = vrot.slane %v4579_v46, %v8957_v34  ;;  %v1402_v36 = vadd.f32 %v10817_v42, %v1331_v50  ;;  %v12743_v40 = vrot.slane %v10711_v21, 9  ;;  %v10983_v30 = vcombine.high %v10607_v59, %v10607_v59 }
 0x2a0   : > { %v10972_v63 = vmax.f32 %v10563_v31, %v12742_v2  ;;  %v2455_v46 = vcombine.high %v1463_v7, %v1463_v7  ;;  %v10986_v6 = vrot.slane %v1463_v7, %v8957_v34  ;;  %v2472_v25 = vcombine.high %v1464_v38, %v1464_v38 }
 0x2a1   : > { %v4939_v35 = vmax.f32 %v4331_v24, %v10966_v44  ;;  %v10979_v54 = vmax.f32 %v10711_v21, %v12743_v40  ;;  %v10989_v31 = vrot.slane %v1464_v38, %v8957_v34  ;;  %v2489_v37 = vcombine.high %v1465_v28, %v1465_v28 }
 0x2a2   : > { %v10992_v50 = vrot.slane %v1465_v28, %v8957_v34  ;;  %v10996_v21 = vcombine.high %v10618_v39, %v10618_v39  ;;  %v10999_v2 = vrot.slane %v2455_v46, %v8957_v34  ;;  %v11003_v7 = vcombine.high %v10986_v6, %v10986_v6 }
 0x2a3   : > { %v5067_v24 = vpack.c.bf16 %v4939_v35, %v4939_v35  ;;  %v2985_v38 = vmax.f32 %v10867_v1, %v10986_v6  ;;  %v11008_v35 = vrot.slane %v2472_v25, %v8957_v34  ;;  %v11014_v28 = vcombine.high %v10989_v31, %v10989_v31 }
 0x2a4   : > { %v2989_v48 = vmax.f32 %v2445_v0, %v10989_v31  ;;  %v1466_v46 = vmax.f32 %v1402_v36, 0.0  ;;  %v11019_v60 = vcombine.high %v10999_v2, %v10999_v2  ;;  %v2986_v23 = vmax.f32 %v2436_v10, %v11003_v7  ;;  %v11044_v5 = vpop.f32.mrb[4].mxu1 }
 0x2a5   : > { %v11010_v40 = vunpack.c.l.b16 %v5067_v24  ;;  %v2987_v1 = vmax.f32 %v10918_v22, %v10999_v2  ;;  %v3113_v25 = vmax.f32 %v2985_v38, %v10840_v9  ;;  %v11027_v24 = vcombine.high %v11008_v35, %v11008_v35  ;;  %12745 = vst [vmem:[#allocation23_spill] sm:$0xff] %v11044_v5 }
 0x2a6   : > { %v2990_v4 = vmax.f32 %v2453_v43, %v11014_v28  ;;  %v2991_v0 = vmax.f32 %v2452_v56, %v11008_v35  ;;  %v11032_v36 = vrot.slane %v2489_v37, %v8957_v34  ;;  %v2988_v8 = vmax.f32 %v2437_v57, %v11019_v60 }
 0x2a7   : > { %12744 = vst [vmem:[#allocation9_spill] sm:$0xff] %v11010_v40  ;;  %v3114_v10 = vmax.f32 %v2986_v23, %v10852_v47  ;;  %v3115_v11 = vmax.f32 %v2987_v1, %v10848_v51  ;;  %v3616_v22 = vrot.slane %v3113_v25, %v8971_v52  ;;  %v7932_v9 = vrot.slane %v3113_v25, 9  ;;  %v12756_v40 = vld [vmem:[#allocation10_spill] sm:$0xff] }
 0x2a8   : > { %v2992_v38 = vmax.f32 %v2454_v58, %v11027_v24  ;;  %v3117_v62 = vmax.f32 %v2989_v48, %v10843_v29  ;;  %v3118_v43 = vmax.f32 %v2990_v4, %v10862_v13  ;;  %v3116_v56 = vmax.f32 %v2988_v8, %v10871_v53  ;;  %v11051_v29 = vpop.f32.mrb[5].mxu1 }
 0x2a9   : > { %v3620_v37 = vrot.slane %v3114_v10, %v8971_v52  ;;  %v3624_v61 = vrot.slane %v3115_v11, %v8971_v52  ;;  %v7933_v57 = vrot.slane %v3114_v10, 9  ;;  %v7934_v51 = vrot.slane %v3115_v11, 9  ;;  %12746 = vst [vmem:[#allocation26_spill] sm:$0xff] %v11051_v29 }
 0x2aa   : > { %v3119_v47 = vmax.f32 %v2991_v0, %v10858_v26  ;;  %v11049_v58 = vmax.f32 %v2992_v38, %v10885_v45  ;;  %v3628_v13 = vrot.slane %v3116_v56, %v8971_v52  ;;  %v7935_v53 = vrot.slane %v3116_v56, 9  ;;  %v11063_v0 = vpop.f32.mrb[6].mxu1 }
 0x2ab   : > { %v3781_v8 = vsel %vm3697_vm3, %v3620_v37, %v3616_v22  ;;  %v11055_v4 = vmax.f32 %v3113_v25, %v7932_v9  ;;  %v11058_v1 = vmax.f32 %v3114_v10, %v7933_v57  ;;  %v11060_v23 = vmax.f32 %v3115_v11, %v7934_v51  ;;  %12748 = vst [vmem:[#allocation22_spill] sm:$0xff] %v11063_v0  ;;  %v11069_v37 = vpop.f32.mrb[7].mxu1 }
 0x2ac   : > { %v3782_v48 = vsel %vm3699_vm4, %v3624_v61, %v3781_v8  ;;  %v3632_v26 = vrot.slane %v3117_v62, %v8971_v52  ;;  %v11065_v45 = vmax.f32 %v3116_v56, %v7935_v53  ;;  %v3636_v38 = vrot.slane %v3118_v43, %v8971_v52  ;;  %12750 = vst [vmem:[#allocation33_spill] sm:$0xff] %v11069_v37 }
 0x2ad   : > { %12747 = vst [vmem:[#allocation32_spill] sm:$0xff] %v11060_v23  ;;  %v3783_v29 = vsel %vm3701_vm5, %v3628_v13, %v3782_v48  ;;  %v7936_v22 = vrot.slane %v3117_v62, 9  ;;  %v3640_v25 = vrot.slane %v3119_v47, %v8971_v52  ;;  %v7937_v10 = vrot.slane %v3118_v43, 9 }
 0x2ae   : > { %12749 = vst [vmem:[#allocation8_spill] sm:$0xff] %v11065_v45  ;;  %v3784_v61 = vsel %vm3703_vm6, %v3632_v26, %v3783_v29  ;;  %v7938_v11 = vrot.slane %v3119_v47, 9  ;;  %v2506_v48 = vcombine.high %v1466_v46, %v1466_v46  ;;  %v11084_v26 = vrot.slane %v1466_v46, %v8957_v34 }
 0x2af   : > { %v3785_v9 = vsel %vm3705_vm7, %v3636_v38, %v3784_v61  ;;  %v4339_v51 = vmax.f32 %v3117_v62, %v7936_v22  ;;  %v11078_v13 = vmax.f32 %v3118_v43, %v7937_v10  ;;  %v4577_v38 = vcombine.high %v10751_v15, %v10751_v15 }
 0x2b0   : > { %v3786_v8 = vsel %vm3707_vm8, %v3640_v25, %v3785_v9  ;;  %v4578_v62 = vcombine.high %v10762_v14, %v10762_v14  ;;  %v11090_v22 = vmax.f32 %v3119_v47, %v7938_v11  ;;  %v4688_v61 = vrot.slane %v10983_v30, 1 }
 0x2b1   : > { %12751 = vst [vmem:[#allocation37_spill] sm:$0xff] %v11078_v13  ;;  %v3828_v29 = vsel %vm971_vm1, 0.0, %v3786_v8  ;;  %v11097_v10 = vrot.slane %v2506_v48, %v8957_v34  ;;  %v4689_v9 = vrot.slane %v10618_v39, 1  ;;  %v4690_v8 = vrot.slane %v10996_v21, 1  ;;  %v12754_v39 = vld [vmem:[#allocation31_spill] sm:$0xff] }
 0x2b2   : > { %12752 = vst [vmem:[#allocation27_spill] sm:$0xff] %v11090_v22  ;;  %v4596_v25 = vcombine.high %v3828_v29, %v3828_v29  ;;  %v11093_v43 = vrot.slane %v3828_v29, %v8957_v34  ;;  %v4692_v11 = vrot.slane %v4577_v38, 1  ;;  %v4693_v29 = vrot.slane %v10762_v14, 1  ;;  %v12757_v22 = vld [vmem:[#allocation11_spill] sm:$0xff] }
 0x2b3   : > { %v4694_v53 = vrot.slane %v4578_v62, 1  ;;  %v4919_v48 = vmax.f32 %v10560_v12, %v10607_v59  ;;  %v12753_v56 = vrot.slane %v10607_v59, 1  ;;  %v4921_v37 = vmax.f32 %v12754_v39, %v10983_v30 }
 0x2b4   : > { %v11104_v57 = vrot.slane %v4596_v25, %v8957_v34  ;;  %v12755_v25 = vld [vmem:[#allocation34_spill] sm:$0xff]  ;;  %v4924_v47 = vmax.f32 %v12756_v40, %v4689_v9  ;;  %v4925_v14 = vmax.f32 %v12757_v22, %v10996_v21  ;;  %v4926_v13 = vmax.f32 %v10972_v63, %v4690_v8  ;;  %v12762_v40 = vld [vmem:[#allocation21_spill] sm:$0xff] }
 0x2b5   : > { %v4920_v46 = vmax.f32 %v10574_v32, %v12753_v56  ;;  %v4922_v5 = vmax.f32 %v12755_v25, %v4688_v61  ;;  %v4927_v12 = vmax.f32 %v10715_v41, %v10751_v15  ;;  %v12758_v59 = vrot.slane %v10751_v15, 1  ;;  %v12759_v56 = vld [vmem:[#allocation25_spill] sm:$0xff]  ;;  %v12761_v61 = vld [vmem:[#allocation20_spill] sm:$0xff] }
 0x2b6   : > { %v4947_v0 = vmax.f32 %v4339_v51, %v11104_v57  ;;  %v4929_v30 = vmax.f32 %v12759_v56, %v4577_v38  ;;  %v12760_v51 = vld [vmem:[#allocation16_spill] sm:$0xff]  ;;  %v4932_v25 = vmax.f32 %v12761_v61, %v4693_v29  ;;  %v4933_v9 = vmax.f32 %v12762_v40, %v4578_v62 }
 0x2b7   : > { %v4928_v32 = vmax.f32 %v10718_v19, %v12758_v59  ;;  %v4930_v45 = vmax.f32 %v12760_v51, %v4692_v11  ;;  %v4934_v21 = vmax.f32 %v10979_v54, %v4694_v53  ;;  %v5047_v22 = vpack.c.bf16 %v4919_v48, %v4919_v48 }
 0x2b8   : > { %v5075_v39 = vpack.c.bf16 %v4947_v0, %v4947_v0  ;;  %v5048_v63 = vpack.c.bf16 %v4920_v46, %v4920_v46  ;;  %v5049_v8 = vpack.c.bf16 %v4921_v37, %v4921_v37  ;;  %v5050_v15 = vpack.c.bf16 %v4922_v5, %v4922_v5  ;;  %v8548_v5 = vld [vmem:[%s12500_s7 + $0x40] sm:$0xff]  }
 0x2b9   : > { %v5052_v23 = vpack.c.bf16 %v4924_v47, %v4924_v47  ;;  %v5053_v19 = vpack.c.bf16 %v4925_v14, %v4925_v14  ;;  %v5054_v59 = vpack.c.bf16 %v4926_v13, %v4926_v13  ;;  %v5055_v38 = vpack.c.bf16 %v4927_v12, %v4927_v12  ;;  %v8549_v13 = vld [vmem:[%s12500_s7] sm:$0xff]   ;;  %8186 = vmatprep.subr.bf16.mxu1 %v8548_v5 }
 0x2ba   : > { %v5056_v0 = vpack.c.bf16 %v4928_v32, %v4928_v32  ;;  %v5057_v56 = vpack.c.bf16 %v4929_v30, %v4929_v30  ;;  %v11133_v11 = vunpack.c.l.b16 %v5075_v39  ;;  %v5058_v29 = vpack.c.bf16 %v4930_v45, %v4930_v45  ;;  %v8550_v45 = vld [vmem:[%s12500_s7 + $0x48] sm:$0xff]   ;;  %8187 = vmatpush3.bf16.msra.mxu1 %v8549_v13  ;;  %v12766_v13 = vld [vmem:[#allocation18_spill] sm:$0xff] }
 0x2bb   : > { %v5060_v51 = vpack.c.bf16 %v4932_v25, %v4932_v25  ;;  %v5061_v62 = vpack.c.bf16 %v4933_v9, %v4933_v9  ;;  %v5062_v61 = vpack.c.bf16 %v4934_v21, %v4934_v21  ;;  %v5311_v54 = vunpack.c.l.b16 %v5047_v22  ;;  %8188 = vmatprep.subr.bf16.mxu1 %v8550_v45 }
 0x2bc   : > { %v5312_v53 = vunpack.c.l.b16 %v5048_v63  ;;  %v5313_v46 = vunpack.c.l.b16 %v5049_v8  ;;  %v5314_v37 = vunpack.c.l.b16 %v5050_v15  ;;  %v5316_v48 = vunpack.c.l.b16 %v5052_v23  ;;  %v8551_v8 = vld [vmem:[%s12500_s7 + $0x8] sm:$0xff]  }
 0x2bd   : > { %v5317_v40 = vunpack.c.l.b16 %v5053_v19  ;;  %v5318_v41 = vunpack.c.l.b16 %v5054_v59  ;;  %v5319_v47 = vunpack.c.l.b16 %v5055_v38  ;;  %v5320_v14 = vunpack.c.l.b16 %v5056_v0  ;;  %v8552_v0 = vld [vmem:[%s12500_s7 + $0x50] sm:$0xff]  }
 0x2be   : > { %v5321_v12 = vunpack.c.l.b16 %v5057_v56  ;;  %v5322_v32 = vunpack.c.l.b16 %v5058_v29  ;;  %v5324_v30 = vunpack.c.l.b16 %v5060_v51  ;;  %v5325_v23 = vunpack.c.l.b16 %v5061_v62  ;;  %8189 = vmatpush3.bf16.msra.mxu1 %v8551_v8 }
 0x2bf   : > { %v5326_v39 = vunpack.c.l.b16 %v5062_v61  ;;  %v5500_v25 = vrot.slane %v5312_v53, 7  ;;  %v5502_v9 = vrot.slane %v5313_v46, 6  ;;  %v5504_v21 = vrot.slane %v5314_v37, 5  ;;  %v12763_v37 = vld [vmem:[#allocation13_spill] sm:$0xff]  ;;  %8190 = vmatprep.subr.bf16.mxu1 %v8552_v0 }
 0x2c0   : > { %v5508_v22 = vrot.slane %v5316_v48, 3  ;;  %v5510_v63 = vrot.slane %v5317_v40, 2  ;;  %v5512_v19 = vrot.slane %v5318_v41, 1  ;;  %v5514_v59 = vrot.slane %v5320_v14, 7  ;;  %v12767_v14 = vld [vmem:[#allocation14_spill] sm:$0xff] }
 0x2c1   : > { %v5501_v15 = vsel %vm5360_vm9, %v5500_v25, %v5311_v54  ;;  %v5516_v38 = vrot.slane %v5321_v12, 6  ;;  %v5518_v29 = vrot.slane %v5322_v32, 5  ;;  %v5522_v51 = vrot.slane %v5324_v30, 3  ;;  %v12764_v54 = vld [vmem:[#allocation12_spill] sm:$0xff] }
 0x2c2   : > { %v5503_v56 = vsel %vm3697_vm3, %v5502_v9, %v5501_v15  ;;  %v5524_v62 = vrot.slane %v5325_v23, 2  ;;  %v5515_v53 = vsel %vm5360_vm9, %v5514_v59, %v5319_v47  ;;  %v5526_v46 = vrot.slane %v5326_v39, 1  ;;  %v8553_v47 = vld [vmem:[%s12500_s7 + $0x10] sm:$0xff]   ;;  %v12768_v39 = vld [vmem:[#allocation15_spill] sm:$0xff]  ;;  %v8554_v9 = vld [vmem:[%s12500_s7 + $0x58] sm:$0xff]  }
 0x2c3   : > { %v5505_v61 = vsel %vm3699_vm4, %v5504_v21, %v5503_v56  ;;  %v1332_v41 = vmul.f32 %v10800_v17, %v12763_v37  ;;  %v12765_v48 = vrot.slane %v12764_v54, 4  ;;  %v5517_v5 = vsel %vm3697_vm3, %v5516_v38, %v5515_v53  ;;  %8191 = vmatpush3.bf16.msra.mxu1 %v8553_v47  ;;  %v8556_v47 = vld [vmem:[%s12500_s7 + $0x60] sm:$0xff]  }
 0x2c4   : > { %v1333_v45 = vmul.f32 %v10800_v17, %v12766_v13  ;;  %v1334_v12 = vmul.f32 %v10800_v17, %v12767_v14  ;;  %v5519_v30 = vsel %vm3699_vm4, %v5518_v29, %v5517_v5  ;;  %v1335_v25 = vmul.f32 %v10800_v17, %v12768_v39  ;;  %8192 = vmatprep.subr.bf16.mxu1 %v8554_v9 }
 0x2c5   : > { %v5507_v40 = vsel %vm3701_vm5, %v12765_v48, %v5505_v61  ;;  %v1403_v23 = vadd.f32 %v10817_v42, %v1332_v41  ;;  %v12769_v8 = vrot.slane %v10792_v20, 4  ;;  %v12770_v48 = vld [vmem:[#allocation35_spill] sm:$0xff]  ;;  %v12771_v9 = vcombine.high %v10992_v50, %v10992_v50 }
 0x2c6   : > { %v5509_v32 = vsel %vm3703_vm6, %v5508_v22, %v5507_v40  ;;  %v1404_v22 = vadd.f32 %v10817_v42, %v1333_v45  ;;  %v1405_v59 = vadd.f32 %v10817_v42, %v1334_v12  ;;  %v1406_v0 = vadd.f32 %v10817_v42, %v1335_v25 }
 0x2c7   : > { %v5511_v21 = vsel %vm3705_vm7, %v5510_v63, %v5509_v32  ;;  %v5521_v15 = vsel %vm3701_vm5, %v12769_v8, %v5519_v30  ;;  %v1467_v29 = vmax.f32 %v1403_v23, 0.0 }
 0x2c8   : > { %v5513_v38 = vsel %vm3707_vm8, %v5512_v19, %v5511_v21  ;;  %v5523_v56 = vsel %vm3703_vm6, %v5522_v51, %v5521_v15  ;;  %v1468_v63 = vmax.f32 %v1404_v22, 0.0  ;;  %v1469_v37 = vmax.f32 %v1405_v59, 0.0 }
 0x2c9   : > { %v5525_v53 = vsel %vm3705_vm7, %v5524_v62, %v5523_v56  ;;  %v2523_v41 = vcombine.high %v1467_v29, %v1467_v29  ;;  %v11188_v54 = vrot.slane %v1467_v29, %v8957_v34  ;;  %v11192_v19 = vmul.f32 %v10800_v17, %v12770_v48 }
 0x2ca   : > { %v5527_v20 = vsel %vm3707_vm8, %v5526_v46, %v5525_v53  ;;  %v2540_v40 = vcombine.high %v1468_v63, %v1468_v63  ;;  %v11195_v5 = vrot.slane %v1468_v63, %v8957_v34  ;;  %v11197_v62 = vmax.f32 %v1406_v0, 0.0  ;;  %v8555_v46 = vld [vmem:[%s12500_s7 + $0x18] sm:$0xff]  }
 0x2cb   : > { %v5589_v51 = vpack.c.b16 %v5527_v20, %v5513_v38  ;;  %v11203_v13 = vrot.slane %v2523_v41, %v8957_v34  ;;  %v11207_v45 = vcombine.high %v11188_v54, %v11188_v54  ;;  %v2993_v14 = vmax.f32 %v10992_v50, %v11188_v54  ;;  %8193 = vmatpush3.bf16.msra.mxu1 %v8555_v46 }
 0x2cc   : > { %v2557_v12 = vcombine.high %v1469_v37, %v1469_v37  ;;  %v11216_v32 = vrot.slane %v2540_v40, %v8957_v34  ;;  %v11220_v30 = vcombine.high %v11195_v5, %v11195_v5  ;;  %v2997_v23 = vmax.f32 %v11084_v26, %v11195_v5  ;;  %8194 = vmatprep.subr.bf16.mxu1 %v8556_v47 }
 0x2cd   : > { %7969 = vmatmul.mubr.msk.bf16.gmra.mrb[20].mxu1 %vm5632_vm10, %v5589_v51  ;;  %v11225_v39 = vrot.slane %v1469_v37, %v8957_v34  ;;  %v11229_v25 = vcombine.high %v11203_v13, %v11203_v13  ;;  %v2994_v21 = vmax.f32 %v12771_v9, %v11207_v45  ;;  %v2995_v8 = vmax.f32 %v11032_v36, %v11203_v13 }
 0x2ce   : > { %v3121_v15 = vmax.f32 %v2993_v14, %v10986_v6  ;;  %5749 = vmatprep.mubr.bf16.mxu1 %v12571_v49  ;;  %v11241_v22 = vcombine.high %v11216_v32, %v11216_v32  ;;  %v12772_v59 = vcombine.high %v11084_v26, %v11084_v26  ;;  %v2999_v50 = vmax.f32 %v11097_v10, %v11216_v32  ;;  %v8557_v6 = vld [vmem:[%s12500_s7 + $0x20] sm:$0xff]  }
 0x2cf   : > { %v3125_v56 = vmax.f32 %v2997_v23, %v10989_v31  ;;  %v12773_v29 = vcombine.high %v11032_v36, %v11032_v36  ;;  %v3122_v53 = vmax.f32 %v2994_v21, %v11003_v7  ;;  %v3123_v26 = vmax.f32 %v2995_v8, %v10999_v2  ;;  %8195 = vmatpush3.bf16.msra.mxu1 %v8557_v6 }
 0x2d0   : > { %v2998_v38 = vmax.f32 %v12772_v59, %v11220_v30  ;;  %v3644_v63 = vrot.slane %v3121_v15, %v8971_v52  ;;  %v7940_v37 = vrot.slane %v3121_v15, 9  ;;  %v12774_v31 = vcombine.high %v11097_v10, %v11097_v10 }
 0x2d1   : > { %v2996_v0 = vmax.f32 %v12773_v29, %v11229_v25  ;;  %v3127_v48 = vmax.f32 %v2999_v50, %v11008_v35  ;;  %v3648_v51 = vrot.slane %v3122_v53, %v8971_v52  ;;  %v3652_v7 = vrot.slane %v3123_v26, %v8971_v52 }
 0x2d2   : > { %v3000_v20 = vmax.f32 %v12774_v31, %v11241_v22  ;;  %v3126_v41 = vmax.f32 %v2998_v38, %v11014_v28  ;;  %v7941_v2 = vrot.slane %v3122_v53, 9  ;;  %v7942_v40 = vrot.slane %v3123_v26, 9 }
 0x2d3   : > { %v3124_v36 = vmax.f32 %v2996_v0, %v11019_v60  ;;  %v11269_v46 = vmax.f32 %v3121_v15, %v7940_v37  ;;  %v11275_v10 = vrot.slane %v2557_v12, %v8957_v34  ;;  %v3787_v35 = vsel %vm3697_vm3, %v3648_v51, %v3644_v63 }
 0x2d4   : > { %v11272_v14 = vmax.f32 %v3000_v20, %v11027_v24  ;;  %v3660_v47 = vrot.slane %v3125_v56, %v8971_v52  ;;  %v3788_v23 = vsel %vm3699_vm4, %v3652_v7, %v3787_v35  ;;  %v11281_v9 = vmax.f32 %v3122_v53, %v7941_v2  ;;  %v12775_v7 = vld [vmem:[#allocation36_spill] sm:$0xff] }
 0x2d5   : > { %v3656_v28 = vrot.slane %v3124_v36, %v8971_v52  ;;  %v7943_v60 = vrot.slane %v3124_v36, 9  ;;  %v11283_v21 = vmax.f32 %v3123_v26, %v7942_v40  ;;  %v3664_v24 = vrot.slane %v3126_v41, %v8971_v52 }
 0x2d6   : > { %v3668_v8 = vrot.slane %v3127_v48, %v8971_v52  ;;  %v7944_v15 = vrot.slane %v3125_v56, 9  ;;  %v7945_v59 = vrot.slane %v3126_v41, 9  ;;  %v7946_v6 = vrot.slane %v3127_v48, 9 }
 0x2d7   : > { %v3789_v12 = vsel %vm3701_vm5, %v3656_v28, %v3788_v23  ;;  %v11288_v38 = vmax.f32 %v3124_v36, %v7943_v60  ;;  %v2572_v63 = vcombine.high %v11225_v39, %v11225_v39  ;;  %v2573_v31 = vcombine.high %v11275_v10, %v11275_v10 }
 0x2d8   : > { %v3790_v50 = vsel %vm3703_vm6, %v3660_v47, %v3789_v12  ;;  %v4347_v53 = vmax.f32 %v3125_v56, %v7944_v15  ;;  %v11293_v26 = vmax.f32 %v3126_v41, %v7945_v59  ;;  %v2574_v20 = vcombine.high %v11197_v62, %v11197_v62 }
 0x2d9   : > { %v3791_v0 = vsel %vm3705_vm7, %v3664_v24, %v3790_v50  ;;  %v11304_v36 = vrot.slane %v11197_v62, %v8957_v34  ;;  %v11307_v56 = vmax.f32 %v3127_v48, %v7946_v6  ;;  %v1407_v41 = vadd.f32 %v10817_v42, %v11192_v19 }
 0x2da   : > { %v3792_v37 = vsel %vm3707_vm8, %v3668_v8, %v3791_v0  ;;  %v1337_v2 = vmul.f32 %v10800_v17, %v12775_v7  ;;  %v11317_v35 = vrot.slane %v2574_v20, %v8957_v34  ;;  %v12776_v62 = vrot.slane %v10915_v33, 9 }
 0x2db   : > { %v3829_v51 = vsel %vm971_vm1, 0.0, %v3792_v37  ;;  %v2589_v48 = vcombine.high %v11304_v36, %v11304_v36  ;;  %v1471_v47 = vmax.f32 %v1407_v41, 0.0  ;;  %v11329_v17 = vcombine.high %v10957_v18, %v10957_v18 }
 0x2dc   : > { %v4613_v40 = vcombine.high %v3829_v51, %v3829_v51  ;;  %v11314_v28 = vrot.slane %v3829_v51, %v8957_v34  ;;  %v11322_v60 = vmax.f32 %v10915_v33, %v12776_v62  ;;  %v1408_v19 = vadd.f32 %v10817_v42, %v1337_v2 }
 0x2dd   : > { %v12777_v8 = vrot.slane %v11049_v58, 9  ;;  %v11342_v12 = vcombine.high %v10966_v44, %v10966_v44  ;;  %v2590_v42 = vcombine.high %v11317_v35, %v11317_v35  ;;  %v2591_v15 = vcombine.high %v1471_v47, %v1471_v47 }
 0x2de   : > { %v11332_v23 = vrot.slane %v4613_v40, %v8957_v34  ;;  %v2598_v59 = vrot.slane %v1471_v47, %v8957_v34  ;;  %v1472_v50 = vmax.f32 %v1408_v19, 0.0  ;;  %v11350_v0 = vcombine.high %v11093_v43, %v11093_v43 }
 0x2df   : > { %v11338_v33 = vmax.f32 %v11049_v58, %v12777_v8  ;;  %v11354_v58 = vcombine.high %v11104_v57, %v11104_v57  ;;  %v2605_v20 = vrot.slane %v2591_v15, %v8957_v34 }
 0x2e0   : > { %v4955_v6 = vmax.f32 %v4347_v53, %v11332_v23  ;;  %v2606_v51 = vcombine.high %v2598_v59, %v2598_v59  ;;  %v3001_v41 = vmax.f32 %v11225_v39, %v2598_v59  ;;  %v2608_v7 = vcombine.high %v1472_v50, %v1472_v50 }
 0x2e1   : > { %v2615_v40 = vrot.slane %v1472_v50, %v8957_v34  ;;  %v2607_v47 = vcombine.high %v2605_v20, %v2605_v20  ;;  %v3003_v8 = vmax.f32 %v11275_v10, %v2605_v20  ;;  %v4700_v62 = vrot.slane %v11350_v0, 1 }
 0x2e2   : > { %v5083_v2 = vpack.c.bf16 %v4955_v6, %v4955_v6  ;;  %v3002_v19 = vmax.f32 %v2572_v63, %v2606_v51  ;;  %v3129_v24 = vmax.f32 %v3001_v41, %v11188_v54  ;;  %v2622_v15 = vrot.slane %v2608_v7, %v8957_v34 }
 0x2e3   : > { %v2623_v61 = vcombine.high %v2615_v40, %v2615_v40  ;;  %v3005_v39 = vmax.f32 %v11304_v36, %v2615_v40  ;;  %v3004_v59 = vmax.f32 %v2573_v31, %v2607_v47  ;;  %v3131_v6 = vmax.f32 %v3003_v8, %v11203_v13 }
 0x2e4   : > { %v11364_v29 = vunpack.c.l.b16 %v5083_v2  ;;  %v3130_v50 = vmax.f32 %v3002_v19, %v11207_v45  ;;  %v3672_v63 = vrot.slane %v3129_v24, %v8971_v52  ;;  %v7948_v51 = vrot.slane %v3129_v24, 9  ;;  %v11372_v54 = vpop.f32.mrb[8].mxu1 }
 0x2e5   : > { %v2624_v10 = vcombine.high %v2622_v15, %v2622_v15  ;;  %v3006_v20 = vmax.f32 %v2589_v48, %v2623_v61  ;;  %v3132_v41 = vmax.f32 %v3004_v59, %v11229_v25  ;;  %v3680_v36 = vrot.slane %v3131_v6, %v8971_v52  ;;  %v11377_v2 = vpop.f32.mrb[9].mxu1 }
 0x2e6   : > { %v3676_v7 = vrot.slane %v3130_v50, %v8971_v52  ;;  %v7949_v31 = vrot.slane %v3130_v50, 9  ;;  %12778 = vst [vmem:[#allocation17_spill] sm:$0xff] %v11377_v2  ;;  %v7950_v45 = vrot.slane %v3131_v6, 9  ;;  %v3007_v40 = vmax.f32 %v11317_v35, %v2622_v15  ;;  %v11381_v19 = vpop.f32.mrb[10].mxu1 }
 0x2e7   : > { %v3008_v47 = vmax.f32 %v2590_v42, %v2624_v10  ;;  %v3684_v61 = vrot.slane %v3132_v41, %v8971_v52  ;;  %v7951_v25 = vrot.slane %v3132_v41, 9  ;;  %v4351_v8 = vmax.f32 %v3129_v24, %v7948_v51  ;;  %v11385_v59 = vpop.f32.mrb[11].mxu1 }
 0x2e8   : > { %v3793_v48 = vsel %vm3697_vm3, %v3676_v7, %v3672_v63  ;;  %v11388_v37 = vmax.f32 %v3130_v50, %v7949_v31  ;;  %v3133_v13 = vmax.f32 %v3005_v39, %v11195_v5  ;;  %v3134_v2 = vmax.f32 %v3006_v20, %v11220_v30 }
 0x2e9   : > { %v3794_v53 = vsel %vm3699_vm4, %v3680_v36, %v3793_v48  ;;  %v11392_v35 = vmax.f32 %v3131_v6, %v7950_v45  ;;  %v3135_v42 = vmax.f32 %v3007_v40, %v11216_v32  ;;  %v3136_v15 = vmax.f32 %v3008_v47, %v11241_v22 }
 0x2ea   : > { %v3795_v63 = vsel %vm3701_vm5, %v3684_v61, %v3794_v53  ;;  %v11397_v10 = vmax.f32 %v3132_v41, %v7951_v25  ;;  %v3688_v24 = vrot.slane %v3133_v13, %v8971_v52  ;;  %v7952_v51 = vrot.slane %v3133_v13, 9  ;;  %v8558_v61 = vld [vmem:[%s12500_s7 + $0x68] sm:$0xff]   ;;  %v12782_v25 = vld [vmem:[#allocation30_spill] sm:$0xff] }
 0x2eb   : > { %v7953_v7 = vrot.slane %v3134_v2, 9  ;;  %v3692_v50 = vrot.slane %v3134_v2, %v8971_v52  ;;  %v3696_v5 = vrot.slane %v3135_v42, %v8971_v52  ;;  %v7954_v39 = vrot.slane %v3135_v42, 9  ;;  %8196 = vmatprep.subr.bf16.mxu1 %v8558_v61 }
 0x2ec   : > { %v7955_v30 = vrot.slane %v3136_v15, 9  ;;  %v3796_v6 = vsel %vm3703_vm6, %v3688_v24, %v3795_v63  ;;  %v4355_v20 = vmax.f32 %v3133_v13, %v7952_v51  ;;  %v4701_v22 = vrot.slane %v11104_v57, 1 }
 0x2ed   : > { %v4356_v32 = vmax.f32 %v3134_v2, %v7953_v7  ;;  %v3797_v53 = vsel %vm3705_vm7, %v3692_v50, %v3796_v6  ;;  %v11405_v41 = vmax.f32 %v3135_v42, %v7954_v39  ;;  %v4702_v36 = vrot.slane %v11354_v58, 1  ;;  %v8559_v7 = vld [vmem:[%s12500_s7 + $0x28] sm:$0xff]   ;;  %v12788_v39 = vld [vmem:[#allocation37_spill] sm:$0xff] }
 0x2ee   : > { %v4935_v31 = vmax.f32 %v10912_v55, %v10957_v18  ;;  %v3798_v45 = vsel %vm3707_vm8, %v3696_v5, %v3797_v53  ;;  %v12779_v40 = vrot.slane %v10957_v18, 1  ;;  %v4937_v2 = vmax.f32 %v10926_v16, %v11329_v17  ;;  %v12783_v18 = vld [vmem:[#allocation7_spill] sm:$0xff]  ;;  %8197 = vmatpush3.bf16.msra.mxu1 %v8559_v7 }
 0x2ef   : > { %v12780_v57 = vrot.slane %v11329_v17, 1  ;;  %v3830_v48 = vsel %vm971_vm1, 0.0, %v3798_v45  ;;  %v12781_v55 = vrot.slane %v10966_v44, 1  ;;  %v12784_v63 = vrot.slane %v11342_v12, 1  ;;  %v12789_v53 = vld [vmem:[#allocation27_spill] sm:$0xff] }
 0x2f0   : > { %v4936_v47 = vmax.f32 %v10924_v27, %v12779_v40  ;;  %v4941_v27 = vmax.f32 %v12783_v18, %v11342_v12  ;;  %v4630_v17 = vcombine.high %v3830_v48, %v3830_v48  ;;  %v4943_v24 = vmax.f32 %v11055_v4, %v11093_v43  ;;  %v12786_v12 = vld [vmem:[#allocation32_spill] sm:$0xff] }
 0x2f1   : > { %v4938_v13 = vmax.f32 %v10931_v3, %v12780_v57  ;;  %v4940_v42 = vmax.f32 %v12782_v25, %v12781_v55  ;;  %v4942_v16 = vmax.f32 %v11322_v60, %v12784_v63  ;;  %v11432_v3 = vrot.slane %v3830_v48, %v8957_v34  ;;  %v12787_v60 = vld [vmem:[#allocation8_spill] sm:$0xff] }
 0x2f2   : > { %v12785_v51 = vrot.slane %v11093_v43, 1  ;;  %v4945_v50 = vmax.f32 %v12786_v12, %v11350_v0  ;;  %v4946_v5 = vmax.f32 %v12787_v60, %v4700_v62  ;;  %v4948_v6 = vmax.f32 %v12788_v39, %v4701_v22 }
 0x2f3   : > { %v4949_v45 = vmax.f32 %v12789_v53, %v11354_v58  ;;  %v11448_v4 = vmax.f32 %v3136_v15, %v7955_v30  ;;  %v11451_v43 = vrot.slane %v4630_v17, %v8957_v34  ;;  %v11458_v40 = vmax.f32 %v4351_v8, %v11432_v3 }
 0x2f4   : > { %v4944_v44 = vmax.f32 %v11058_v1, %v12785_v51  ;;  %v11455_v1 = vcombine.high %v11432_v3, %v11432_v3  ;;  %v4707_v0 = vrot.slane %v11432_v3, 1  ;;  %v4950_v62 = vmax.f32 %v11338_v33, %v4702_v36 }
 0x2f5   : > { %v5063_v22 = vpack.c.bf16 %v4935_v31, %v4935_v31  ;;  %v5064_v57 = vpack.c.bf16 %v4936_v47, %v4936_v47  ;;  %v4709_v58 = vrot.slane %v11451_v43, 1  ;;  %v4963_v15 = vmax.f32 %v4355_v20, %v11451_v43 }
 0x2f6   : > { %v5065_v34 = vpack.c.bf16 %v4937_v2, %v4937_v2  ;;  %v5066_v30 = vpack.c.bf16 %v4938_v13, %v4938_v13  ;;  %v5068_v61 = vpack.c.bf16 %v4940_v42, %v4940_v42  ;;  %v5069_v48 = vpack.c.bf16 %v4941_v27, %v4941_v27 }
 0x2f7   : > { %v5070_v55 = vpack.c.bf16 %v4942_v16, %v4942_v16  ;;  %v5071_v25 = vpack.c.bf16 %v4943_v24, %v4943_v24  ;;  %v11464_v18 = vmax.f32 %v4356_v32, %v4709_v58  ;;  %v5091_v8 = vpack.c.bf16 %v4963_v15, %v4963_v15 }
 0x2f8   : > { %v5072_v63 = vpack.c.bf16 %v4944_v44, %v4944_v44  ;;  %v5073_v17 = vpack.c.bf16 %v4945_v50, %v4945_v50  ;;  %v5074_v51 = vpack.c.bf16 %v4946_v5, %v4946_v5  ;;  %v5076_v7 = vpack.c.bf16 %v4948_v6, %v4948_v6 }
 0x2f9   : > { %v5077_v33 = vpack.c.bf16 %v4949_v45, %v4949_v45  ;;  %v5078_v36 = vpack.c.bf16 %v4950_v62, %v4950_v62  ;;  %v5092_v31 = vpack.c.bf16 %v11464_v18, %v11464_v18  ;;  %v5327_v47 = vunpack.c.l.b16 %v5063_v22  ;;  %v5770_v22 = vld [vmem:[%s12498_s5] sm:$0x3]  ;;  %v8561_v18 = vld [vmem:[%s12500_s7 + $0x30] sm:$0xff]  }
 0x2fa   : > { %v5328_v20 = vunpack.c.l.b16 %v5064_v57  ;;  %v5329_v2 = vunpack.c.l.b16 %v5065_v34  ;;  %v5330_v13 = vunpack.c.l.b16 %v5066_v30  ;;  %v5332_v42 = vunpack.c.l.b16 %v5068_v61  ;;  %v5814_v30 = vld [vmem:[%s12499_s6] sm:$0x3] }
 0x2fb   : > { %v5333_v27 = vunpack.c.l.b16 %v5069_v48  ;;  %v5334_v16 = vunpack.c.l.b16 %v5070_v55  ;;  %v11468_v24 = vunpack.c.l.b16 %v5091_v8  ;;  %v5335_v32 = vunpack.c.l.b16 %v5071_v25 }
 0x2fc   : > { %v5336_v12 = vunpack.c.l.b16 %v5072_v63  ;;  %v5337_v44 = vunpack.c.l.b16 %v5073_v17  ;;  %v5338_v50 = vunpack.c.l.b16 %v5074_v51  ;;  %v5340_v60 = vunpack.c.l.b16 %v5076_v7  ;;  %v12790_v51 = vld [vmem:[#allocation6_spill] sm:$0xff] }
 0x2fd   : > { %v5341_v5 = vunpack.c.l.b16 %v5077_v33  ;;  %v5342_v39 = vunpack.c.l.b16 %v5078_v36  ;;  %v5528_v6 = vrot.slane %v5328_v20, 7  ;;  %v5530_v53 = vrot.slane %v5329_v2, 6 }
 0x2fe   : > { %v5532_v45 = vrot.slane %v5330_v13, 5  ;;  %v5536_v62 = vrot.slane %v5332_v42, 3  ;;  %v5538_v57 = vrot.slane %v5333_v27, 2  ;;  %v5540_v58 = vrot.slane %v5334_v16, 1 }
 0x2ff   : > { %v5542_v15 = vrot.slane %v5336_v12, 7  ;;  %v5544_v34 = vrot.slane %v5337_v44, 6  ;;  %v5529_v61 = vsel %vm5360_vm9, %v5528_v6, %v5327_v47  ;;  %v5546_v48 = vrot.slane %v5338_v50, 5  ;;  %v12791_v47 = vld [vmem:[#allocation9_spill] sm:$0xff] }
 0x300   : > { %v5550_v55 = vrot.slane %v5340_v60, 3  ;;  %v5552_v25 = vrot.slane %v5341_v5, 2  ;;  %v5531_v8 = vsel %vm3697_vm3, %v5530_v53, %v5529_v61  ;;  %v5554_v17 = vrot.slane %v5342_v39, 1  ;;  %v12794_v60 = vld [vmem:[#allocation24_spill] sm:$0xff]  ;;  %v12795_v5 = vld [vmem:[#allocation29_spill] sm:$0xff] }
 0x301   : > { %v5543_v63 = vsel %vm5360_vm9, %v5542_v15, %v5335_v32  ;;  %v5774_v7 = vsub.s32 0, %v12790_v51  ;;  %v5533_v33 = vsel %vm3699_vm4, %v5532_v45, %v5531_v8  ;;  %v11483_v20 = vrot.slane %v5770_v22, %v8971_v52  ;;  %v12796_v45 = vld [vmem:[#allocation19_spill] sm:$0xff]  ;;  %v12797_v15 = vld [vmem:[#allocation28_spill] sm:$0xff] }
 0x302   : > { %v5545_v36 = vsel %vm3697_vm3, %v5544_v34, %v5543_v63  ;;  %v11486_v2 = vrot.slane %v5814_v30, %v8971_v52  ;;  %v12792_v13 = vrot.slane %v12791_v47, 4  ;;  %v12793_v44 = vrot.slane %v11133_v11, 4 }
 0x303   : > { %v5547_v27 = vsel %vm3699_vm4, %v5546_v48, %v5545_v36  ;;  %v11492_v16 = vrot.slane %v5770_v22, %v5774_v7  ;;  %v11494_v32 = vrot.slane %v5814_v30, %v5774_v7  ;;  %v5783_v52 = vmul.f32 %v11483_v20, %v12794_v60 }
 0x304   : > { %v5535_v42 = vsel %vm3701_vm5, %v12792_v13, %v5533_v33  ;;  %v5549_v50 = vsel %vm3701_vm5, %v12793_v44, %v5547_v27  ;;  %v5785_v39 = vmul.f32 %v11483_v20, %v12795_v5  ;;  %v12798_v8 = vrot.slane %v11272_v14, 9 }
 0x305   : > { %v5537_v12 = vsel %vm3703_vm6, %v5536_v62, %v5535_v42  ;;  %v5551_v53 = vsel %vm3703_vm6, %v5550_v55, %v5549_v50  ;;  %v5782_v22 = vmul.f32 %v11492_v16, %v12796_v45  ;;  %v5784_v62 = vmul.f32 %v11492_v16, %v12797_v15 }
 0x306   : > { %v5539_v6 = vsel %vm3705_vm7, %v5538_v57, %v5537_v12  ;;  %v5553_v34 = vsel %vm3705_vm7, %v5552_v25, %v5551_v53  ;;  %v5827_v30 = vadd.f32 %v11486_v2, %v5783_v52  ;;  %v5829_v61 = vadd.f32 %v11486_v2, %v5785_v39 }
 0x307   : > { %v5541_v11 = vsel %vm3707_vm8, %v5540_v58, %v5539_v6  ;;  %v5555_v48 = vsel %vm3707_vm8, %v5554_v17, %v5553_v34  ;;  %v11516_v57 = vadd.f32 %v11494_v32, %v5782_v22  ;;  %v11519_v55 = vadd.f32 %v11494_v32, %v5784_v62 }
 0x308   : > { %v4350_v63 = vmax.f32 %v11272_v14, %v12798_v8  ;;  %v5590_v51 = vpack.c.b16 %v5555_v48, %v5541_v11  ;;  %v5858_v58 = vmax.f32 %v5827_v30, 0.0  ;;  %v5859_v7 = vmax.f32 %v5829_v61, 0.0 }
 0x309   : > { %v4628_v25 = vcombine.high %v11314_v28, %v11314_v28  ;;  %v4629_v33 = vcombine.high %v11332_v23, %v11332_v23  ;;  %v4646_v17 = vcombine.high %v11451_v43, %v11451_v43  ;;  %v4705_v36 = vrot.slane %v11332_v23, 1 }
 0x30a   : > { %v4708_v47 = vrot.slane %v11455_v1, 1  ;;  %7970 = vmatmul.mubr.msk.bf16.gmra.mrb[24].mxu1 %vm5632_vm10, %v5590_v51  ;;  %v8105_v13 = vpack.c.bf16 %v5858_v58, %v5858_v58  ;;  %v8106_v14 = vpack.c.bf16 %v5859_v7, %v5859_v7  ;;  %v4951_v27 = vmax.f32 %v11269_v46, %v11314_v28 }
 0x30b   : > { %v4704_v42 = vrot.slane %v4628_v25, 1  ;;  %5759 = vmatprep.mubr.bf16.mxu1 %v12571_v49  ;;  %v4706_v12 = vrot.slane %v4629_v33, 1  ;;  %v4710_v44 = vrot.slane %v4646_v17, 1  ;;  %v12799_v50 = vrot.slane %v11314_v28, 1 }
 0x30c   : > { %v4953_v23 = vmax.f32 %v11283_v21, %v4628_v25  ;;  %v5576_v60 = vrot.slane %v11468_v24, 4  ;;  %v5930_v52 = vshrl.u32 %v8105_v13, 16  ;;  %v5933_v5 = vshll.u32 %v8105_v13, 16 }
 0x30d   : > { %v4952_v43 = vmax.f32 %v11281_v9, %v12799_v50  ;;  %v5937_v39 = vshrl.u32 %v8106_v14, 16  ;;  %v4954_v6 = vmax.f32 %v11288_v38, %v4704_v42  ;;  %v4956_v53 = vmax.f32 %v11293_v26, %v4705_v36 }
 0x30e   : > { %v4957_v46 = vmax.f32 %v11307_v56, %v4629_v33  ;;  %v4958_v45 = vmax.f32 %v4350_v63, %v4706_v12  ;;  %v5932_v22 = vrot.slane %v5930_v52, 7  ;;  %v5940_v15 = vshll.u32 %v8106_v14, 16 }
 0x30f   : > { %v4960_v9 = vmax.f32 %v11388_v37, %v4707_v0  ;;  %v4961_v21 = vmax.f32 %v11392_v35, %v11455_v1  ;;  %v5939_v28 = vrot.slane %v5937_v39, 7  ;;  %v4962_v62 = vmax.f32 %v11397_v10, %v4708_v47 }
 0x310   : > { %v4965_v11 = vmax.f32 %v11405_v41, %v4646_v17  ;;  %v4966_v38 = vmax.f32 %v11448_v4, %v4710_v44  ;;  %v5935_v26 = vor.u32 %v5933_v5, %v5932_v22  ;;  %v5079_v34 = vpack.c.bf16 %v4951_v27, %v4951_v27 }
 0x311   : > { %v5080_v56 = vpack.c.bf16 %v4952_v43, %v4952_v43  ;;  %v5081_v30 = vpack.c.bf16 %v4953_v23, %v4953_v23  ;;  %v5082_v61 = vpack.c.bf16 %v4954_v6, %v4954_v6  ;;  %v5084_v48 = vpack.c.bf16 %v4956_v53, %v4956_v53 }
 0x312   : > { %v5085_v8 = vpack.c.bf16 %v4957_v46, %v4957_v46  ;;  %v5086_v3 = vpack.c.bf16 %v4958_v45, %v4958_v45  ;;  %v5087_v37 = vpack.c.bf16 %v11458_v40, %v11458_v40  ;;  %v5088_v0 = vpack.c.bf16 %v4960_v9, %v4960_v9  ;;  %v8560_v45 = vld [vmem:[%s12500_s7 + $0x70] sm:$0xff]  }
 0x313   : > { %v5089_v35 = vpack.c.bf16 %v4961_v21, %v4961_v21  ;;  %v5090_v1 = vpack.c.bf16 %v4962_v62, %v4962_v62  ;;  %v11554_v63 = vor.u32 %v5940_v15, %v5939_v28  ;;  %v5093_v10 = vpack.c.bf16 %v4965_v11, %v4965_v11  ;;  %8198 = vmatprep.subr.bf16.mxu1 %v8560_v45  ;;  %v12035_v62 = vld [vmem:[%s12500_s7 + $0x100] sm:$0xff]  }
 0x314   : > { %v5094_v41 = vpack.c.bf16 %v4966_v38, %v4966_v38  ;;  %v5344_v51 = vunpack.c.l.b16 %v5080_v56  ;;  %v5345_v4 = vunpack.c.l.b16 %v5081_v30  ;;  %v5346_v58 = vunpack.c.l.b16 %v5082_v61  ;;  %8199 = vmatpush3.bf16.msra.mxu1 %v8561_v18 }
 0x315   : > { %v5348_v7 = vunpack.c.l.b16 %v5084_v48  ;;  %v5349_v25 = vunpack.c.l.b16 %v5085_v8  ;;  %v5343_v33 = vunpack.c.l.b16 %v5079_v34  ;;  %v5350_v17 = vunpack.c.l.b16 %v5086_v3 }
 0x316   : > { %v5352_v36 = vunpack.c.l.b16 %v5088_v0  ;;  %v5353_v47 = vunpack.c.l.b16 %v5089_v35  ;;  %v5351_v13 = vunpack.c.l.b16 %v5087_v37  ;;  %v5354_v14 = vunpack.c.l.b16 %v5090_v1 }
 0x317   : > { %v5356_v40 = vunpack.c.l.b16 %v5092_v31  ;;  %v5357_v42 = vunpack.c.l.b16 %v5093_v10  ;;  %v5358_v27 = vunpack.c.l.b16 %v5094_v41  ;;  %v5556_v12 = vrot.slane %v5344_v51, 7  ;;  %v8562_v31 = vld [vmem:[%s12500_s7 + $0x78] sm:$0xff]  }
 0x318   : > { %v5558_v44 = vrot.slane %v5345_v4, 6  ;;  %v5560_v50 = vrot.slane %v5346_v58, 5  ;;  %v5564_v43 = vrot.slane %v5348_v7, 3  ;;  %v5566_v23 = vrot.slane %v5349_v25, 2  ;;  %8200 = vmatprep.subr.bf16.mxu1 %v8562_v31  ;;  %v12805_v7 = vld [vmem:[#allocation23_spill] sm:$0xff] }
 0x319   : > { %v5570_v52 = vrot.slane %v5352_v36, 7  ;;  %v5572_v5 = vrot.slane %v5353_v47, 6  ;;  %v5557_v39 = vsel %vm5360_vm9, %v5556_v12, %v5343_v33  ;;  %v5568_v6 = vrot.slane %v5350_v17, 1  ;;  %v12806_v33 = vld [vmem:[#allocation26_spill] sm:$0xff] }
 0x31a   : > { %v5574_v53 = vrot.slane %v5354_v14, 5  ;;  %v5578_v46 = vrot.slane %v5356_v40, 3  ;;  %v5559_v22 = vsel %vm3697_vm3, %v5558_v44, %v5557_v39  ;;  %v5580_v9 = vrot.slane %v5357_v42, 2  ;;  %v12807_v36 = vld [vmem:[#allocation22_spill] sm:$0xff]  ;;  %v12808_v40 = vld [vmem:[#allocation33_spill] sm:$0xff] }
 0x31b   : > { %v5571_v15 = vsel %vm5360_vm9, %v5570_v52, %v5351_v13  ;;  %v5561_v21 = vsel %vm3699_vm4, %v5560_v50, %v5559_v22  ;;  %v12802_v11 = vrot.slane %v11364_v29, 4  ;;  %v6062_v56 = vsel %vm11574_vm12, 0, %v5935_v26 }
 0x31c   : > { %v5573_v28 = vsel %vm3697_vm3, %v5572_v5, %v5571_v15  ;;  %v5925_v61 = vrot.slane %v12571_v49, 7  ;;  %v11595_v8 = vsel %vm11584_vm15, %v6062_v56, 0  ;;  %v6063_v26 = vsel %vm11574_vm12, 0, %v11554_v63 }
 0x31d   : > { %v5563_v38 = vsel %vm3701_vm5, %v12802_v11, %v5561_v21  ;;  %v5575_v34 = vsel %vm3699_vm4, %v5574_v53, %v5573_v28  ;;  %v5582_v37 = vrot.slane %v5358_v27, 1  ;;  %6265 = vrot.lane.b32.xlu0 %v11595_v8, %s12539_s24  ;;  %v11617_v63 = vsel %vm11584_vm15, %v6063_v26, 0  ;;  %v12809_v53 = vld [vmem:[#allocation17_spill] sm:$0xff] }
 0x31e   : > { %v5565_v48 = vsel %vm3703_vm6, %v5564_v43, %v5563_v38  ;;  %v5577_v29 = vsel %vm3701_vm5, %v5576_v60, %v5575_v34  ;;  %v6061_v24 = vsel %vm11574_vm12, 0, %v5925_v61  ;;  %v8563_v60 = vld [vmem:[%s12500_s7 + $0x38] sm:$0xff]   ;;  %v6108_v4 = vshll.u32 %v11595_v8, 16 }
 0x31f   : > { %v5567_v3 = vsel %vm3705_vm7, %v5566_v23, %v5565_v48  ;;  %v5579_v49 = vsel %vm3703_vm6, %v5578_v46, %v5577_v29  ;;  %v11613_v1 = vsel %vm11584_vm15, %v6061_v24, 0  ;;  %8201 = vmatpush3.bf16.msra.mxu1 %v8563_v60  ;;  %v5786_v25 = vmul.f32 %v11492_v16, %v12805_v7 }
 0x320   : > { %v5569_v0 = vsel %vm3707_vm8, %v5568_v6, %v5567_v3  ;;  %v5581_v35 = vsel %vm3705_vm7, %v5580_v9, %v5579_v49  ;;  %v6099_v41 = vshrl.u32 %v11613_v1, 16  ;;  %v6101_v51 = vshll.u32 %v11613_v1, 16 }
 0x321   : > { %v5583_v10 = vsel %vm3707_vm8, %v5582_v37, %v5581_v35  ;;  %v5787_v17 = vmul.f32 %v11483_v20, %v12806_v33  ;;  %v5788_v47 = vmul.f32 %v11492_v16, %v12807_v36  ;;  %6267 = vrot.lane.b32.xlu0 %v11617_v63, %s12539_s24  ;;  %v6110_v14 = vrot.slane %v6108_v4, 1 }
 0x322   : > { %v5591_v58 = vpack.c.b16 %v5583_v10, %v5569_v0  ;;  %v6103_v13 = vrot.slane %v6101_v51, 1  ;;  %v5789_v42 = vmul.f32 %v11483_v20, %v12808_v40  ;;  %v6106_v27 = vshrl.u32 %v11595_v8, 16 }
 0x323   : > { %v11636_v12 = vadd.f32 %v11494_v32, %v5786_v25  ;;  %v5831_v44 = vadd.f32 %v11486_v2, %v5787_v17  ;;  %v11640_v50 = vadd.f32 %v11494_v32, %v5788_v47  ;;  %v5790_v52 = vmul.f32 %v11492_v16, %v11372_v54 }
 0x324   : > { %7971 = vmatmul.mubr.msk.bf16.gmra.mrb[28].mxu1 %vm5632_vm10, %v5591_v58  ;;  %v6104_v43 = vor.u32 %v6103_v13, %v6099_v41  ;;  %v5833_v23 = vadd.f32 %v11486_v2, %v5789_v42  ;;  %v5721_v5 = vpop.f32.mrb[12].mxu1  ;;  %v11645_v39 = vor.u32 %v6110_v14, %v6106_v27  ;;  %v5791_v46 = vmul.f32 %v11483_v20, %v12809_v53 }
 0x325   : > { %v5860_v6 = vmax.f32 %v5831_v44, 0.0  ;;  %v5792_v45 = vmul.f32 %v11492_v16, %v11381_v19  ;;  %v5723_v18 = vpop.f32.mrb[13].mxu1  ;;  %v11653_v22 = vadd.f32 %v11494_v32, %v5790_v52  ;;  %v5793_v54 = vmul.f32 %v11483_v20, %v11385_v59 }
 0x326   : > { %6203 = vrot.lane.b32.xlu1 %v6104_v43, %s12539_s24  ;;  %v5861_v31 = vmax.f32 %v5833_v23, 0.0  ;;  %v5794_v15 = vmul.f32 %v11492_v16, %v5721_v5  ;;  %v5725_v9 = vpop.f32.mrb[14].mxu1  ;;  %v6113_v28 = vshrl.u32 %v11617_v63, 16  ;;  %v5835_v11 = vadd.f32 %v11486_v2, %v5791_v46 }
 0x327   : > { %v8107_v21 = vpack.c.bf16 %v5860_v6, %v5860_v6  ;;  %v11661_v19 = vadd.f32 %v11494_v32, %v5792_v45  ;;  %v5727_v38 = vpop.f32.mrb[15].mxu1  ;;  %v5837_v56 = vadd.f32 %v11486_v2, %v5793_v54  ;;  %v5795_v59 = vmul.f32 %v11483_v20, %v5723_v18 }
 0x328   : > { %v8108_v34 = vpack.c.bf16 %v5861_v31, %v5861_v31  ;;  %v11665_v61 = vadd.f32 %v11494_v32, %v5794_v15  ;;  %v6115_v29 = vshll.u32 %v11617_v63, 16  ;;  %v5862_v26 = vmax.f32 %v5835_v11, 0.0 }
 0x329   : > { %12810 = vst [vmem:[#allocation31_spill] sm:$0xff] %v11661_v19  ;;  %v5944_v48 = vshrl.u32 %v8107_v21, 16  ;;  %v5796_v3 = vmul.f32 %v11492_v16, %v5725_v9  ;;  %v5947_v49 = vshll.u32 %v8107_v21, 16  ;;  %v5863_v24 = vmax.f32 %v5837_v56, 0.0 }
 0x32a   : > { %6205 = vrot.lane.b32.xlu1 %v11645_v39, %s12539_s24  ;;  %v5951_v37 = vshrl.u32 %v8108_v34, 16  ;;  %v5839_v60 = vadd.f32 %v11486_v2, %v5795_v59  ;;  %v8109_v35 = vpack.c.bf16 %v5862_v26, %v5862_v26  ;;  %v5797_v41 = vmul.f32 %v11483_v20, %v5727_v38 }
 0x32b   : > { %v5946_v0 = vrot.slane %v5944_v48, 7  ;;  %v11674_v10 = vadd.f32 %v11494_v32, %v5796_v3  ;;  %v5954_v4 = vshll.u32 %v8108_v34, 16  ;;  %v8110_v58 = vpack.c.bf16 %v5863_v24, %v5863_v24 }
 0x32c   : > { %v5953_v51 = vrot.slane %v5951_v37, 7  ;;  %v5864_v7 = vmax.f32 %v5839_v60, 0.0  ;;  %v6117_v33 = vrot.slane %v6115_v29, 1  ;;  %v5958_v17 = vshrl.u32 %v8109_v35, 16 }
 0x32d   : > { %v5949_v25 = vor.u32 %v5947_v49, %v5946_v0  ;;  %v5841_v36 = vadd.f32 %v11486_v2, %v5797_v41  ;;  %v5961_v13 = vshll.u32 %v8109_v35, 16  ;;  %v5965_v14 = vshrl.u32 %v8110_v58, 16 }
 0x32e   : > { %v5956_v47 = vor.u32 %v5954_v4, %v5953_v51  ;;  %v8111_v40 = vpack.c.bf16 %v5864_v7, %v5864_v7  ;;  %v5960_v27 = vrot.slane %v5958_v17, 7  ;;  %v5968_v44 = vshll.u32 %v8110_v58, 16 }
 0x32f   : > { %v6064_v42 = vsel %vm11574_vm12, 0, %v5949_v25  ;;  %v5865_v43 = vmax.f32 %v5841_v36, 0.0  ;;  %v5967_v5 = vrot.slane %v5965_v14, 7  ;;  %v11695_v18 = vor.u32 %v6117_v33, %v6113_v28 }
 0x330   : > { %v11682_v23 = vsel %vm11584_vm15, %v6064_v42, 0  ;;  %v6065_v52 = vsel %vm11574_vm12, 0, %v5956_v47  ;;  %v5972_v6 = vshrl.u32 %v8111_v40, 16  ;;  %v5963_v45 = vor.u32 %v5961_v13, %v5960_v27 }
 0x331   : > { %6269 = vrot.lane.b32.xlu0 %v11682_v23, %s12539_s24  ;;  %v11690_v53 = vsel %vm11584_vm15, %v6065_v52, 0  ;;  %v6122_v46 = vshll.u32 %v11682_v23, 16  ;;  %v6120_v31 = vshrl.u32 %v11682_v23, 16  ;;  %v5970_v54 = vor.u32 %v5968_v44, %v5967_v5 }
 0x332   : > { %6271 = vrot.lane.b32.xlu1 %v11690_v53, %s12539_s24  ;;  %v5974_v15 = vrot.slane %v5972_v6, 7  ;;  %v6066_v21 = vsel %vm11574_vm12, 0, %v5963_v45  ;;  %v6129_v11 = vshll.u32 %v11690_v53, 16  ;;  %v8112_v38 = vpack.c.bf16 %v5865_v43, %v5865_v43 }
 0x333   : > { %v6124_v9 = vrot.slane %v6122_v46, 1  ;;  %v11703_v34 = vsel %vm11584_vm15, %v6066_v21, 0  ;;  %v5975_v56 = vshll.u32 %v8111_v40, 16  ;;  %v6067_v59 = vsel %vm11574_vm12, 0, %v5970_v54 }
 0x334   : > { %v6136_v48 = vshll.u32 %v11703_v34, 16  ;;  %v5979_v26 = vshrl.u32 %v8112_v38, 16  ;;  %v6131_v3 = vrot.slane %v6129_v11, 1  ;;  %v11716_v37 = vsel %vm11584_vm15, %v6067_v59, 0 }
 0x335   : > { %6207 = vrot.lane.b32.xlu0 %v11695_v18, %s12539_s24  ;;  %v11707_v28 = vor.u32 %v6124_v9, %v6120_v31  ;;  %v5977_v29 = vor.u32 %v5975_v56, %v5974_v15  ;;  %v5982_v60 = vshll.u32 %v8112_v38, 16  ;;  %v6127_v35 = vshrl.u32 %v11690_v53, 16 }
 0x336   : > { %v6138_v49 = vrot.slane %v6136_v48, 1  ;;  %v5981_v24 = vrot.slane %v5979_v26, 7  ;;  %v6134_v41 = vshrl.u32 %v11703_v34, 16  ;;  %v6143_v25 = vshll.u32 %v11716_v37, 16 }
 0x337   : > { %6209 = vrot.lane.b32.xlu1 %v11707_v28, %s12539_s24  ;;  %v6068_v0 = vsel %vm11574_vm12, 0, %v5977_v29  ;;  %v11730_v58 = vor.u32 %v6131_v3, %v6127_v35  ;;  %v6141_v14 = vshrl.u32 %v11716_v37, 16  ;;  %v12819_v30 = vrot.slane %v11595_v8, 1 }
 0x338   : > { %v11726_v51 = vsel %vm11584_vm15, %v6068_v0, 0  ;;  %v5984_v4 = vor.u32 %v5982_v60, %v5981_v24  ;;  %v11732_v7 = vor.u32 %v6138_v49, %v6134_v41  ;;  %v6145_v36 = vrot.slane %v6143_v25, 1 }
 0x339   : > { %6273 = vrot.lane.b32.xlu0 %v11703_v34, %s12539_s24  ;;  %v6150_v33 = vshll.u32 %v11726_v51, 16  ;;  %v6148_v40 = vshrl.u32 %v11726_v51, 16 }
 0x33a   : > { %v6069_v17 = vsel %vm11574_vm12, 0, %v5984_v4  ;;  %v11752_v42 = vor.u32 %v6145_v36, %v6141_v14 }
 0x33b   : > { %6275 = vrot.lane.b32.xlu1 %v11716_v37, %s12539_s24  ;;  %v6152_v47 = vrot.slane %v6150_v33, 1  ;;  %v11744_v13 = vsel %vm11584_vm15, %v6069_v17, 0 }
 0x33d   : > { %6211 = vrot.lane.b32.xlu0 %v11730_v58, %s12539_s24  ;;  %v11754_v27 = vor.u32 %v6152_v47, %v6148_v40  ;;  %v11795_v40 = vrot.slane %v11613_v1, 1 }
 0x33f   : > { %6213 = vrot.lane.b32.xlu1 %v11732_v7, %s12539_s24 }
 0x341   : > { %6277 = vrot.lane.b32.xlu0 %v11726_v51, %s12539_s24 }
 0x343   : > { %6279 = vrot.lane.b32.xlu1 %v11744_v13, %s12539_s24 }
 0x345   : > { %6215 = vrot.lane.b32.xlu0 %v11752_v42, %s12539_s24 }
 0x347   : > { %6217 = vrot.lane.b32.xlu1 %v11754_v27, %s12539_s24 }
 0x361   : > { %v5731_v44 = vpop.f32.mrb[16].mxu1 }
 0x362   : > { %v5798_v43 = vmul.f32 %v11492_v16, %v5731_v44  ;;  %v5733_v52 = vpop.f32.mrb[17].mxu1  ;;  %v12535_v44 = vrot.slane %v11595_v8, 1 }
 0x363   : > { %v5799_v5 = vmul.f32 %v11483_v20, %v5733_v52  ;;  %v5735_v6 = vpop.f32.mrb[18].mxu1 }
 0x364   : > { %v11763_v46 = vadd.f32 %v11494_v32, %v5798_v43  ;;  %v5800_v45 = vmul.f32 %v11492_v16, %v5735_v6  ;;  %v5737_v31 = vpop.f32.mrb[19].mxu1 }
 0x365   : > { %v5843_v54 = vadd.f32 %v11486_v2, %v5799_v5  ;;  %v5801_v15 = vmul.f32 %v11483_v20, %v5737_v31 }
 0x366   : > { %12811 = vst [vmem:[#allocation34_spill] sm:$0xff] %v11763_v46  ;;  %v11769_v9 = vadd.f32 %v11494_v32, %v5800_v45 }
 0x367   : > { %v5866_v21 = vmax.f32 %v5843_v54, 0.0  ;;  %v5845_v11 = vadd.f32 %v11486_v2, %v5801_v15 }
 0x368   : > { %12812 = vst [vmem:[#allocation10_spill] sm:$0xff] %v11769_v9 }
 0x369   : > { %v8113_v38 = vpack.c.bf16 %v5866_v21, %v5866_v21  ;;  %v5867_v56 = vmax.f32 %v5845_v11, 0.0 }
 0x36b   : > { %v5986_v59 = vshrl.u32 %v8113_v38, 16  ;;  %v8114_v48 = vpack.c.bf16 %v5867_v56, %v5867_v56  ;;  %v5989_v26 = vshll.u32 %v8113_v38, 16 }
 0x36d   : > { %v5988_v29 = vrot.slane %v5986_v59, 7  ;;  %v5993_v3 = vshrl.u32 %v8114_v48, 16  ;;  %v5996_v60 = vshll.u32 %v8114_v48, 16 }
 0x36f   : > { %v5991_v49 = vor.u32 %v5989_v26, %v5988_v29  ;;  %v5995_v24 = vrot.slane %v5993_v3, 7  ;;  %v11813_v29 = vrot.slane %v11617_v63, 1 }
 0x371   : > { %v5998_v0 = vor.u32 %v5996_v60, %v5995_v24  ;;  %v6070_v35 = vsel %vm11574_vm12, 0, %v5991_v49 }
 0x372   : > { %v11776_v41 = vsel %vm11584_vm15, %v6070_v35, 0 }
 0x373   : > { %6281 = vrot.lane.b32.xlu0 %v11776_v41, %s12539_s24  ;;  %v6071_v4 = vsel %vm11574_vm12, 0, %v5998_v0  ;;  %v6157_v25 = vshll.u32 %v11776_v41, 16  ;;  %v6155_v17 = vshrl.u32 %v11776_v41, 16 }
 0x374   : > { %v11785_v33 = vsel %vm11584_vm15, %v6071_v4, 0 }
 0x375   : > { %6283 = vrot.lane.b32.xlu1 %v11785_v33, %s12539_s24  ;;  %v6159_v36 = vrot.slane %v6157_v25, 1 }
 0x377   : > { %v11790_v47 = vor.u32 %v6159_v36, %v6155_v17 }
 0x379   : > { %6219 = vrot.lane.b32.xlu0 %v11790_v47, %s12539_s24 }
 0x38f   : > { %v6266_v14 = vpop.permute.xlu0 %6265 }
 0x390   : > { %v6381_v52 = vsel %vm5632_vm10, %v11795_v40, %v6266_v14 }
 0x393   : > { %v6268_v43 = vpop.permute.xlu0 %6267 }
 0x394   : > { %v6384_v5 = vsel %vm5632_vm10, %v12535_v44, %v6268_v43 }
 0x395   : > { %v7989_v6 = vcombine.low %v6381_v52, %v6384_v5 }
 0x397   : > { %6995 = vmatprep.mubr.bf16.mxu1 %v7989_v6 }
 0x398   : > { %v6204_v45 = vpop.permute.xlu1 %6203 }
 0x399   : > { %v11805_v31 = vsel %vm5632_vm10, %v11613_v1, %v6204_v45  ;;  %v11816_v1 = vrot.slane %v11682_v23, 1 }
 0x39c   : > { %v6206_v54 = vpop.permute.xlu1 %6205 }
 0x39d   : > { %v6352_v15 = vsel %vm5632_vm10, %v11595_v8, %v6206_v54 }
 0x39e   : > { %v7988_v21 = vcombine.low %v11805_v31, %v6352_v15 }
 0x3a0   : > { %6996 = vmatmul.mubr.bf16.vlgmr.msra.gmra.mrb[32].mxu1 %v7988_v21  ;;  %v5741_v11 = vpop.f32.mrb[20].mxu1 }
 0x3a1   : > { %v5802_v38 = vmul.f32 %v11492_v16, %v5741_v11  ;;  %v5743_v56 = vpop.f32.mrb[21].mxu1 }
 0x3a2   : > { %v5803_v59 = vmul.f32 %v11483_v20, %v5743_v56  ;;  %v5745_v48 = vpop.f32.mrb[22].mxu1 }
 0x3a3   : > { %v6270_v26 = vpop.permute.xlu0 %6269  ;;  %v11819_v3 = vadd.f32 %v11494_v32, %v5802_v38  ;;  %v5804_v49 = vmul.f32 %v11492_v16, %v5745_v48  ;;  %v5747_v24 = vpop.f32.mrb[23].mxu1  ;;  %v11842_v48 = vrot.slane %v11703_v34, 1 }
 0x3a4   : > { %v6272_v60 = vpop.permute.xlu1 %6271  ;;  %v5847_v0 = vadd.f32 %v11486_v2, %v5803_v59  ;;  %v5805_v35 = vmul.f32 %v11483_v20, %v5747_v24  ;;  %v6387_v4 = vsel %vm5632_vm10, %v11813_v29, %v6270_v26  ;;  %v11839_v59 = vrot.slane %v11690_v53, 1 }
 0x3a5   : > { %12813 = vst [vmem:[#allocation11_spill] sm:$0xff] %v11819_v3  ;;  %v6390_v25 = vsel %vm5632_vm10, %v11816_v1, %v6272_v60  ;;  %v11829_v17 = vadd.f32 %v11494_v32, %v5804_v49 }
 0x3a6   : > { %v7993_v36 = vcombine.low %v6387_v4, %v6390_v25  ;;  %v5868_v14 = vmax.f32 %v5847_v0, 0.0  ;;  %v5849_v43 = vadd.f32 %v11486_v2, %v5805_v35 }
 0x3a7   : > { %12814 = vst [vmem:[#allocation25_spill] sm:$0xff] %v11829_v17  ;;  %v6208_v52 = vpop.permute.xlu0 %6207 }
 0x3a8   : > { %7003 = vmatprep.mubr.bf16.mxu1 %v7993_v36  ;;  %v8115_v5 = vpack.c.bf16 %v5868_v14, %v5868_v14  ;;  %v5869_v6 = vmax.f32 %v5849_v43, 0.0  ;;  %v6354_v54 = vsel %vm5632_vm10, %v11617_v63, %v6208_v52  ;;  %v6164_v63 = vshll.u32 %v11785_v33, 16 }
 0x3a9   : > { %v6210_v45 = vpop.permute.xlu1 %6209 }
 0x3aa   : > { %v6356_v15 = vsel %vm5632_vm10, %v11682_v23, %v6210_v45  ;;  %v6000_v21 = vshrl.u32 %v8115_v5, 16  ;;  %v8116_v11 = vpack.c.bf16 %v5869_v6, %v5869_v6  ;;  %v6003_v49 = vshll.u32 %v8115_v5, 16 }
 0x3ab   : > { %v11836_v38 = vcombine.low %v6354_v54, %v6356_v15  ;;  %v6274_v56 = vpop.permute.xlu0 %6273  ;;  %v6166_v5 = vrot.slane %v6164_v63, 1 }
 0x3ac   : > { %v6002_v26 = vrot.slane %v6000_v21, 7  ;;  %v6007_v24 = vshrl.u32 %v8116_v11, 16  ;;  %v6393_v23 = vsel %vm5632_vm10, %v11839_v59, %v6274_v56  ;;  %v6010_v25 = vshll.u32 %v8116_v11, 16  ;;  %v8564_v21 = vld [vmem:[%s12500_s7 + $0xc0] sm:$0xff]  }
 0x3ad   : > { %7004 = vmatmul.mubr.bf16.gmra.mrb[36].mxu1 %v11836_v38  ;;  %v6276_v60 = vpop.permute.xlu1 %6275  ;;  %v8565_v11 = vld [vmem:[%s12500_s7 + $0x80] sm:$0xff]   ;;  %8250 = vmatprep.subr.bf16.mxu1 %v8564_v21 }
 0x3ae   : > { %v6396_v0 = vsel %vm5632_vm10, %v11842_v48, %v6276_v60  ;;  %v6005_v35 = vor.u32 %v6003_v49, %v6002_v26  ;;  %v6009_v4 = vrot.slane %v6007_v24, 7  ;;  %v6162_v26 = vshrl.u32 %v11785_v33, 16  ;;  %v8566_v24 = vld [vmem:[%s12500_s7 + $0xc8] sm:$0xff]   ;;  %8251 = vmatpush3.bf16.msra.mxu1 %v8565_v11 }
 0x3af   : > { %v7997_v36 = vcombine.low %v6393_v23, %v6396_v0  ;;  %v6212_v14 = vpop.permute.xlu0 %6211  ;;  %v11882_v60 = vrot.slane %v11716_v37, 1  ;;  %v11885_v23 = vrot.slane %v11726_v51, 1  ;;  %8252 = vmatprep.subr.bf16.mxu1 %v8566_v24 }
 0x3b0   : > { %v6012_v43 = vor.u32 %v6010_v25, %v6009_v4  ;;  %v6072_v52 = vsel %vm11574_vm12, 0, %v6005_v35  ;;  %v6358_v54 = vsel %vm5632_vm10, %v11690_v53, %v6212_v14  ;;  %v11889_v0 = vor.u32 %v6166_v5, %v6162_v26 }
 0x3b1   : > { %v6214_v6 = vpop.permute.xlu1 %6213  ;;  %7011 = vmatprep.mubr.bf16.mxu1 %v7997_v36  ;;  %v11854_v45 = vsel %vm11584_vm15, %v6072_v52, 0 }
 0x3b2   : > { %v6360_v15 = vsel %vm5632_vm10, %v11703_v34, %v6214_v6  ;;  %6285 = vrot.lane.b32.xlu1 %v11854_v45, %s12539_s24  ;;  %v6073_v56 = vsel %vm11574_vm12, 0, %v6012_v43  ;;  %v6171_v53 = vshll.u32 %v11854_v45, 16  ;;  %v6169_v35 = vshrl.u32 %v11854_v45, 16  ;;  %v8567_v43 = vld [vmem:[%s12500_s7 + $0x88] sm:$0xff]  }
 0x3b3   : > { %v11872_v49 = vcombine.low %v6358_v54, %v6360_v15  ;;  %v6278_v34 = vpop.permute.xlu0 %6277  ;;  %v11879_v63 = vsel %vm11584_vm15, %v6073_v56, 0  ;;  %8253 = vmatpush3.bf16.msra.mxu1 %v8567_v43 }
 0x3b4   : > { %6287 = vrot.lane.b32.xlu0 %v11879_v63, %s12539_s24  ;;  %v6173_v4 = vrot.slane %v6171_v53, 1  ;;  %v6399_v36 = vsel %vm5632_vm10, %v11882_v60, %v6278_v34 }
 0x3b5   : > { %7012 = vmatmul.mubr.bf16.gmra.mrb[40].mxu1 %v11872_v49  ;;  %v6280_v25 = vpop.permute.xlu1 %6279 }
 0x3b6   : > { %v6402_v14 = vsel %vm5632_vm10, %v11885_v23, %v6280_v25  ;;  %6221 = vrot.lane.b32.xlu1 %v11889_v0, %s12539_s24  ;;  %v11902_v52 = vor.u32 %v6173_v4, %v6169_v35 }
 0x3b7   : > { %v8001_v5 = vcombine.low %v6399_v36, %v6402_v14  ;;  %v6216_v6 = vpop.permute.xlu0 %6215  ;;  %v8568_v14 = vld [vmem:[%s12500_s7 + $0xd0] sm:$0xff]  }
 0x3b8   : > { %6223 = vrot.lane.b32.xlu0 %v11902_v52, %s12539_s24  ;;  %v6362_v15 = vsel %vm5632_vm10, %v11716_v37, %v6216_v6  ;;  %8254 = vmatprep.subr.bf16.mxu1 %v8568_v14 }
 0x3b9   : > { %v6218_v54 = vpop.permute.xlu1 %6217  ;;  %7019 = vmatprep.mubr.bf16.mxu1 %v8001_v5 }
 0x3ba   : > { %v6364_v21 = vsel %vm5632_vm10, %v11726_v51, %v6218_v54 }
 0x3bb   : > { %v11910_v11 = vcombine.low %v6362_v15, %v6364_v21  ;;  %v8569_v15 = vld [vmem:[%s12500_s7 + $0x90] sm:$0xff]  }
 0x3bc   : > { %8255 = vmatpush3.bf16.msra.mxu1 %v8569_v15 }
 0x3bd   : > { %7020 = vmatmul.mubr.bf16.gmra.mrb[44].mxu1 %v11910_v11 }
 0x3dd   : > { %v5751_v56 = vpop.f32.mrb[24].mxu1 }
 0x3de   : > { %v5806_v26 = vmul.f32 %v11492_v16, %v5751_v56  ;;  %v5753_v53 = vpop.f32.mrb[25].mxu1 }
 0x3df   : > { %v5807_v34 = vmul.f32 %v11483_v20, %v5753_v53  ;;  %v5755_v24 = vpop.f32.mrb[26].mxu1  ;;  %v12536_v53 = vrot.slane %v11776_v41, 1 }
 0x3e0   : > { %v11916_v35 = vadd.f32 %v11494_v32, %v5806_v26  ;;  %v5808_v37 = vmul.f32 %v11492_v16, %v5755_v24  ;;  %v5757_v4 = vpop.f32.mrb[27].mxu1  ;;  %v6178_v24 = vshll.u32 %v11879_v63, 16 }
 0x3e1   : > { %v5851_v51 = vadd.f32 %v11486_v2, %v5807_v34  ;;  %v5809_v25 = vmul.f32 %v11483_v20, %v5757_v4 }
 0x3e2   : > { %12815 = vst [vmem:[#allocation16_spill] sm:$0xff] %v11916_v35  ;;  %v11922_v36 = vadd.f32 %v11494_v32, %v5808_v37 }
 0x3e3   : > { %v5870_v43 = vmax.f32 %v5851_v51, 0.0  ;;  %v5853_v5 = vadd.f32 %v11486_v2, %v5809_v25 }
 0x3e4   : > { %12816 = vst [vmem:[#allocation20_spill] sm:$0xff] %v11922_v36  ;;  %v6180_v36 = vrot.slane %v6178_v24, 1  ;;  %v6176_v24 = vshrl.u32 %v11879_v63, 16 }
 0x3e5   : > { %v8117_v6 = vpack.c.bf16 %v5870_v43, %v5870_v43  ;;  %v5871_v54 = vmax.f32 %v5853_v5, 0.0  ;;  %v6282_v21 = vpop.permute.xlu0 %6281  ;;  %v8570_v43 = vld [vmem:[%s12500_s7 + $0xd8] sm:$0xff]  }
 0x3e6   : > { %v6404_v25 = vsel %vm5632_vm10, %v11795_v40, %v6282_v21  ;;  %8256 = vmatprep.subr.bf16.mxu1 %v8570_v43  ;;  %v8572_v21 = vld [vmem:[%s12500_s7 + $0xe0] sm:$0xff]   ;;  %v11974_v43 = vor.u32 %v6180_v36, %v6176_v24 }
 0x3e7   : > { %v6014_v56 = vshrl.u32 %v8117_v6, 16  ;;  %v8118_v26 = vpack.c.bf16 %v5871_v54, %v5871_v54  ;;  %v6017_v34 = vshll.u32 %v8117_v6, 16  ;;  %v6284_v37 = vpop.permute.xlu1 %6283 }
 0x3e8   : > { %v6407_v14 = vsel %vm5632_vm10, %v12536_v53, %v6284_v37 }
 0x3e9   : > { %v6016_v4 = vrot.slane %v6014_v56, 7  ;;  %v6021_v51 = vshrl.u32 %v8118_v26, 16  ;;  %v8006_v5 = vcombine.low %v6404_v25, %v6407_v14  ;;  %v6024_v6 = vshll.u32 %v8118_v26, 16  ;;  %v8571_v56 = vld [vmem:[%s12500_s7 + $0x98] sm:$0xff]   ;;  %v8573_v26 = vld [vmem:[%s12500_s7 + $0xa0] sm:$0xff]   ;;  %v8574_v25 = vld [vmem:[%s12500_s7 + $0xe8] sm:$0xff]  }
 0x3ea   : > { %8257 = vmatpush3.bf16.msra.mxu1 %v8571_v56 }
 0x3eb   : > { %v6019_v54 = vor.u32 %v6017_v34, %v6016_v4  ;;  %v6023_v15 = vrot.slane %v6021_v51, 7  ;;  %v6220_v44 = vpop.permute.xlu0 %6219  ;;  %7027 = vmatprep.mubr.bf16.mxu1 %v8006_v5  ;;  %8258 = vmatprep.subr.bf16.mxu1 %v8572_v21 }
 0x3ec   : > { %v6366_v34 = vsel %vm5632_vm10, %v11776_v41, %v6220_v44 }
 0x3ed   : > { %v6026_v37 = vor.u32 %v6024_v6, %v6023_v15  ;;  %v6074_v53 = vsel %vm11574_vm12, 0, %v6019_v54  ;;  %v8005_v51 = vcombine.low %v11805_v31, %v6366_v34  ;;  %v8575_v15 = vld [vmem:[%s12500_s7 + $0xa8] sm:$0xff]  }
 0x3ee   : > { %v11956_v4 = vsel %vm11584_vm15, %v6074_v53, 0  ;;  %8259 = vmatpush3.bf16.msra.mxu1 %v8573_v26 }
 0x3ef   : > { %6289 = vrot.lane.b32.xlu1 %v11956_v4, %s12539_s24  ;;  %v6075_v44 = vsel %vm11574_vm12, 0, %v6026_v37  ;;  %v6185_v14 = vshll.u32 %v11956_v4, 16  ;;  %7028 = vmatmul.mubr.bf16.gmra.mrb[48].mxu1 %v8005_v51  ;;  %v6183_v5 = vshrl.u32 %v11956_v4, 16 }
 0x3f0   : > { %v11970_v53 = vsel %vm11584_vm15, %v6075_v44, 0  ;;  %8260 = vmatprep.subr.bf16.mxu1 %v8574_v25 }
 0x3f1   : > { %6291 = vrot.lane.b32.xlu0 %v11970_v53, %s12539_s24  ;;  %v6187_v54 = vrot.slane %v6185_v14, 1 }
 0x3f2   : > { %8261 = vmatpush3.bf16.msra.mxu1 %v8575_v15 }
 0x3f3   : > { %6225 = vrot.lane.b32.xlu1 %v11974_v43, %s12539_s24  ;;  %v11982_v6 = vor.u32 %v6187_v54, %v6183_v5  ;;  %v8576_v5 = vld [vmem:[%s12500_s7 + $0xf0] sm:$0xff]  }
 0x3f4   : > { %v8577_v54 = vld [vmem:[%s12500_s7 + $0xb0] sm:$0xff]   ;;  %8262 = vmatprep.subr.bf16.mxu1 %v8576_v5 }
 0x3f5   : > { %6227 = vrot.lane.b32.xlu0 %v11982_v6, %s12539_s24 }
 0x3f6   : > { %8263 = vmatpush3.bf16.msra.mxu1 %v8577_v54 }
 0x3f7   : > { %v5761_v36 = vpop.f32.mrb[28].mxu1 }
 0x3f8   : > { %v5810_v56 = vmul.f32 %v11492_v16, %v5761_v36  ;;  %v5763_v21 = vpop.f32.mrb[29].mxu1 }
 0x3f9   : > { %v5811_v37 = vmul.f32 %v11483_v20, %v5763_v21  ;;  %v5765_v34 = vpop.f32.mrb[30].mxu1 }
 0x3fa   : > { %v11989_v26 = vadd.f32 %v11494_v32, %v5810_v56  ;;  %v5812_v51 = vmul.f32 %v11492_v16, %v5765_v34  ;;  %v5767_v25 = vpop.f32.mrb[31].mxu1 }
 0x3fb   : > { %v5855_v44 = vadd.f32 %v11486_v2, %v5811_v37  ;;  %v5813_v24 = vmul.f32 %v11483_v20, %v5767_v25  ;;  %v8578_v25 = vld [vmem:[%s12500_s7 + $0xf8] sm:$0xff]  }
 0x3fc   : > { %12817 = vst [vmem:[#allocation21_spill] sm:$0xff] %v11989_v26  ;;  %v11995_v14 = vadd.f32 %v11494_v32, %v5812_v51  ;;  %v6192_v51 = vshll.u32 %v11970_v53, 16  ;;  %8264 = vmatprep.subr.bf16.mxu1 %v8578_v25  ;;  %v12537_v25 = vrot.slane %v11744_v13, 1 }
 0x3fd   : > { %v5872_v15 = vmax.f32 %v5855_v44, 0.0  ;;  %v5857_v36 = vadd.f32 %v11486_v2, %v5813_v24  ;;  %v8579_v2 = vld [vmem:[%s12500_s7 + $0xb8] sm:$0xff]  }
 0x3fe   : > { %12818 = vst [vmem:[#allocation13_spill] sm:$0xff] %v11995_v14  ;;  %v6194_v54 = vrot.slane %v6192_v51, 1  ;;  %8265 = vmatpush3.bf16.msra.mxu1 %v8579_v2  ;;  %v6298_v51 = vshrl.u32 %v11744_v13, 16  ;;  %v12073_v2 = vrot.slane %v11785_v33, 1 }
 0x3ff   : > { %v8119_v16 = vpack.c.bf16 %v5872_v15, %v5872_v15  ;;  %v5873_v56 = vmax.f32 %v5857_v36, 0.0  ;;  %8338 = vmatprep.subr.bf16.mxu1 %v12035_v62 }
 0x401   : > { %v6028_v21 = vshrl.u32 %v8119_v16, 16  ;;  %v8120_v20 = vpack.c.bf16 %v5873_v56, %v5873_v56  ;;  %v6031_v32 = vshll.u32 %v8119_v16, 16  ;;  %v6190_v16 = vshrl.u32 %v11970_v53, 16 }
 0x403   : > { %v6030_v37 = vrot.slane %v6028_v21, 7  ;;  %v6035_v34 = vshrl.u32 %v8120_v20, 16  ;;  %v6038_v44 = vshll.u32 %v8120_v20, 16 }
 0x405   : > { %v6033_v14 = vor.u32 %v6031_v32, %v6030_v37  ;;  %v6037_v35 = vrot.slane %v6035_v34, 7  ;;  %v6300_v32 = vshll.u32 %v11744_v13, 16 }
 0x407   : > { %v6040_v24 = vor.u32 %v6038_v44, %v6037_v35  ;;  %v6076_v5 = vsel %vm11574_vm12, 0, %v6033_v14  ;;  %v12029_v14 = vor.u32 %v6194_v54, %v6190_v16  ;;  %v6302_v34 = vrot.slane %v6300_v32, 1 }
 0x408   : > { %v12015_v15 = vsel %vm11584_vm15, %v6076_v5, 0  ;;  %v12820_v44 = vrot.slane %v11776_v41, 1  ;;  %v12089_v16 = vrot.slane %v11956_v4, 1 }
 0x409   : > { %6293 = vrot.lane.b32.xlu1 %v12015_v15, %s12539_s24  ;;  %v6077_v36 = vsel %vm11574_vm12, 0, %v6040_v24  ;;  %v6199_v56 = vshll.u32 %v12015_v15, 16  ;;  %v6197_v21 = vshrl.u32 %v12015_v15, 16  ;;  %v12059_v8 = vor.u32 %v6302_v34, %v6298_v51 }
 0x40a   : > { %v12025_v35 = vsel %vm11584_vm15, %v6077_v36, 0  ;;  %v12078_v24 = vrot.slane %v11854_v45, 1  ;;  %v12084_v36 = vrot.slane %v11879_v63, 1  ;;  %v12098_v34 = vrot.slane %v11970_v53, 1 }
 0x40b   : > { %6295 = vrot.lane.b32.xlu0 %v12025_v35, %s12539_s24  ;;  %v6201_v20 = vrot.slane %v6199_v56, 1  ;;  %v6307_v5 = vshll.u32 %v12025_v35, 16  ;;  %v6305_v51 = vshrl.u32 %v12025_v35, 16 }
 0x40d   : > { %6229 = vrot.lane.b32.xlu1 %v12029_v14, %s12539_s24  ;;  %v12039_v37 = vor.u32 %v6201_v20, %v6197_v21  ;;  %v6309_v56 = vrot.slane %v6307_v5, 1 }
 0x40f   : > { %6231 = vrot.lane.b32.xlu0 %v12039_v37, %s12539_s24  ;;  %v12103_v5 = vor.u32 %v6309_v56, %v6305_v51  ;;  %v12538_v56 = vrot.slane %v12025_v35, 1 }
 0x411   : > { %6313 = vrot.lane.b32.xlu1 %v12819_v30, %s12539_s24 }
 0x413   : > { %6315 = vrot.lane.b32.xlu0 %v11813_v29, %s12539_s24 }
 0x415   : > { %6317 = vrot.lane.b32.xlu1 %v11816_v1, %s12539_s24 }
 0x417   : > { %6319 = vrot.lane.b32.xlu0 %v11839_v59, %s12539_s24 }
 0x419   : > { %6321 = vrot.lane.b32.xlu1 %v11842_v48, %s12539_s24 }
 0x41b   : > { %6323 = vrot.lane.b32.xlu0 %v11882_v60, %s12539_s24 }
 0x41d   : > { %6345 = vrot.lane.b32.xlu1 %v12059_v8, %s12539_s24 }
 0x41f   : > { %6325 = vrot.lane.b32.xlu0 %v11885_v23, %s12539_s24 }
 0x421   : > { %6327 = vrot.lane.b32.xlu1 %v12537_v25, %s12539_s24 }
 0x423   : > { %6329 = vrot.lane.b32.xlu0 %v12820_v44, %s12539_s24 }
 0x424   : > { %v6286_v54 = vpop.permute.xlu1 %6285 }
 0x425   : > { %6331 = vrot.lane.b32.xlu1 %v12073_v2, %s12539_s24  ;;  %v6410_v21 = vsel %vm5632_vm10, %v12073_v2, %v6286_v54 }
 0x426   : > { %v6288_v41 = vpop.permute.xlu0 %6287 }
 0x427   : > { %6333 = vrot.lane.b32.xlu0 %v12078_v24, %s12539_s24  ;;  %v6413_v20 = vsel %vm5632_vm10, %v12078_v24, %v6288_v41 }
 0x428   : > { %v8010_v30 = vcombine.low %v6410_v21, %v6413_v20  ;;  %v6222_v32 = vpop.permute.xlu1 %6221  ;;  %v12114_v20 = vrot.slane %v12015_v15, 1 }
 0x429   : > { %6335 = vrot.lane.b32.xlu1 %v12084_v36, %s12539_s24  ;;  %v6368_v54 = vsel %vm5632_vm10, %v11785_v33, %v6222_v32 }
 0x42a   : > { %v6224_v44 = vpop.permute.xlu0 %6223  ;;  %7035 = vmatprep.mubr.bf16.mxu1 %v8010_v30 }
 0x42b   : > { %6337 = vrot.lane.b32.xlu0 %v12089_v16, %s12539_s24  ;;  %v6370_v41 = vsel %vm5632_vm10, %v11854_v45, %v6224_v44 }
 0x42c   : > { %v12109_v21 = vcombine.low %v6368_v54, %v6370_v41 }
 0x42d   : > { %6339 = vrot.lane.b32.xlu1 %v12098_v34, %s12539_s24 }
 0x42e   : > { %7036 = vmatmul.mubr.bf16.gmra.mrb[52].mxu1 %v12109_v21 }
 0x42f   : > { %6347 = vrot.lane.b32.xlu0 %v12103_v5, %s12539_s24 }
 0x431   : > { %6341 = vrot.lane.b32.xlu1 %v12114_v20, %s12539_s24 }
 0x433   : > { %6343 = vrot.lane.b32.xlu0 %v12538_v56, %s12539_s24  ;;  %s8662_s24 = smov [#allocation2]  }
 0x434   : > { %s8598_s17 = sshll.u32 %s8662_s24, 4  ;;  %s8599_s17 = int_to_ptr.vmem [resolvable:$false] %s8598_s17 }
 0x435   : > { %s8600_s22 = scalar_lea.vmem %s8599_s17, 2048  ;;  %p8601_p0 = scmp.lt.s32.totalorder %s12444_s23, %s8599_s17 }
 0x436   : > { %p8602_p1 = scmp.lt.s32.totalorder %s8600_s22, %s8594_s20 }
 0x438   : > { %p8603_p2 = por %p8602_p1, %p8601_p0 }
 0x43a   : > { %p8604_p3 = pnand %p8603_p2, %p8597_p13 }
 0x461   : > { %v6290_v33 = vpop.permute.xlu1 %6289 }
 0x462   : > { %v6416_v30 = vsel %vm5632_vm10, %v12084_v36, %v6290_v33 }
 0x463   : > { %v6292_v45 = vpop.permute.xlu0 %6291 }
 0x464   : > { %v6419_v32 = vsel %vm5632_vm10, %v12089_v16, %v6292_v45 }
 0x465   : > { %v8014_v51 = vcombine.low %v6416_v30, %v6419_v32  ;;  %v6226_v44 = vpop.permute.xlu1 %6225 }
 0x466   : > { %v6372_v41 = vsel %vm5632_vm10, %v11879_v63, %v6226_v44 }
 0x467   : > { %v6228_v54 = vpop.permute.xlu0 %6227  ;;  %7043 = vmatprep.mubr.bf16.mxu1 %v8014_v51 }
 0x468   : > { %v6374_v25 = vsel %vm5632_vm10, %v11956_v4, %v6228_v54 }
 0x469   : > { %v12131_v26 = vcombine.low %v6372_v41, %v6374_v25 }
 0x46b   : > { %7044 = vmatmul.mubr.bf16.gmra.mrb[56].mxu1 %v12131_v26 }
 0x473   : > { %v8202_v56 = vpop.f32.mrb[32].mxu1 }
 0x474   : > { %v8203_v9 = vpop.f32.mrb[33].mxu1 }
 0x475   : > { %v12134_v33 = vadd.f32 %v8203_v9, %v8202_v56  ;;  %v8205_v17 = vpop.f32.mrb[34].mxu1 }
 0x476   : > { %v8206_v45 = vpop.f32.mrb[35].mxu1 }
 0x477   : > { %v12136_v30 = vadd.f32 %v8206_v45, %v8205_v17 }
 0x47b   : > { %v6294_v32 = vpop.permute.xlu1 %6293 }
 0x47c   : > { %v6422_v63 = vsel %vm5632_vm10, %v12098_v34, %v6294_v32 }
 0x47d   : > { %v6296_v51 = vpop.permute.xlu0 %6295 }
 0x47e   : > { %v6425_v4 = vsel %vm5632_vm10, %v12114_v20, %v6296_v51 }
 0x47f   : > { %v8018_v25 = vcombine.low %v6422_v63, %v6425_v4  ;;  %v6230_v44 = vpop.permute.xlu1 %6229 }
 0x480   : > { %v8208_v41 = vpop.f32.mrb[36].mxu1  ;;  %v6376_v9 = vsel %vm5632_vm10, %v11970_v53, %v6230_v44 }
 0x481   : > { %7051 = vmatprep.mubr.bf16.mxu1 %v8018_v25  ;;  %v6232_v54 = vpop.permute.xlu0 %6231  ;;  %v8209_v56 = vpop.f32.mrb[37].mxu1 }
 0x482   : > { %v6378_v17 = vsel %vm5632_vm10, %v12015_v15, %v6232_v54  ;;  %v12148_v46 = vadd.f32 %v8209_v56, %v8208_v41  ;;  %v8211_v32 = vpop.f32.mrb[38].mxu1  ;;  %v8581_v41 = vld [vmem:[%s12500_s7 + $0x108] sm:$0xff]  }
 0x483   : > { %v12146_v45 = vcombine.low %v6376_v9, %v6378_v17  ;;  %v6314_v3 = vpop.permute.xlu1 %6313  ;;  %v8212_v19 = vpop.f32.mrb[39].mxu1 }
 0x484   : > { %v12151_v63 = vadd.f32 %v8212_v19, %v8211_v32  ;;  %v6428_v15 = vsel %vm5632_vm10, %v11645_v39, %v6314_v3  ;;  %v8582_v39 = vld [vmem:[%s12500_s7 + $0x110] sm:$0xff]  }
 0x485   : > { %7052 = vmatmul.mubr.bf16.gmra.mrb[60].mxu1 %v12146_v45  ;;  %v6316_v51 = vpop.permute.xlu0 %6315 }
 0x486   : > { %7092 = vmatprep.mubr.bf16.mxu1 %v11836_v38  ;;  %v6431_v53 = vsel %vm5632_vm10, %v11695_v18, %v6316_v51 }
 0x487   : > { %v6318_v25 = vpop.permute.xlu1 %6317  ;;  %v7990_v54 = vcombine.low %v6428_v15, %v6431_v53 }
 0x488   : > { %v8214_v4 = vpop.f32.mrb[40].mxu1  ;;  %v6434_v51 = vsel %vm5632_vm10, %v11707_v28, %v6318_v25 }
 0x489   : > { %v8215_v44 = vpop.f32.mrb[41].mxu1  ;;  %v6320_v56 = vpop.permute.xlu0 %6319 }
 0x48a   : > { %v12161_v9 = vadd.f32 %v8215_v44, %v8214_v4  ;;  %v8217_v19 = vpop.f32.mrb[42].mxu1  ;;  %v6437_v18 = vsel %vm5632_vm10, %v11730_v58, %v6320_v56 }
 0x48b   : > { %v8218_v17 = vpop.f32.mrb[43].mxu1  ;;  %v6322_v3 = vpop.permute.xlu1 %6321  ;;  %v7994_v4 = vcombine.low %v6434_v51, %v6437_v18 }
 0x48c   : > { %v12163_v38 = vadd.f32 %v8218_v17, %v8217_v19 }
 0x48d   : > { %7093 = vmatmul.mubr.bf16.vlgmr.msra.gmra.mrb[64].mxu1 %v7990_v54  ;;  %v6324_v54 = vpop.permute.xlu0 %6323 }
 0x48e   : > { %8339 = vmatpush3.bf16.msra.mxu1 %v12035_v62  ;;  %7100 = vmatprep.mubr.bf16.mxu1 %v11872_v49  ;;  %v8583_v49 = vld [vmem:[%s12500_s7 + $0x118] sm:$0xff]   ;;  %v6443_v28 = vsel %vm5632_vm10, %v11752_v42, %v6324_v54 }
 0x48f   : > { %8340 = vmatprep.subr.bf16.mxu1 %v8581_v41  ;;  %v6346_v19 = vpop.permute.xlu1 %6345 }
 0x490   : > { %v8220_v32 = vpop.f32.mrb[44].mxu1  ;;  %v6475_v25 = vsel %vm5632_vm10, %v11744_v13, %v6346_v19 }
 0x491   : > { %v8221_v53 = vpop.f32.mrb[45].mxu1  ;;  %v8003_v56 = vcombine.low %v6475_v25, %v11805_v31 }
 0x492   : > { %8341 = vmatpush3.bf16.msra.mxu1 %v8581_v41  ;;  %v12177_v62 = vadd.f32 %v8221_v53, %v8220_v32  ;;  %v8223_v15 = vpop.f32.mrb[46].mxu1  ;;  %v6440_v41 = vsel %vm5632_vm10, %v11732_v7, %v6322_v3  ;;  %v6326_v32 = vpop.permute.xlu0 %6325 }
 0x493   : > { %8342 = vmatprep.subr.bf16.mxu1 %v8582_v39  ;;  %v8224_v44 = vpop.f32.mrb[47].mxu1  ;;  %v7998_v17 = vcombine.low %v6440_v41, %v6443_v28  ;;  %v6328_v18 = vpop.permute.xlu1 %6327  ;;  %v6446_v42 = vsel %vm5632_vm10, %v11754_v27, %v6326_v32 }
 0x494   : > { %v12179_v58 = vadd.f32 %v8224_v44, %v8223_v15 }
 0x495   : > { %7101 = vmatmul.mubr.bf16.gmra.mrb[68].mxu1 %v7994_v4 }
 0x496   : > { %7108 = vmatprep.mubr.bf16.mxu1 %v11910_v11  ;;  %8343 = vmatpush3.bf16.msra.mxu1 %v8582_v39  ;;  %v6449_v11 = vsel %vm5632_vm10, %v12059_v8, %v6328_v18  ;;  %v6330_v51 = vpop.permute.xlu0 %6329 }
 0x497   : > { %8344 = vmatprep.subr.bf16.mxu1 %v8583_v49  ;;  %v8002_v39 = vcombine.low %v6446_v42, %v6449_v11  ;;  %v6332_v53 = vpop.permute.xlu1 %6331  ;;  %v6452_v3 = vsel %vm5632_vm10, %v11790_v47, %v6330_v51  ;;  %v8009_v42 = vcombine.low %v12073_v2, %v12078_v24 }
 0x498   : > { %v6455_v7 = vsel %vm5632_vm10, %v11889_v0, %v6332_v53 }
 0x49a   : > { %8345 = vmatpush3.bf16.msra.mxu1 %v8583_v49  ;;  %v6334_v4 = vpop.permute.xlu0 %6333  ;;  %v8007_v49 = vcombine.low %v6452_v3, %v6455_v7 }
 0x49b   : > { %v6336_v15 = vpop.permute.xlu1 %6335  ;;  %v6458_v44 = vsel %vm5632_vm10, %v11902_v52, %v6334_v4 }
 0x49c   : > { %v6461_v27 = vsel %vm5632_vm10, %v11974_v43, %v6336_v15 }
 0x49d   : > { %7109 = vmatmul.mubr.bf16.gmra.mrb[72].mxu1 %v7998_v17  ;;  %v7992_v17 = vcombine.low %v11813_v29, %v11816_v1  ;;  %v12821_v29 = vrot.slane %v11744_v13, 1  ;;  %v12822_v13 = vrot.slane %v12025_v35, 1 }
 0x49e   : > { %7116 = vmatprep.mubr.bf16.mxu1 %v8003_v56  ;;  %v6338_v8 = vpop.permute.xlu0 %6337 }
 0x49f   : > { %v6340_v54 = vpop.permute.xlu1 %6339  ;;  %v8004_v1 = vcombine.low %v12821_v29, %v11795_v40 }
 0x4a0   : > { %v6467_v47 = vsel %vm5632_vm10, %v12029_v14, %v6340_v54 }
 0x4a2   : > { %v6348_v0 = vpop.permute.xlu0 %6347 }
 0x4a3   : > { %v6477_v19 = vsel %vm5632_vm10, %v12025_v35, %v6348_v0  ;;  %v6342_v52 = vpop.permute.xlu1 %6341  ;;  %v8586_v35 = vld [vmem:[%s12503_s10 + $0x10] sm:$0xff]  }
 0x4a4   : > { %v8020_v28 = vcombine.low %v6477_v19, %v11805_v31 }
 0x4a5   : > { %7117 = vmatmul.mubr.bf16.gmra.mrb[76].mxu1 %v8002_v39 }
 0x4a6   : > { %7124 = vmatprep.mubr.bf16.mxu1 %v12109_v21  ;;  %v8011_v21 = vcombine.low %v6458_v44, %v6461_v27  ;;  %v6344_v25 = vpop.permute.xlu0 %6343 }
 0x4a7   : > { %v6473_v41 = vsel %vm5632_vm10, %v12103_v5, %v6344_v25  ;;  %v7996_v5 = vcombine.low %v11839_v59, %v11842_v48  ;;  %v8013_v59 = vcombine.low %v12084_v36, %v12089_v16  ;;  %v8017_v48 = vcombine.low %v12098_v34, %v12114_v20  ;;  %v8584_v16 = vld [vmem:[%s12503_s10] sm:$0xff]   ;;  %v8587_v34 = vld [vmem:[%s12503_s10 + $0x18] sm:$0xff]  }
 0x4a8   : > { %8362 = vmatprep.subr.bf16.mxu1 %v8584_v16 }
 0x4ad   : > { %7125 = vmatmul.mubr.bf16.gmra.mrb[80].mxu1 %v8007_v49 }
 0x4ae   : > { %7132 = vmatprep.mubr.bf16.mxu1 %v12131_v26  ;;  %v6464_v26 = vsel %vm5632_vm10, %v11982_v6, %v6338_v8 }
 0x4af   : > { %v8015_v43 = vcombine.low %v6464_v26, %v6467_v47 }
 0x4b5   : > { %7133 = vmatmul.mubr.bf16.gmra.mrb[84].mxu1 %v8011_v21 }
 0x4b6   : > { %7140 = vmatprep.mubr.bf16.mxu1 %v12146_v45  ;;  %v6470_v45 = vsel %vm5632_vm10, %v12039_v37, %v6342_v52  ;;  %v8000_v37 = vcombine.low %v11882_v60, %v11885_v23  ;;  %v8021_v60 = vcombine.low %v12822_v13, %v11795_v40  ;;  %v8585_v40 = vld [vmem:[%s12503_s10 + $0x8] sm:$0xff]  }
 0x4b7   : > { %v8019_v14 = vcombine.low %v6470_v45, %v6473_v41 }
 0x4bd   : > { %7141 = vmatmul.mubr.bf16.gmra.mrb[88].mxu1 %v8015_v43 }
 0x4be   : > { %7148 = vmatprep.mubr.bf16.mxu1 %v8020_v28 }
 0x4c2   : > { %v8226_v56 = vpop.f32.mrb[48].mxu1 }
 0x4c3   : > { %v8227_v6 = vpop.f32.mrb[49].mxu1 }
 0x4c4   : > { %v12218_v31 = vadd.f32 %v8227_v6, %v8226_v56  ;;  %v8229_v18 = vpop.f32.mrb[50].mxu1 }
 0x4c5   : > { %7149 = vmatmul.mubr.bf16.gmra.mrb[92].mxu1 %v8019_v14  ;;  %v8230_v32 = vpop.f32.mrb[51].mxu1 }
 0x4c6   : > { %8346 = vmatprep.mubr.msk.bf16.mxu1 %vm5632_vm10, %v7992_v17  ;;  %v12220_v11 = vadd.f32 %v8230_v32, %v8229_v18 }
 0x4cd   : > { %8347 = vmatmul.mubr.msk.bf16.vlgmr.msra.gmra.mrb[96].mxu1 %vm5632_vm10, %v7996_v5 }
 0x4ce   : > { %8350 = vmatprep.mubr.msk.bf16.mxu1 %vm5632_vm10, %v8000_v37  ;;  %8363 = vmatpush3.bf16.msra.mxu1 %v8584_v16 }
 0x4cf   : > { %8364 = vmatprep.subr.bf16.mxu1 %v8585_v40 }
 0x4d2   : > { %8365 = vmatpush3.bf16.msra.mxu1 %v8585_v40 }
 0x4d3   : > { %8366 = vmatprep.subr.bf16.mxu1 %v8586_v35 }
 0x4d5   : > { %8351 = vmatmul.mubr.msk.bf16.gmra.mrb[100].mxu1 %vm5632_vm10, %v8004_v1 }
 0x4d6   : > { %8354 = vmatprep.mubr.msk.bf16.mxu1 %vm5632_vm10, %v8009_v42  ;;  %8367 = vmatpush3.bf16.msra.mxu1 %v8586_v35 }
 0x4d7   : > { %8368 = vmatprep.subr.bf16.mxu1 %v8587_v34 }
 0x4da   : > { %8369 = vmatpush3.bf16.msra.mxu1 %v8587_v34 }
 0x4dd   : > { %8355 = vmatmul.mubr.msk.bf16.gmra.mrb[104].mxu1 %vm5632_vm10, %v8013_v59 }
 0x4de   : > { %8358 = vmatprep.mubr.msk.bf16.mxu1 %vm5632_vm10, %v8017_v48 }
 0x4e5   : > { %8359 = vmatmul.mubr.msk.bf16.gmra.mrb[108].mxu1 %vm5632_vm10, %v8021_v60 }
 0x501   : > { %v8232_v23 = vpop.f32.mrb[52].mxu1 }
 0x502   : > { %v8233_v2 = vpop.f32.mrb[53].mxu1 }
 0x503   : > { %v12245_v24 = vadd.f32 %v8233_v2, %v8232_v23  ;;  %v8235_v39 = vpop.f32.mrb[54].mxu1 }
 0x504   : > { %v8236_v51 = vpop.f32.mrb[55].mxu1 }
 0x505   : > { %v12247_v36 = vadd.f32 %v8236_v51, %v8235_v39 }
 0x53e   : > { %v8238_v20 = vpop.f32.mrb[56].mxu1 }
 0x53f   : > { %v8239_v53 = vpop.f32.mrb[57].mxu1 }
 0x540   : > { %v12261_v7 = vadd.f32 %v8239_v53, %v8238_v20  ;;  %v8241_v3 = vpop.f32.mrb[58].mxu1 }
 0x541   : > { %v8242_v4 = vpop.f32.mrb[59].mxu1 }
 0x542   : > { %v8243_v49 = vadd.f32 %v8242_v4, %v8241_v3 }
 0x558   : > { %v8244_v15 = vpop.f32.mrb[60].mxu1 }
 0x559   : > { %v8245_v27 = vpop.f32.mrb[61].mxu1 }
 0x55a   : > { %v12263_v8 = vadd.f32 %v8245_v27, %v8244_v15  ;;  %v8247_v44 = vpop.f32.mrb[62].mxu1 }
 0x55b   : > { %v8248_v21 = vpop.f32.mrb[63].mxu1 }
 0x55c   : > { %v12265_v54 = vadd.f32 %v8248_v21, %v8247_v44 }
 0x560   : > { %v8266_v0 = vpop.f32.mrb[64].mxu1 }
 0x561   : > { %v8267_v47 = vpop.f32.mrb[65].mxu1 }
 0x562   : > { %v8268_v19 = vadd.f32 %v8267_v47, %v8266_v0  ;;  %v8269_v26 = vpop.f32.mrb[66].mxu1 }
 0x563   : > { %v8270_v43 = vpop.f32.mrb[67].mxu1 }
 0x564   : > { %v8271_v28 = vadd.f32 %v8270_v43, %v8269_v26  ;;  %v12268_v25 = vadd.f32 %v8268_v19, %v12134_v33 }
 0x566   : > { %v12271_v52 = vadd.f32 %v8271_v28, %v12136_v30 }
 0x568   : > { %v8272_v41 = vpop.f32.mrb[68].mxu1 }
 0x569   : > { %v8273_v45 = vpop.f32.mrb[69].mxu1 }
 0x56a   : > { %v8274_v14 = vadd.f32 %v8273_v45, %v8272_v41  ;;  %v8275_v17 = vpop.f32.mrb[70].mxu1 }
 0x56b   : > { %v8276_v56 = vpop.f32.mrb[71].mxu1 }
 0x56c   : > { %v8277_v6 = vadd.f32 %v8276_v56, %v8275_v17  ;;  %v7103_v18 = vadd.f32 %v8274_v14, %v12148_v46 }
 0x56e   : > { %v7106_v32 = vadd.f32 %v8277_v6, %v12151_v63 }
 0x570   : > { %v8278_v5 = vpop.f32.mrb[72].mxu1 }
 0x571   : > { %v8279_v37 = vpop.f32.mrb[73].mxu1 }
 0x572   : > { %v8280_v29 = vadd.f32 %v8279_v37, %v8278_v5  ;;  %v8281_v1 = vpop.f32.mrb[74].mxu1  ;;  %v12314_v37 = vld [vmem:[%s12502_s9] ss:$0 sm:$0xff] }
 0x573   : > { %v8282_v42 = vpop.f32.mrb[75].mxu1 }
 0x574   : > { %v8283_v33 = vadd.f32 %v8282_v42, %v8281_v1  ;;  %v12276_v59 = vadd.f32 %v8280_v29, %v12161_v9 }
 0x576   : > { %v12279_v30 = vadd.f32 %v8283_v33, %v12163_v38 }
 0x578   : > { %v8284_v48 = vpop.f32.mrb[76].mxu1 }
 0x579   : > { %v8285_v13 = vpop.f32.mrb[77].mxu1 }
 0x57a   : > { %v8286_v60 = vadd.f32 %v8285_v13, %v8284_v48  ;;  %v8287_v23 = vpop.f32.mrb[78].mxu1 }
 0x57b   : > { %v8288_v2 = vpop.f32.mrb[79].mxu1 }
 0x57c   : > { %v8289_v46 = vadd.f32 %v8288_v2, %v8287_v23  ;;  %v7119_v63 = vadd.f32 %v8286_v60, %v12177_v62 }
 0x57e   : > { %v7122_v39 = vadd.f32 %v8289_v46, %v12179_v58 }
 0x580   : > { %v8290_v51 = vpop.f32.mrb[80].mxu1 }
 0x581   : > { %v8291_v16 = vpop.f32.mrb[81].mxu1 }
 0x582   : > { %v8292_v40 = vadd.f32 %v8291_v16, %v8290_v51  ;;  %v8293_v35 = vpop.f32.mrb[82].mxu1 }
 0x583   : > { %v8294_v34 = vpop.f32.mrb[83].mxu1 }
 0x584   : > { %v8295_v9 = vadd.f32 %v8294_v34, %v8293_v35  ;;  %v12284_v20 = vadd.f32 %v8292_v40, %v12218_v31 }
 0x586   : > { %v12287_v38 = vadd.f32 %v8295_v9, %v12220_v11 }
 0x588   : > { %v8296_v53 = vpop.f32.mrb[84].mxu1 }
 0x589   : > { %v8297_v3 = vpop.f32.mrb[85].mxu1 }
 0x58a   : > { %v8298_v4 = vadd.f32 %v8297_v3, %v8296_v53  ;;  %v8299_v15 = vpop.f32.mrb[86].mxu1 }
 0x58b   : > { %v8300_v27 = vpop.f32.mrb[87].mxu1 }
 0x58c   : > { %v8301_v62 = vadd.f32 %v8300_v27, %v8299_v15  ;;  %v12290_v58 = vadd.f32 %v8298_v4, %v12245_v24 }
 0x58e   : > { %v12293_v44 = vadd.f32 %v8301_v62, %v12247_v36 }
 0x590   : > { %v8302_v21 = vpop.f32.mrb[88].mxu1 }
 0x591   : > { %v8303_v0 = vpop.f32.mrb[89].mxu1 }
 0x592   : > { %v8304_v47 = vadd.f32 %v8303_v0, %v8302_v21  ;;  %v8305_v31 = vpop.f32.mrb[90].mxu1 }
 0x593   : > { %v8306_v19 = vpop.f32.mrb[91].mxu1 }
 0x594   : > { %v8307_v26 = vadd.f32 %v8306_v19, %v8305_v31  ;;  %v12296_v11 = vadd.f32 %v8304_v47, %v12261_v7  ;;  %v12309_v7 = vld [vmem:[%s12501_s8] ss:$0 sm:$0xff] }
 0x596   : > { %v12298_v43 = vadd.f32 %v8307_v26, %v8243_v49 }
 0x598   : > { %v8308_v28 = vpop.f32.mrb[92].mxu1 }
 0x599   : > { %v8309_v41 = vpop.f32.mrb[93].mxu1 }
 0x59a   : > { %v8310_v45 = vadd.f32 %v8309_v41, %v8308_v28  ;;  %v8311_v14 = vpop.f32.mrb[94].mxu1 }
 0x59b   : > { %v8312_v24 = vpop.f32.mrb[95].mxu1 }
 0x59c   : > { %v8313_v17 = vadd.f32 %v8312_v24, %v8311_v14  ;;  %v12301_v36 = vadd.f32 %v8310_v45, %v12263_v8 }
 0x59e   : > { %v12304_v56 = vadd.f32 %v8313_v17, %v12265_v54 }
 0x5a0   : > { %v8348_v6 = vpop.f32.mrb[96].mxu1 }
 0x5a1   : > { %v7200_v49 = vadd.f32 %v8348_v6, %v7103_v18  ;;  %v7191_v5 = vpop.f32.mrb[97].mxu1 }
 0x5a2   : > { %v7192_v29 = vadd.f32 %v7191_v5, %v12268_v25  ;;  %v8349_v8 = vpop.f32.mrb[98].mxu1 }
 0x5a3   : > { %v7263_v1 = vmul.f32 %v12309_v7, %v7200_v49  ;;  %v7203_v54 = vadd.f32 %v8349_v8, %v7106_v32  ;;  %v7194_v42 = vpop.f32.mrb[99].mxu1 }
 0x5a4   : > { %v7261_v33 = vmul.f32 %v12309_v7, %v7192_v29  ;;  %v7195_v48 = vadd.f32 %v7194_v42, %v12271_v52 }
 0x5a5   : > { %v7286_v13 = vadd.f32 %v12314_v37, %v7263_v1  ;;  %v7264_v18 = vmul.f32 %v12309_v7, %v7203_v54 }
 0x5a6   : > { %v7284_v60 = vadd.f32 %v12314_v37, %v7261_v33  ;;  %v7262_v23 = vmul.f32 %v12309_v7, %v7195_v48 }
 0x5a7   : > { %v7287_v2 = vadd.f32 %v12314_v37, %v7264_v18  ;;  %v7302_v51 = vmax.f32 %v7286_v13, 0.0 }
 0x5a8   : > { %v7285_v25 = vadd.f32 %v12314_v37, %v7262_v23  ;;  %v8352_v46 = vpop.f32.mrb[100].mxu1  ;;  %v7300_v35 = vmax.f32 %v7284_v60, 0.0 }
 0x5a9   : > { %v7303_v32 = vmax.f32 %v7287_v2, 0.0  ;;  %v7216_v16 = vadd.f32 %v8352_v46, %v7119_v63  ;;  %v7207_v40 = vpop.f32.mrb[101].mxu1 }
 0x5aa   : > { %v7301_v34 = vmax.f32 %v7285_v25, 0.0  ;;  %v7208_v52 = vadd.f32 %v7207_v40, %v12276_v59  ;;  %v8353_v9 = vpop.f32.mrb[102].mxu1 }
 0x5ab   : > { %v7317_v53 = vpack.c.bf16 %v7303_v32, %v7302_v51  ;;  %v7267_v3 = vmul.f32 %v12309_v7, %v7216_v16  ;;  %v7219_v4 = vadd.f32 %v8353_v9, %v7122_v39  ;;  %v7210_v15 = vpop.f32.mrb[103].mxu1 }
 0x5ac   : > { %v7316_v27 = vpack.c.bf16 %v7301_v34, %v7300_v35  ;;  %v7265_v62 = vmul.f32 %v12309_v7, %v7208_v52  ;;  %v7211_v21 = vadd.f32 %v7210_v15, %v12279_v30 }
 0x5ad   : > { %v7290_v0 = vadd.f32 %v12314_v37, %v7267_v3  ;;  %v7268_v63 = vmul.f32 %v12309_v7, %v7219_v4 }
 0x5ae   : > { %v7288_v47 = vadd.f32 %v12314_v37, %v7265_v62  ;;  %v7266_v31 = vmul.f32 %v12309_v7, %v7211_v21  ;;  %8370 = vmatprep.mubr.msk.bf16.mxu1 %vm5632_vm10, %v7316_v27 }
 0x5af   : > { %v7291_v59 = vadd.f32 %v12314_v37, %v7268_v63  ;;  %8371 = vmatmul.mubr.msk.bf16.vlgmr.msra.gmra.mrb[112].mxu1 %vm5632_vm10, %v7317_v53  ;;  %v7306_v26 = vmax.f32 %v7290_v0, 0.0 }
 0x5b0   : > { %v7289_v39 = vadd.f32 %v12314_v37, %v7266_v31  ;;  %v8356_v19 = vpop.f32.mrb[104].mxu1  ;;  %v7304_v45 = vmax.f32 %v7288_v47, 0.0 }
 0x5b1   : > { %v7307_v28 = vmax.f32 %v7291_v59, 0.0  ;;  %v7232_v30 = vadd.f32 %v8356_v19, %v12290_v58  ;;  %v7223_v41 = vpop.f32.mrb[105].mxu1 }
 0x5b2   : > { %v7305_v14 = vmax.f32 %v7289_v39, 0.0  ;;  %v7224_v24 = vadd.f32 %v7223_v41, %v12284_v20  ;;  %v8357_v17 = vpop.f32.mrb[106].mxu1 }
 0x5b3   : > { %v7319_v6 = vpack.c.bf16 %v7307_v28, %v7306_v26  ;;  %v7271_v49 = vmul.f32 %v12309_v7, %v7232_v30  ;;  %v7235_v5 = vadd.f32 %v8357_v17, %v12293_v44  ;;  %v7226_v29 = vpop.f32.mrb[107].mxu1 }
 0x5b4   : > { %v7318_v8 = vpack.c.bf16 %v7305_v14, %v7304_v45  ;;  %v7269_v1 = vmul.f32 %v12309_v7, %v7224_v24  ;;  %v7227_v54 = vadd.f32 %v7226_v29, %v12287_v38 }
 0x5b5   : > { %v7294_v42 = vadd.f32 %v12314_v37, %v7271_v49  ;;  %v7272_v58 = vmul.f32 %v12309_v7, %v7235_v5 }
 0x5b6   : > { %v7292_v33 = vadd.f32 %v12314_v37, %v7269_v1  ;;  %v7270_v20 = vmul.f32 %v12309_v7, %v7227_v54  ;;  %8374 = vmatprep.mubr.msk.bf16.mxu1 %vm5632_vm10, %v7318_v8 }
 0x5b7   : > { %v7295_v48 = vadd.f32 %v12314_v37, %v7272_v58  ;;  %8375 = vmatmul.mubr.msk.bf16.gmra.mrb[116].mxu1 %vm5632_vm10, %v7319_v6  ;;  %v7310_v18 = vmax.f32 %v7294_v42, 0.0 }
 0x5b8   : > { %v7293_v44 = vadd.f32 %v12314_v37, %v7270_v20  ;;  %v8360_v13 = vpop.f32.mrb[108].mxu1  ;;  %v7308_v2 = vmax.f32 %v7292_v33, 0.0 }
 0x5b9   : > { %v7311_v60 = vmax.f32 %v7295_v48, 0.0  ;;  %v7248_v38 = vadd.f32 %v8360_v13, %v12301_v36  ;;  %v7239_v23 = vpop.f32.mrb[109].mxu1 }
 0x5ba   : > { %v7309_v25 = vmax.f32 %v7293_v44, 0.0  ;;  %v7240_v46 = vadd.f32 %v7239_v23, %v12296_v11  ;;  %v8361_v51 = vpop.f32.mrb[110].mxu1 }
 0x5bb   : > { %v7321_v32 = vpack.c.bf16 %v7311_v60, %v7310_v18  ;;  %v7275_v16 = vmul.f32 %v12309_v7, %v7248_v38  ;;  %v7251_v40 = vadd.f32 %v8361_v51, %v12304_v56  ;;  %v7242_v35 = vpop.f32.mrb[111].mxu1 }
 0x5bc   : > { %v7320_v34 = vpack.c.bf16 %v7309_v25, %v7308_v2  ;;  %v7273_v52 = vmul.f32 %v12309_v7, %v7240_v46  ;;  %v7243_v9 = vadd.f32 %v7242_v35, %v12298_v43  ;;  %v12823_v25 = vld [vmem:[#allocation31_spill] sm:$0xff] }
 0x5bd   : > { %v7298_v53 = vadd.f32 %v12314_v37, %v7275_v16  ;;  %v7276_v36 = vmul.f32 %v12309_v7, %v7251_v40 }
 0x5be   : > { %v7296_v3 = vadd.f32 %v12314_v37, %v7273_v52  ;;  %v7274_v11 = vmul.f32 %v12309_v7, %v7243_v9  ;;  %8378 = vmatprep.mubr.msk.bf16.mxu1 %vm5632_vm10, %v7320_v34  ;;  %v12371_v7 = vld [vmem:[%s12504_s11] ss:$0 sm:$0xff] }
 0x5bf   : > { %v7299_v4 = vadd.f32 %v12314_v37, %v7276_v36  ;;  %8379 = vmatmul.mubr.msk.bf16.gmra.mrb[120].mxu1 %vm5632_vm10, %v7321_v32  ;;  %v7314_v15 = vmax.f32 %v7298_v53, 0.0 }
 0x5c0   : > { %v7297_v56 = vadd.f32 %v12314_v37, %v7274_v11  ;;  %v7312_v62 = vmax.f32 %v7296_v3, 0.0  ;;  %v12376_v37 = vld [vmem:[%s12505_s12] ss:$0 sm:$0xff] }
 0x5c1   : > { %v7315_v27 = vmax.f32 %v7299_v4, 0.0 }
 0x5c2   : > { %v7313_v43 = vmax.f32 %v7297_v56, 0.0  ;;  %v12824_v56 = vld [vmem:[#allocation11_spill] sm:$0xff] }
 0x5c3   : > { %v7323_v21 = vpack.c.bf16 %v7315_v27, %v7314_v15 }
 0x5c4   : > { %v7322_v0 = vpack.c.bf16 %v7313_v43, %v7312_v62  ;;  %v12825_v62 = vld [vmem:[#allocation34_spill] sm:$0xff] }
 0x5c6   : > { %8382 = vmatprep.mubr.msk.bf16.mxu1 %vm5632_vm10, %v7322_v0  ;;  %v12826_v0 = vld [vmem:[#allocation25_spill] sm:$0xff] }
 0x5c7   : > { %8383 = vmatmul.mubr.msk.bf16.gmra.mrb[124].mxu1 %vm5632_vm10, %v7323_v21 }
 0x682   : > { %v8372_v63 = vpop.f32.mrb[112].mxu1 }
 0x683   : > { %v7486_v47 = vmul.f32 %v8372_v63, %v12371_v7  ;;  %v7414_v31 = vpop.f32.mrb[113].mxu1 }
 0x684   : > { %v7484_v59 = vmul.f32 %v12371_v7, %v7414_v31  ;;  %v8373_v39 = vpop.f32.mrb[114].mxu1 }
 0x685   : > { %v7509_v19 = vadd.f32 %v12376_v37, %v7486_v47  ;;  %v7487_v26 = vmul.f32 %v8373_v39, %v12371_v7  ;;  %v7417_v28 = vpop.f32.mrb[115].mxu1  ;;  %v12827_v47 = vld [vmem:[#allocation10_spill] sm:$0xff] }
 0x686   : > { %v7507_v30 = vadd.f32 %v12376_v37, %v7484_v59  ;;  %v7485_v41 = vmul.f32 %v12371_v7, %v7417_v28 }
 0x687   : > { %v7525_v45 = vadd.f32 %v7509_v19, %v11636_v12  ;;  %v7510_v14 = vadd.f32 %v12376_v37, %v7487_v26 }
 0x688   : > { %v7523_v24 = vadd.f32 %v7507_v30, %v11516_v57  ;;  %v7508_v17 = vadd.f32 %v12376_v37, %v7485_v41 }
 0x689   : > { %v7526_v6 = vadd.f32 %v7510_v14, %v11640_v50  ;;  %v7541_v29 = vmax.f32 %v7525_v45, 0.0 }
 0x68a   : > { %v7524_v49 = vadd.f32 %v7508_v17, %v11519_v55  ;;  %v8376_v5 = vpop.f32.mrb[116].mxu1  ;;  %v7539_v42 = vmax.f32 %v7523_v24, 0.0 }
 0x68b   : > { %v7542_v8 = vmax.f32 %v7526_v6, 0.0  ;;  %v7490_v1 = vmul.f32 %v8376_v5, %v12371_v7  ;;  %v7430_v54 = vpop.f32.mrb[117].mxu1 }
 0x68c   : > { %v7540_v12 = vmax.f32 %v7524_v49, 0.0  ;;  %v7488_v58 = vmul.f32 %v12371_v7, %v7430_v54  ;;  %v8377_v33 = vpop.f32.mrb[118].mxu1 }
 0x68d   : > { %v8147_v57 = vpack.c.bf16 %v7542_v8, %v7541_v29  ;;  %v7513_v20 = vadd.f32 %v12376_v37, %v7490_v1  ;;  %v7491_v48 = vmul.f32 %v8377_v33, %v12371_v7  ;;  %v7433_v44 = vpop.f32.mrb[119].mxu1  ;;  %v12828_v1 = vld [vmem:[#allocation21_spill] sm:$0xff] }
 0x68e   : > { %v8142_v50 = vpack.c.bf16 %v7540_v12, %v7539_v42  ;;  %v7511_v55 = vadd.f32 %v12376_v37, %v7488_v58  ;;  %v7489_v13 = vmul.f32 %v12371_v7, %v7433_v44  ;;  %v12829_v12 = vld [vmem:[#allocation16_spill] sm:$0xff] }
 0x68f   : > { %8179 = vst [vmem:[%s12399_s21 + $0x8] sm:$0xff] %v8147_v57   ;;  %v7529_v18 = vadd.f32 %v7513_v20, %v11665_v61  ;;  %v7514_v60 = vadd.f32 %v12376_v37, %v7491_v48  ;;  %v12830_v57 = vld [vmem:[#allocation13_spill] sm:$0xff]  ;;  %v12831_v48 = vld [vmem:[#allocation20_spill] sm:$0xff] }
 0x690   : > { %8143 = vst [vmem:[%s12399_s21] sm:$0xff] %v8142_v50   ;;  %v7527_v38 = vadd.f32 %v7511_v55, %v11653_v22  ;;  %v7512_v23 = vadd.f32 %v12376_v37, %v7489_v13 }
 0x691   : > { %v7530_v2 = vadd.f32 %v7514_v60, %v11674_v10  ;;  %v7545_v32 = vmax.f32 %v7529_v18, 0.0 }
 0x692   : > { %v7528_v46 = vadd.f32 %v7512_v23, %v12823_v25  ;;  %v8380_v51 = vpop.f32.mrb[120].mxu1  ;;  %v7543_v61 = vmax.f32 %v7527_v38, 0.0 }
 0x693   : > { %v7546_v16 = vmax.f32 %v7530_v2, 0.0  ;;  %v7494_v40 = vmul.f32 %v8380_v51, %v12371_v7  ;;  %v7446_v35 = vpop.f32.mrb[121].mxu1 }
 0x694   : > { %v7544_v34 = vmax.f32 %v7528_v46, 0.0  ;;  %v7492_v52 = vmul.f32 %v12371_v7, %v7446_v35  ;;  %v8381_v9 = vpop.f32.mrb[122].mxu1 }
 0x695   : > { %v8157_v22 = vpack.c.bf16 %v7546_v16, %v7545_v32  ;;  %v7517_v53 = vadd.f32 %v12376_v37, %v7494_v40  ;;  %v7495_v10 = vmul.f32 %v8381_v9, %v12371_v7  ;;  %v7449_v36 = vpop.f32.mrb[123].mxu1 }
 0x696   : > { %v8152_v3 = vpack.c.bf16 %v7544_v34, %v7543_v61  ;;  %v7515_v11 = vadd.f32 %v12376_v37, %v7492_v52  ;;  %v7493_v4 = vmul.f32 %v12371_v7, %v7449_v36 }
 0x697   : > { %8181 = vst [vmem:[%s12399_s21 + $0x18] sm:$0xff] %v8157_v22   ;;  %v7533_v15 = vadd.f32 %v7517_v53, %v12824_v56  ;;  %v7518_v27 = vadd.f32 %v12376_v37, %v7495_v10 }
 0x698   : > { %8180 = vst [vmem:[%s12399_s21 + $0x10] sm:$0xff] %v8152_v3   ;;  %v7531_v43 = vadd.f32 %v7515_v11, %v12825_v62  ;;  %v7516_v21 = vadd.f32 %v12376_v37, %v7493_v4 }
 0x699   : > { %v7534_v63 = vadd.f32 %v7518_v27, %v12826_v0  ;;  %v7549_v39 = vmax.f32 %v7533_v15, 0.0 }
 0x69a   : > { %v7532_v31 = vadd.f32 %v7516_v21, %v12827_v47  ;;  %v8384_v59 = vpop.f32.mrb[124].mxu1  ;;  %v7547_v30 = vmax.f32 %v7531_v43, 0.0 }
 0x69b   : > { %v7550_v19 = vmax.f32 %v7534_v63, 0.0  ;;  %v7498_v26 = vmul.f32 %v8384_v59, %v12371_v7  ;;  %v7462_v28 = vpop.f32.mrb[125].mxu1 }
 0x69c   : > { %v7548_v41 = vmax.f32 %v7532_v31, 0.0  ;;  %v7496_v45 = vmul.f32 %v12371_v7, %v7462_v28  ;;  %v8385_v14 = vpop.f32.mrb[126].mxu1 }
 0x69d   : > { %v8167_v24 = vpack.c.bf16 %v7550_v19, %v7549_v39  ;;  %v7521_v17 = vadd.f32 %v12376_v37, %v7498_v26  ;;  %v7499_v6 = vmul.f32 %v8385_v14, %v12371_v7  ;;  %v7465_v49 = vpop.f32.mrb[127].mxu1 }
 0x69e   : > { %v8162_v5 = vpack.c.bf16 %v7548_v41, %v7547_v30  ;;  %v7519_v29 = vadd.f32 %v12376_v37, %v7496_v45  ;;  %v7497_v8 = vmul.f32 %v12371_v7, %v7465_v49 }
 0x69f   : > { %8183 = vst [vmem:[%s12399_s21 + $0x28] sm:$0xff] %v8167_v24   ;;  %v7537_v54 = vadd.f32 %v7521_v17, %v12828_v1  ;;  %v7522_v42 = vadd.f32 %v12376_v37, %v7499_v6 }
 0x6a0   : > { %8182 = vst [vmem:[%s12399_s21 + $0x20] sm:$0xff] %v8162_v5   ;;  %v7535_v58 = vadd.f32 %v7519_v29, %v12829_v12  ;;  %v7520_v33 = vadd.f32 %v12376_v37, %v7497_v8 }
 0x6a1   : > { %v7538_v20 = vadd.f32 %v7522_v42, %v12830_v57  ;;  %v7553_v7 = vmax.f32 %v7537_v54, 0.0 }
 0x6a2   : > { %v7536_v44 = vadd.f32 %v7520_v33, %v12831_v48  ;;  %v7551_v55 = vmax.f32 %v7535_v58, 0.0 }
 0x6a3   : > { %v7554_v50 = vmax.f32 %v7538_v20, 0.0 }
 0x6a4   : > { %v7552_v13 = vmax.f32 %v7536_v44, 0.0 }
 0x6a5   : > { %v8177_v18 = vpack.c.bf16 %v7554_v50, %v7553_v7 }
 0x6a6   : > { %v8172_v60 = vpack.c.bf16 %v7552_v13, %v7551_v55 }
 0x6a7   : > { %8185 = vst [vmem:[%s12399_s21 + $0x38] sm:$0xff] %v8177_v18  }
 0x6a8   : > { %8184 = vst [vmem:[%s12399_s21 + $0x30] sm:$0xff] %v8172_v60  }
 0x6a9   : > { %8607 = shalt.err (!%p8604_p3)
}
 0x6aa   : > { %s8608_s15 = scalar_lea.hbm %s12442_s16, 1024  ;;  %s8612_s24 = scalar_lea.hbm %s12506_s13, 2048 }
 0x6ab   : > { %p8609_p4 = scmp.ne.s32.totalorder %s12442_s16, %s8608_s15  ;;  %p8613_p9 = scmp.lt.u32.totalorder %s12442_s16, %s12506_s13 }
 0x6ac   : > { %p8614_p10 = scmp.lt.u32.totalorder %s8612_s24, %s8608_s15  ;;  %p8616_p12 = scmp.lt.u32.totalorder %s8608_s15, %s12442_s16 }
 0x6ad   : > { %p8610_p7 = pnand %p8609_p4, %p8772_p5 }
 0x6ae   : > { %p8615_p11 = por %p8614_p10, %p8613_p9 }
 0x6af   : > { %p8611_p8 = pneg %p8610_p7 }
 0x6b0   : > { %p8617_p13 = por %p8616_p12, %p8615_p11 }
 0x6b2   : > { %p8618_p0 = pnand %p8617_p13, %p8611_p8 }
 0x6b4   : > { %8621 = shalt.err (!%p8618_p0)
}
 0x6b5   : > { %s8663_s20 = smov 4   ;;  %s12832_s22 = smov 64  }
 0x6b6   : > { %8386 = dma.vmem_to_hbm [thread:$0]  (%p8772_p5), %s12444_s23, 1024, %s12442_s16, %s12450_s29, %s12832_s22, %s12832_s22, %s8663_s20  }
 0x6b7 PF: > { %p8392_p1 = scmp.ge.s32.totalorder %s8656_s28, 2  ;;  %s7665_s0 = sand.u32 1, %s8644_s25  }
 0x6b8   : > { %s7666_s15 = scalar_lea.sflag [#allocation3], %s7665_s0 }
 0x6b9   : > { %p8389_p2 = pnand %p8392_p1, %p8776_p6 }
 0x6bb   : > { %8639 = dma.done.wait (!%p8389_p2), %s7666_s15, 1024  }
 0x6bc   : > { %8641 = vsyncadd (!%p8389_p2), %s7666_s15, 4294966272  ;;  %s12833_s18 = sld [smem:[#allocation5_spill]]  ;;  %p23_p3 = scmp.ge.s32.totalorder %s8759_s14, 4  }
 0x6bd   : > { %s12834_s25 = smov %s8648_s26  ;;  %s12835_s26 = smov %s8652_s27 }
 0x6be   : > { %s12837_s28 = smov %s8759_s14  ;;  %25 = sbr.rel (!%p23_p3) target bundleno = 5 (0x5), region = 107 }
 0x6c2   : > { %s12836_s27 = smov %s12833_s18 }
 0x6c5   :  { %7671 = vsyncpa [#allocation3], 1 }
 0x6c6   :  { %7673 = vsyncpa [#allocation3 + $0x1], 1 }

</bundles_post_ra>
